<compile_context>
chip_gen: v7x
topology: tpu7x:2x2x1
jax: 0.10.0
libtpu: 0.0.40
codegen_flags: <defaults>
</compile_context>

<pallas_src>
import jax
import jax.numpy as jnp
import numpy as np
from jax import lax
from jax.experimental import pallas as pl
from jax.experimental.pallas import tpu as pltpu

K = 3          # conv kernel size (stride 1, padding 1 -> "SAME")
LANE = 128     # TPU lane width


def _round_up(x, m):
    return (x + m - 1) // m * m


def _num_tensorcores():
    """Best-effort TensorCores-per-chip (v7x: 2, v5e/v6e: 1). Defaults to 1."""
    try:
        info = pltpu.get_tpu_info()
        for attr in ("num_cores", "core_count", "num_tensorcores", "tensor_core_count"):
            v = getattr(info, attr, None)
            if isinstance(v, int) and v > 0:
                return v
    except Exception:
        pass
    try:
        if "v7" in jax.devices()[0].device_kind.lower():
            return 2
    except Exception:
        pass
    return 1


def image_model_kernel(x_ref, wc_ref, bc_ref, wh_ref, bh_ref, out_ref):
    # x_ref:   (NB, H+2, W+2, C)   bf16 halo-padded NHWC image block
    # wc_ref:  (K*K, C, CMID_PAD)  bf16 conv weight per tap (out-ch zero-padded)
    # bc_ref:  (1, CMID_PAD)       f32 conv bias (0 in padded lanes)
    # wh_ref:  (CMID_PAD, NC_PAD)  f32 classifier weight, pre-scaled by 1/P
    # bh_ref:  (1, NC_PAD)         f32 classifier bias
    # out_ref: (1, NB, NC_PAD)     f32 logits (padded lanes exactly 0)
    nb, hp, wp, c = x_ref.shape
    h, w = hp - 2, wp - 2
    p = h * w
    cmid = bc_ref.shape[1]

    # On-chip im2col: conv(3x3, SAME) as K*K accumulated shifted-slice matmuls.
    # Each tap: (NB*P, C) bf16 @ (C, CMID_PAD) bf16 -> f32 accumulate on the MXU.
    feat = jnp.zeros((nb * p, cmid), jnp.float32)
    for ki in range(K):
        for kj in range(K):
            patch = x_ref[:, ki:ki + h, kj:kj + w, :].reshape(nb * p, c)
            feat = feat + jnp.dot(patch, wc_ref[ki * K + kj],
                                  preferred_element_type=jnp.float32)
    feat = jnp.maximum(feat + bc_ref[...], 0.0)            # bias + ReLU (f32, VPU)

    # Per-image global pooling: sublane sum (XLU); the 1/P mean scale is folded
    # into wh in the wrapper (exact since P is a power of two).
    pooled = jnp.sum(feat.reshape(nb, p, cmid), axis=1)    # (NB, CMID_PAD)

    # Head stays f32 (multi-pass on the MXU; keeps the 1e-3 tolerance comfortably).
    logits = jnp.dot(pooled, wh_ref[...],
                     preferred_element_type=jnp.float32) + bh_ref[...]
    out_ref[0] = logits


def image_model_forward(img_nchw, params):
    """img (N, C, H, W) -> logits (N, num_classes)."""
    wc9, bc, wh, bh = params   # (K*K, C, C_mid), (1, C_mid), (C_mid, NC), (1, NC)
    n, c, h, w = img_nchw.shape
    p = h * w
    c_mid = wc9.shape[2]
    nc = wh.shape[1]
    cmid_pad = _round_up(c_mid, LANE)
    nc_pad = _round_up(nc, LANE)

    # Lane-dense zero padding of weights/bias; fold 1/P pool scale into the head;
    # conv weights in bf16 for the MXU, everything after the conv stays f32.
    wc_p = jnp.pad(wc9, ((0, 0), (0, 0), (0, cmid_pad - c_mid))).astype(jnp.bfloat16)
    bc_p = jnp.pad(bc, ((0, 0), (0, cmid_pad - c_mid))).astype(jnp.float32)
    wh_p = jnp.pad(wh / float(p),
                   ((0, cmid_pad - c_mid), (0, nc_pad - nc))).astype(jnp.float32)
    bh_p = jnp.pad(bh, ((0, 0), (0, nc_pad - nc))).astype(jnp.float32)

    # Generation-aware grid: 2 parallel steps only on multi-TensorCore chips
    # (v7x); a single step on v5e/v6e where the grid is a serial loop.
    if _num_tensorcores() >= 2 and n >= 2:
        grid_len = 2
        nb = -(-n // 2)          # ceil(n/2); batch zero-padded below if odd
    else:
        grid_len = 1
        nb = n
    n_pad = grid_len * nb

    # NCHW -> NHWC + spatial halo padding only; no im2col blow-up and the KKC
    # contraction dim is never lane-padded in HBM.  bf16 feeds the MXU directly.
    x = jnp.transpose(img_nchw, (0, 2, 3, 1)).astype(jnp.bfloat16)
    x = jnp.pad(x, ((0, n_pad - n), (1, 1), (1, 1), (0, 0)))   # (n_pad, H+2, W+2, C)

    # TODO(synk): at real timm resolutions add an H-row grid axis ("arbitrary")
    # with a pooled f32 accumulator in VMEM scratch (pl.when init/finalize) so
    # the image tile fits v7x's 64 MiB VMEM; unnecessary at 16x16.
    out = pl.pallas_call(
        image_model_kernel,
        out_shape=jax.ShapeDtypeStruct((grid_len, nb, nc_pad), jnp.float32),
        grid_spec=pltpu.PrefetchScalarGridSpec(
            num_scalar_prefetch=0,
            grid=(grid_len,),
            in_specs=[
                pl.BlockSpec((nb, h + 2, w + 2, c), lambda i: (i, 0, 0, 0)),
                # Constant index_maps -> weight/bias blocks stay VMEM-resident.
                pl.BlockSpec((K * K, c, cmid_pad), lambda i: (0, 0, 0)),
                pl.BlockSpec((1, cmid_pad), lambda i: (0, 0)),
                pl.BlockSpec((cmid_pad, nc_pad), lambda i: (0, 0)),
                pl.BlockSpec((1, nc_pad), lambda i: (0, 0)),
            ],
            out_specs=pl.BlockSpec((1, nb, nc_pad), lambda i: (i, 0, 0)),
        ),
        compiler_params=pltpu.CompilerParams(
            dimension_semantics=("parallel",),
            vmem_limit_bytes=32 * 1024 * 1024,   # explicit; > v5e's 16 MiB default
        ),
    )(x, wc_p, bc_p, wh_p, bh_p)
    return out.reshape(n_pad, nc_pad)[:n, :nc]               # (N, num_classes)


def make_params(key, c_in, c_mid, num_classes):
    k1, k2, k3, k4 = jax.random.split(key, 4)
    # conv weight in (K, K, C_in, C_mid) HWIO order; kernel consumes it per tap.
    wc_hwio = jax.random.normal(k1, (K, K, c_in, c_mid), jnp.float32) * 0.1
    wc9 = wc_hwio.reshape(K * K, c_in, c_mid)
    bc = jax.random.normal(k2, (1, c_mid), jnp.float32) * 0.1
    wh = jax.random.normal(k3, (c_mid, num_classes), jnp.float32) * 0.1
    bh = jax.random.normal(k4, (1, num_classes), jnp.float32) * 0.1
    return (wc9, bc, wh, bh), wc_hwio


def reference_forward(img_nchw, wc_hwio, bc, wh, bh):
    """Pure-JAX reference; conv operands bf16-rounded to mirror the kernel's MXU dtypes."""
    x = jnp.transpose(img_nchw, (0, 2, 3, 1)).astype(jnp.float32)   # NHWC
    xb = x.astype(jnp.bfloat16).astype(jnp.float32)
    wb = wc_hwio.astype(jnp.bfloat16).astype(jnp.float32)
    y = lax.conv_general_dilated(
        xb, wb, window_strides=(1, 1), padding="SAME",
        dimension_numbers=("NHWC", "HWIO", "NHWC"),
        precision=lax.Precision.HIGHEST)
    y = jnp.maximum(y + bc.reshape(1, 1, 1, -1), 0.0)
    pooled = jnp.mean(y, axis=(1, 2))                               # (N, C_mid)
    return jnp.matmul(pooled, wh, precision=lax.Precision.HIGHEST) + bh


if __name__ == "__main__":
    # Small shapes consistent with the module's forward: batch=2, C=4, 16x16 image,
    # hidden_dims=[64, 8] -> num_classes = hidden_dims[-1] = 8, conv width 32.
    N, C, H, W = 2, 4, 16, 16
    C_MID, NUM_CLASSES = 32, 8

    key = jax.random.PRNGKey(0)
    k_img, k_par = jax.random.split(key)
    img = jax.random.normal(k_img, (N, C, H, W), jnp.float32)       # PyTorch-style NCHW

    params, wc_hwio = make_params(k_par, C, C_MID, NUM_CLASSES)

    out = jax.block_until_ready(image_model_forward(img, params))

    ref = reference_forward(img, wc_hwio, params[1], params[2], params[3])
    np.testing.assert_allclose(np.asarray(out), np.asarray(ref), rtol=1e-3, atol=1e-3)
    assert out.shape == (N, NUM_CLASSES)

    print("KERNEL_OK")
</pallas_src>

<mosaic_0001>
module attributes {stable_mosaic.version = 11 : i64} {
  func.func @image_model_kernel(%arg0: i32, %arg1: memref<2x18x18x4xbf16, #tpu.memory_space<vmem>>, %arg2: memref<9x4x128xbf16, #tpu.memory_space<vmem>>, %arg3: memref<1x128xf32, #tpu.memory_space<vmem>>, %arg4: memref<128x128xf32, #tpu.memory_space<vmem>>, %arg5: memref<1x128xf32, #tpu.memory_space<vmem>>, %arg6: memref<1x2x128xf32, #tpu.memory_space<vmem>>) attributes {dimension_semantics = [#tpu.dimension_semantics<parallel>], iteration_bounds = array<i64: 1>, scalar_prefetch = 0 : i64, scratch_operands = 0 : i64, tpu.core_type = #tpu.core_type<tc>, window_params = [{transform_indices = @transform_0, window_bounds = array<i64: 2, 18, 18, 4>}, {pipeline_mode = #tpu.pipeline_mode<synchronous>, transform_indices = @transform_1, window_bounds = array<i64: 9, 4, 128>}, {pipeline_mode = #tpu.pipeline_mode<synchronous>, transform_indices = @transform_2, window_bounds = array<i64: 1, 128>}, {pipeline_mode = #tpu.pipeline_mode<synchronous>, transform_indices = @transform_3, window_bounds = array<i64: 128, 128>}, {pipeline_mode = #tpu.pipeline_mode<synchronous>, transform_indices = @transform_4, window_bounds = array<i64: 1, 128>}, {transform_indices = @transform_5, window_bounds = array<i64: 1, 2, 128>}]} {
    %cst = arith.constant 0.000000e+00 : f32
    %0 = vector.broadcast %cst : f32 to vector<512x128xf32>
    %c0 = arith.constant 0 : index
    %c0_0 = arith.constant 0 : index
    %c0_1 = arith.constant 0 : index
    %c0_2 = arith.constant 0 : index
    %1 = vector.load %arg1[%c0, %c0_0, %c0_1, %c0_2] : memref<2x18x18x4xbf16, #tpu.memory_space<vmem>>, vector<2x16x16x4xbf16>
    %2 = vector.shape_cast %1 : vector<2x16x16x4xbf16> to vector<512x4xbf16>
    %c0_3 = arith.constant 0 : index
    %c0_4 = arith.constant 0 : index
    %c0_5 = arith.constant 0 : index
    %3 = vector.load %arg2[%c0_3, %c0_4, %c0_5] : memref<9x4x128xbf16, #tpu.memory_space<vmem>>, vector<1x4x128xbf16>
    %4 = vector.shape_cast %3 : vector<1x4x128xbf16> to vector<4x128xbf16>
    %cst_6 = arith.constant dense<0.000000e+00> : vector<512x128xf32>
    %5 = tpu.matmul %2, %4, %cst_6 {dimension_numbers = #tpu.dot_dimension_numbers<[1], [0], [0], [1], [0, 0, 1, 1], [], []>} : vector<512x4xbf16>, vector<4x128xbf16>, vector<512x128xf32> -> vector<512x128xf32>
    %6 = arith.addf %0, %5 : vector<512x128xf32>
    %c0_7 = arith.constant 0 : index
    %c0_8 = arith.constant 0 : index
    %c1 = arith.constant 1 : index
    %c0_9 = arith.constant 0 : index
    %7 = vector.load %arg1[%c0_7, %c0_8, %c1, %c0_9] : memref<2x18x18x4xbf16, #tpu.memory_space<vmem>>, vector<2x16x16x4xbf16>
    %8 = vector.shape_cast %7 : vector<2x16x16x4xbf16> to vector<512x4xbf16>
    %c1_10 = arith.constant 1 : index
    %c0_11 = arith.constant 0 : index
    %c0_12 = arith.constant 0 : index
    %9 = vector.load %arg2[%c1_10, %c0_11, %c0_12] : memref<9x4x128xbf16, #tpu.memory_space<vmem>>, vector<1x4x128xbf16>
    %10 = vector.shape_cast %9 : vector<1x4x128xbf16> to vector<4x128xbf16>
    %cst_13 = arith.constant dense<0.000000e+00> : vector<512x128xf32>
    %11 = tpu.matmul %8, %10, %cst_13 {dimension_numbers = #tpu.dot_dimension_numbers<[1], [0], [0], [1], [0, 0, 1, 1], [], []>} : vector<512x4xbf16>, vector<4x128xbf16>, vector<512x128xf32> -> vector<512x128xf32>
    %12 = arith.addf %6, %11 : vector<512x128xf32>
    %c0_14 = arith.constant 0 : index
    %c0_15 = arith.constant 0 : index
    %c2 = arith.constant 2 : index
    %c0_16 = arith.constant 0 : index
    %13 = vector.load %arg1[%c0_14, %c0_15, %c2, %c0_16] : memref<2x18x18x4xbf16, #tpu.memory_space<vmem>>, vector<2x16x16x4xbf16>
    %14 = vector.shape_cast %13 : vector<2x16x16x4xbf16> to vector<512x4xbf16>
    %c2_17 = arith.constant 2 : index
    %c0_18 = arith.constant 0 : index
    %c0_19 = arith.constant 0 : index
    %15 = vector.load %arg2[%c2_17, %c0_18, %c0_19] : memref<9x4x128xbf16, #tpu.memory_space<vmem>>, vector<1x4x128xbf16>
    %16 = vector.shape_cast %15 : vector<1x4x128xbf16> to vector<4x128xbf16>
    %cst_20 = arith.constant dense<0.000000e+00> : vector<512x128xf32>
    %17 = tpu.matmul %14, %16, %cst_20 {dimension_numbers = #tpu.dot_dimension_numbers<[1], [0], [0], [1], [0, 0, 1, 1], [], []>} : vector<512x4xbf16>, vector<4x128xbf16>, vector<512x128xf32> -> vector<512x128xf32>
    %18 = arith.addf %12, %17 : vector<512x128xf32>
    %c0_21 = arith.constant 0 : index
    %c1_22 = arith.constant 1 : index
    %c0_23 = arith.constant 0 : index
    %c0_24 = arith.constant 0 : index
    %19 = vector.load %arg1[%c0_21, %c1_22, %c0_23, %c0_24] : memref<2x18x18x4xbf16, #tpu.memory_space<vmem>>, vector<2x16x16x4xbf16>
    %20 = vector.shape_cast %19 : vector<2x16x16x4xbf16> to vector<512x4xbf16>
    %c3 = arith.constant 3 : index
    %c0_25 = arith.constant 0 : index
    %c0_26 = arith.constant 0 : index
    %21 = vector.load %arg2[%c3, %c0_25, %c0_26] : memref<9x4x128xbf16, #tpu.memory_space<vmem>>, vector<1x4x128xbf16>
    %22 = vector.shape_cast %21 : vector<1x4x128xbf16> to vector<4x128xbf16>
    %cst_27 = arith.constant dense<0.000000e+00> : vector<512x128xf32>
    %23 = tpu.matmul %20, %22, %cst_27 {dimension_numbers = #tpu.dot_dimension_numbers<[1], [0], [0], [1], [0, 0, 1, 1], [], []>} : vector<512x4xbf16>, vector<4x128xbf16>, vector<512x128xf32> -> vector<512x128xf32>
    %24 = arith.addf %18, %23 : vector<512x128xf32>
    %c0_28 = arith.constant 0 : index
    %c1_29 = arith.constant 1 : index
    %c1_30 = arith.constant 1 : index
    %c0_31 = arith.constant 0 : index
    %25 = vector.load %arg1[%c0_28, %c1_29, %c1_30, %c0_31] : memref<2x18x18x4xbf16, #tpu.memory_space<vmem>>, vector<2x16x16x4xbf16>
    %26 = vector.shape_cast %25 : vector<2x16x16x4xbf16> to vector<512x4xbf16>
    %c4 = arith.constant 4 : index
    %c0_32 = arith.constant 0 : index
    %c0_33 = arith.constant 0 : index
    %27 = vector.load %arg2[%c4, %c0_32, %c0_33] : memref<9x4x128xbf16, #tpu.memory_space<vmem>>, vector<1x4x128xbf16>
    %28 = vector.shape_cast %27 : vector<1x4x128xbf16> to vector<4x128xbf16>
    %cst_34 = arith.constant dense<0.000000e+00> : vector<512x128xf32>
    %29 = tpu.matmul %26, %28, %cst_34 {dimension_numbers = #tpu.dot_dimension_numbers<[1], [0], [0], [1], [0, 0, 1, 1], [], []>} : vector<512x4xbf16>, vector<4x128xbf16>, vector<512x128xf32> -> vector<512x128xf32>
    %30 = arith.addf %24, %29 : vector<512x128xf32>
    %c0_35 = arith.constant 0 : index
    %c1_36 = arith.constant 1 : index
    %c2_37 = arith.constant 2 : index
    %c0_38 = arith.constant 0 : index
    %31 = vector.load %arg1[%c0_35, %c1_36, %c2_37, %c0_38] : memref<2x18x18x4xbf16, #tpu.memory_space<vmem>>, vector<2x16x16x4xbf16>
    %32 = vector.shape_cast %31 : vector<2x16x16x4xbf16> to vector<512x4xbf16>
    %c5 = arith.constant 5 : index
    %c0_39 = arith.constant 0 : index
    %c0_40 = arith.constant 0 : index
    %33 = vector.load %arg2[%c5, %c0_39, %c0_40] : memref<9x4x128xbf16, #tpu.memory_space<vmem>>, vector<1x4x128xbf16>
    %34 = vector.shape_cast %33 : vector<1x4x128xbf16> to vector<4x128xbf16>
    %cst_41 = arith.constant dense<0.000000e+00> : vector<512x128xf32>
    %35 = tpu.matmul %32, %34, %cst_41 {dimension_numbers = #tpu.dot_dimension_numbers<[1], [0], [0], [1], [0, 0, 1, 1], [], []>} : vector<512x4xbf16>, vector<4x128xbf16>, vector<512x128xf32> -> vector<512x128xf32>
    %36 = arith.addf %30, %35 : vector<512x128xf32>
    %c0_42 = arith.constant 0 : index
    %c2_43 = arith.constant 2 : index
    %c0_44 = arith.constant 0 : index
    %c0_45 = arith.constant 0 : index
    %37 = vector.load %arg1[%c0_42, %c2_43, %c0_44, %c0_45] : memref<2x18x18x4xbf16, #tpu.memory_space<vmem>>, vector<2x16x16x4xbf16>
    %38 = vector.shape_cast %37 : vector<2x16x16x4xbf16> to vector<512x4xbf16>
    %c6 = arith.constant 6 : index
    %c0_46 = arith.constant 0 : index
    %c0_47 = arith.constant 0 : index
    %39 = vector.load %arg2[%c6, %c0_46, %c0_47] : memref<9x4x128xbf16, #tpu.memory_space<vmem>>, vector<1x4x128xbf16>
    %40 = vector.shape_cast %39 : vector<1x4x128xbf16> to vector<4x128xbf16>
    %cst_48 = arith.constant dense<0.000000e+00> : vector<512x128xf32>
    %41 = tpu.matmul %38, %40, %cst_48 {dimension_numbers = #tpu.dot_dimension_numbers<[1], [0], [0], [1], [0, 0, 1, 1], [], []>} : vector<512x4xbf16>, vector<4x128xbf16>, vector<512x128xf32> -> vector<512x128xf32>
    %42 = arith.addf %36, %41 : vector<512x128xf32>
    %c0_49 = arith.constant 0 : index
    %c2_50 = arith.constant 2 : index
    %c1_51 = arith.constant 1 : index
    %c0_52 = arith.constant 0 : index
    %43 = vector.load %arg1[%c0_49, %c2_50, %c1_51, %c0_52] : memref<2x18x18x4xbf16, #tpu.memory_space<vmem>>, vector<2x16x16x4xbf16>
    %44 = vector.shape_cast %43 : vector<2x16x16x4xbf16> to vector<512x4xbf16>
    %c7 = arith.constant 7 : index
    %c0_53 = arith.constant 0 : index
    %c0_54 = arith.constant 0 : index
    %45 = vector.load %arg2[%c7, %c0_53, %c0_54] : memref<9x4x128xbf16, #tpu.memory_space<vmem>>, vector<1x4x128xbf16>
    %46 = vector.shape_cast %45 : vector<1x4x128xbf16> to vector<4x128xbf16>
    %cst_55 = arith.constant dense<0.000000e+00> : vector<512x128xf32>
    %47 = tpu.matmul %44, %46, %cst_55 {dimension_numbers = #tpu.dot_dimension_numbers<[1], [0], [0], [1], [0, 0, 1, 1], [], []>} : vector<512x4xbf16>, vector<4x128xbf16>, vector<512x128xf32> -> vector<512x128xf32>
    %48 = arith.addf %42, %47 : vector<512x128xf32>
    %c0_56 = arith.constant 0 : index
    %c2_57 = arith.constant 2 : index
    %c2_58 = arith.constant 2 : index
    %c0_59 = arith.constant 0 : index
    %49 = vector.load %arg1[%c0_56, %c2_57, %c2_58, %c0_59] : memref<2x18x18x4xbf16, #tpu.memory_space<vmem>>, vector<2x16x16x4xbf16>
    %50 = vector.shape_cast %49 : vector<2x16x16x4xbf16> to vector<512x4xbf16>
    %c8 = arith.constant 8 : index
    %c0_60 = arith.constant 0 : index
    %c0_61 = arith.constant 0 : index
    %51 = vector.load %arg2[%c8, %c0_60, %c0_61] : memref<9x4x128xbf16, #tpu.memory_space<vmem>>, vector<1x4x128xbf16>
    %52 = vector.shape_cast %51 : vector<1x4x128xbf16> to vector<4x128xbf16>
    %cst_62 = arith.constant dense<0.000000e+00> : vector<512x128xf32>
    %53 = tpu.matmul %50, %52, %cst_62 {dimension_numbers = #tpu.dot_dimension_numbers<[1], [0], [0], [1], [0, 0, 1, 1], [], []>} : vector<512x4xbf16>, vector<4x128xbf16>, vector<512x128xf32> -> vector<512x128xf32>
    %54 = arith.addf %48, %53 : vector<512x128xf32>
    %c0_63 = arith.constant 0 : index
    %c0_64 = arith.constant 0 : index
    %55 = vector.load %arg3[%c0_63, %c0_64] : memref<1x128xf32, #tpu.memory_space<vmem>>, vector<1x128xf32>
    %56 = vector.broadcast %55 : vector<1x128xf32> to vector<512x128xf32>
    %57 = arith.addf %54, %56 : vector<512x128xf32>
    %cst_65 = arith.constant 0.000000e+00 : f32
    %58 = vector.broadcast %cst_65 : f32 to vector<512x128xf32>
    %59 = arith.maximumf %57, %58 : vector<512x128xf32>
    %60 = vector.shape_cast %59 : vector<512x128xf32> to vector<2x256x128xf32>
    %cst_66 = arith.constant dense<0.000000e+00> : vector<2x128xf32>
    %61 = vector.multi_reduction <add>, %60, %cst_66 [1] : vector<2x256x128xf32> to vector<2x128xf32>
    %c0_67 = arith.constant 0 : index
    %c0_68 = arith.constant 0 : index
    %62 = vector.load %arg4[%c0_67, %c0_68] : memref<128x128xf32, #tpu.memory_space<vmem>>, vector<128x128xf32>
    %cst_69 = arith.constant dense<0.000000e+00> : vector<2x128xf32>
    %63 = tpu.matmul %61, %62, %cst_69 {dimension_numbers = #tpu.dot_dimension_numbers<[1], [0], [0], [1], [0, 0, 1, 1], [], []>} : vector<2x128xf32>, vector<128x128xf32>, vector<2x128xf32> -> vector<2x128xf32>
    %c0_70 = arith.constant 0 : index
    %c0_71 = arith.constant 0 : index
    %64 = vector.load %arg5[%c0_70, %c0_71] : memref<1x128xf32, #tpu.memory_space<vmem>>, vector<1x128xf32>
    %65 = vector.broadcast %64 : vector<1x128xf32> to vector<2x128xf32>
    %66 = arith.addf %63, %65 : vector<2x128xf32>
    %c0_72 = arith.constant 0 : index
    %c0_73 = arith.constant 0 : index
    %c0_74 = arith.constant 0 : index
    %67 = vector.load %arg6[%c0_72, %c0_73, %c0_74] : memref<1x2x128xf32, #tpu.memory_space<vmem>>, vector<1x2x128xf32>
    %68 = vector.shape_cast %67 : vector<1x2x128xf32> to vector<2x128xf32>
    %69 = vector.shape_cast %66 : vector<2x128xf32> to vector<1x2x128xf32>
    tpu.vector_store %arg6[%c0_72, %c0_73, %c0_74], %69 {strides = array<i32>} : memref<1x2x128xf32, #tpu.memory_space<vmem>>, vector<1x2x128xf32>,
    return
  }
  func.func @transform_0(%arg0: i32) -> (i32, i32, i32, i32) {
    %c0_i32 = arith.constant 0 : i32
    %c0_i32_0 = arith.constant 0 : i32
    %c0_i32_1 = arith.constant 0 : i32
    %c0_i32_2 = arith.constant 0 : i32
    return %arg0, %c0_i32, %c0_i32_0, %c0_i32_1 : i32, i32, i32, i32
  }
  func.func @transform_1(%arg0: i32) -> (i32, i32, i32) {
    %c0_i32 = arith.constant 0 : i32
    %c0_i32_0 = arith.constant 0 : i32
    %c0_i32_1 = arith.constant 0 : i32
    %c0_i32_2 = arith.constant 0 : i32
    return %c0_i32, %c0_i32_0, %c0_i32_1 : i32, i32, i32
  }
  func.func @transform_2(%arg0: i32) -> (i32, i32) {
    %c0_i32 = arith.constant 0 : i32
    %c0_i32_0 = arith.constant 0 : i32
    %c0_i32_1 = arith.constant 0 : i32
    return %c0_i32, %c0_i32_0 : i32, i32
  }
  func.func @transform_3(%arg0: i32) -> (i32, i32) {
    %c0_i32 = arith.constant 0 : i32
    %c0_i32_0 = arith.constant 0 : i32
    %c0_i32_1 = arith.constant 0 : i32
    return %c0_i32, %c0_i32_0 : i32, i32
  }
  func.func @transform_4(%arg0: i32) -> (i32, i32) {
    %c0_i32 = arith.constant 0 : i32
    %c0_i32_0 = arith.constant 0 : i32
    %c0_i32_1 = arith.constant 0 : i32
    return %c0_i32, %c0_i32_0 : i32, i32
  }
  func.func @transform_5(%arg0: i32) -> (i32, i32, i32) {
    %c0_i32 = arith.constant 0 : i32
    %c0_i32_0 = arith.constant 0 : i32
    %c0_i32_1 = arith.constant 0 : i32
    return %arg0, %c0_i32, %c0_i32_0 : i32, i32, i32
  }
}

</mosaic_0001>

<bundles_post_ra>
// kernel: tpu_custom_call.1
= control target key start
LH: loop header
LB: loop body
LE: loop exit
PB: predicated region body
PF: predicated region fallthrough
CT: control target
= control target key end

     0   :  { %vm1085_vm0 = vcmask 1041408   ;;  %vm119_vm1 = vsmask.f32 3328  ;;  %vm120_vm2 = vsmask.f32 7440  ;;  %vm988_vm4 = vcmask 31744   ;;  %s16388_s0 = inlined_call_operand.vmem [shape: bf16[2,18,18,4], index: 0, kind: input, shape index: {}]   ;;  %s16389_s1 = inlined_call_operand.vmem [shape: bf16[9,4,128], index: 1, kind: input, shape index: {}]   ;;  %s16390_s2 = inlined_call_operand.vmem [shape: f32[1,128], index: 2, kind: input, shape index: {}]   ;;  %s16391_s3 = inlined_call_operand.vmem [shape: f32[128,128], index: 3, kind: input, shape index: {}]   ;;  %s16392_s4 = inlined_call_operand.vmem [shape: f32[1,128], index: 4, kind: input, shape index: {}]   ;;  %s16393_s5 = inlined_call_operand.hbm [shape: f32[1,2,128], index: 5, kind: output, shape index: {}]  }
   0x1   :  { %v9562_v0 = vld [vmem:[%s16389_s1 + $0x8] sm:$0x3]  ;;  %v9111_v1 = vld [vmem:[%s16389_s1 + $0x2] sm:$0x3]  ;;  %v23_v5 = vld [vmem:[%s16388_s0 + $0x4] sm:$0xf] }
   0x2   :  { %11662 = vmatprep.subr.msk.bf16.mxu0 %vm1085_vm0, %v9562_v0  ;;  %11658 = vmatprep.subr.msk.bf16.mxu1 %vm1085_vm0, %v9111_v1  ;;  %v12052_v2 = vsel %vm1085_vm0, %v9562_v0, 0  ;;  %v1087_v3 = vsel %vm1085_vm0, %v9111_v1, 0  ;;  %v22_v4 = vld [vmem:[%s16388_s0] sm:$0xf]  ;;  %v87_v6 = vld [vmem:[%s16388_s0 + $0x8] sm:$0x1]  ;;  %vm12093_vm3 = vmor %vm119_vm1, %vm120_vm2 }
   0x3   :  { %16402 = vst [vmem:[#allocation5_spill] sm:$0xff] %v12052_v2  ;;  %10756 = vmatpush3.bf16.msra.mxu0 %v12052_v2  ;;  %10492 = vmatpush3.bf16.msra.mxu1 %v1087_v3  ;;  %v123_v7 = vshrl.u32 %v22_v4, 16  ;;  %v126_v8 = vshll.u32 %v22_v4, 16  ;;  %v132_v9 = vshll.u32 %v23_v5, 16  ;;  %v136_v10 = vshrl.u32 %v23_v5, 16 }
   0x4   :  { %v9466_v11 = vld [vmem:[%s16388_s0 + $0xc] sm:$0xf]  ;;  %v142_v12 = vshll.u32 %v87_v6, 16  ;;  %v12071_v13 = vld [vmem:[%s16388_s0 + $0x10] sm:$0xf]  ;;  %vm2022_vm5 = vcmask 1042432  }
   0x5   :  { %v12076_v14 = vld [vmem:[%s16388_s0 + $0x14] sm:$0x1]  ;;  %v125_v15 = vrot.slane %v123_v7, 4  ;;  %v128_v16 = vrot.slane %v126_v8, 5  ;;  %v134_v17 = vrot.slane %v132_v9, 5  ;;  %v138_v18 = vrot.slane %v136_v10, 4 }
   0x6   :  { %v12081_v19 = vld [vmem:[%s16389_s1 + $0xa] sm:$0x3]  ;;  %v144_v20 = vrot.slane %v142_v12, 5  ;;  %v3575_v21 = vshrl.u32 %v9466_v11, 16  ;;  %v3578_v22 = vshll.u32 %v9466_v11, 16  ;;  %v3584_v23 = vshll.u32 %v12071_v13, 16 }
   0x7   :  { %11664 = vmatprep.subr.msk.bf16.mxu0 %vm1085_vm0, %v12081_v19  ;;  %v129_v24 = vor.u32 %v128_v16, %v125_v15  ;;  %v139_v25 = vor.u32 %v138_v18, %v134_v17  ;;  %v3588_v26 = vshrl.u32 %v12071_v13, 16  ;;  %v3594_v27 = vshll.u32 %v12076_v14, 16  ;;  %v24_v28 = vld [vmem:[%s16388_s0 + $0xc] sm:$0xf]  ;;  %v25_v33 = vld [vmem:[%s16388_s0 + $0x10] sm:$0xf] }
   0x8   :  { %v3577_v30 = vrot.slane %v3575_v21, 4  ;;  %v3580_v31 = vrot.slane %v3578_v22, 5  ;;  %v3586_v32 = vrot.slane %v3584_v23, 5  ;;  %v88_v39 = vld [vmem:[%s16388_s0 + $0x14] sm:$0x1]  ;;  %v147_v40 = vshrl.u32 %v24_v28, 16 }
   0x9   :  { %v130_v34 = vrot.slane %v129_v24, 4  ;;  %v140_v35 = vrot.slane %v139_v25, 4  ;;  %v3590_v36 = vrot.slane %v3588_v26, 4  ;;  %v3596_v38 = vrot.slane %v3594_v27, 5  ;;  %v9469_v50 = vld [vmem:[%s16388_s0 + $0x18] sm:$0xf] }
   0xa   :  { %v3581_v37 = vor.u32 %v3580_v31, %v3577_v30  ;;  %v150_v41 = vshll.u32 %v24_v28, 16  ;;  %v156_v45 = vshll.u32 %v25_v33, 16  ;;  %v149_v48 = vrot.slane %v147_v40, 4  ;;  %v12113_v55 = vld [vmem:[%s16388_s0 + $0x1c] sm:$0xf] }
   0xb   :  { %v135_v42 = vsel %vm12093_vm3, %v130_v34, %v134_v17  ;;  %v145_v43 = vsel %vm12093_vm3, %v140_v35, %v144_v20  ;;  %v3591_v44 = vor.u32 %v3590_v36, %v3586_v32  ;;  %v160_v53 = vshrl.u32 %v25_v33, 16  ;;  %v12123_v60 = vld [vmem:[%s16388_s0 + $0x20] sm:$0x1]  ;;  %v26_v10 = vld [vmem:[%s16388_s0 + $0x18] sm:$0xf] }
   0xc   :  { %v9112_v46 = vcombine.low %v135_v42, %v145_v43  ;;  %v3582_v47 = vrot.slane %v3581_v37, 4  ;;  %v152_v49 = vrot.slane %v150_v41, 5  ;;  %v158_v52 = vrot.slane %v156_v45, 5  ;;  %v27_v17 = vld [vmem:[%s16388_s0 + $0x1c] sm:$0xf] }
   0xd   :  { %v3592_v51 = vrot.slane %v3591_v44, 4  ;;  %v166_v54 = vshll.u32 %v88_v39, 16  ;;  %v5022_v57 = vrot.slane %v12071_v13, 5  ;;  %v5025_v58 = vrot.slane %v12076_v14, 5  ;;  %v89_v26 = vld [vmem:[%s16388_s0 + $0x20] sm:$0x1] }
   0xe   :  { %10493 = vmatprep.mubr.msk.bf16.mxu1 %vm988_vm4, %v9112_v46  ;;  %v3587_v56 = vsel %vm12093_vm3, %v3582_v47, %v3586_v32  ;;  %v153_v59 = vor.u32 %v152_v49, %v149_v48  ;;  %v162_v62 = vrot.slane %v160_v53, 4  ;;  %v3599_v0 = vshrl.u32 %v9469_v50, 16  ;;  %v9472_v33 = vld [vmem:[%s16388_s0 + $0x24] sm:$0xf]  ;;  %v12161_v42 = vld [vmem:[%s16389_s1] sm:$0x3] }
   0xf   :  { %v3597_v61 = vsel %vm12093_vm3, %v3592_v51, %v3596_v38  ;;  %v168_v63 = vrot.slane %v166_v54, 5  ;;  %v3602_v4 = vshll.u32 %v9469_v50, 16  ;;  %v3608_v5 = vshll.u32 %v12113_v55, 16  ;;  %v9474_v45 = vld [vmem:[%s16388_s0 + $0x2c] sm:$0x1]  ;;  %11659 = vmatprep.subr.msk.bf16.mxu1 %vm1085_vm0, %v12161_v42 }
  0x10   :  { %v9563_v1 = vcombine.low %v3587_v56, %v3597_v61  ;;  %v154_v3 = vrot.slane %v153_v59, 4  ;;  %v163_v6 = vor.u32 %v162_v62, %v158_v52  ;;  %v3601_v7 = vrot.slane %v3599_v0, 4  ;;  %v29_v61 = vld [vmem:[%s16388_s0 + $0x28] sm:$0xf] }
  0x11   :  { %v3612_v8 = vshrl.u32 %v12113_v55, 16  ;;  %v3618_v9 = vshll.u32 %v12123_v60, 16  ;;  %v3604_v12 = vrot.slane %v3602_v4, 5  ;;  %v3610_v15 = vrot.slane %v3608_v5, 5  ;;  %v90_v5 = vld [vmem:[%s16388_s0 + $0x2c] sm:$0x1] }
  0x12   :  { %10757 = vmatprep.mubr.msk.bf16.mxu0 %vm988_vm4, %v9563_v1  ;;  %v159_v11 = vsel %vm12093_vm3, %v154_v3, %v158_v52  ;;  %v5029_v16 = vrot.slane %v12113_v55, 5  ;;  %v164_v18 = vrot.slane %v163_v6, 4  ;;  %v5032_v22 = vrot.slane %v12123_v60, 5  ;;  %v28_v52 = vld [vmem:[%s16388_s0 + $0x24] sm:$0xf] }
  0x13   :  { %v3614_v20 = vrot.slane %v3612_v8, 4  ;;  %v3620_v21 = vrot.slane %v3618_v9, 5  ;;  %v3605_v23 = vor.u32 %v3604_v12, %v3601_v7  ;;  %v5439_v25 = vsel %vm1085_vm0, %v12081_v19, 0  ;;  %v9473_v19 = vld [vmem:[%s16388_s0 + $0x28] sm:$0xf] }
  0x14   :  { %v12143_v24 = vrot.slane %v5029_v16, 4  ;;  %v171_v27 = vshrl.u32 %v26_v10, 16  ;;  %v169_v28 = vsel %vm12093_vm3, %v164_v18, %v168_v63  ;;  %v174_v31 = vshll.u32 %v26_v10, 16  ;;  %v9475_v12 = vld [vmem:[%s16388_s0 + $0x30] sm:$0xf] }
  0x15   :  { %v3615_v30 = vor.u32 %v3614_v20, %v3610_v15  ;;  %v180_v32 = vshll.u32 %v27_v17, 16  ;;  %v9113_v34 = vcombine.low %v159_v11, %v169_v28  ;;  %v3606_v35 = vrot.slane %v3605_v23, 4  ;;  %v9629_v60 = vld [vmem:[%s16388_s0 + $0x24] sm:$0xe] }
  0x16   :  { %v173_v36 = vrot.slane %v171_v27, 4  ;;  %v184_v37 = vshrl.u32 %v27_v17, 16  ;;  %v176_v39 = vrot.slane %v174_v31, 5  ;;  %v190_v41 = vshll.u32 %v89_v26, 16 }
  0x17   :  { %v3616_v38 = vrot.slane %v3615_v30, 4  ;;  %v182_v40 = vrot.slane %v180_v32, 5  ;;  %10494 = vmatmul.mubr.msk.bf16.vlgmr.msra.gmra.mrb[0].mxu1 %vm988_vm4, %v9113_v34  ;;  %v3611_v43 = vsel %vm12093_vm3, %v3606_v35, %v3610_v15  ;;  %v3623_v46 = vshrl.u32 %v9472_v33, 16  ;;  %v9477_v35 = vld [vmem:[%s16388_s0 + $0x38] sm:$0x1] }
  0x18   :  { %v186_v44 = vrot.slane %v184_v37, 4  ;;  %v3626_v47 = vshll.u32 %v9472_v33, 16  ;;  %v177_v49 = vor.u32 %v176_v39, %v173_v36  ;;  %v192_v50 = vrot.slane %v190_v41, 5  ;;  %v30_v41 = vld [vmem:[%s16388_s0 + $0x30] sm:$0xf] }
  0x19   :  { %v3621_v48 = vsel %vm12093_vm3, %v3616_v38, %v3620_v21  ;;  %v3632_v51 = vshll.u32 %v9473_v19, 16  ;;  %v3625_v56 = vrot.slane %v3623_v46, 4  ;;  %v3636_v0 = vshrl.u32 %v9473_v19, 16  ;;  %v9476_v21 = vld [vmem:[%s16388_s0 + $0x34] sm:$0xf] }
  0x1a   :  { %v9564_v53 = vcombine.low %v3611_v43, %v3621_v48  ;;  %v187_v54 = vor.u32 %v186_v44, %v182_v40  ;;  %v3628_v59 = vrot.slane %v3626_v47, 5  ;;  %v178_v62 = vrot.slane %v177_v49, 4  ;;  %v31_v47 = vld [vmem:[%s16388_s0 + $0x34] sm:$0xf] }
  0x1b   :  { %v3634_v63 = vrot.slane %v3632_v51, 5  ;;  %v3642_v1 = vshll.u32 %v9474_v45, 16  ;;  %v195_v6 = vshrl.u32 %v28_v52, 16  ;;  %v198_v7 = vshll.u32 %v28_v52, 16 }
  0x1c   :  { %10758 = vmatmul.mubr.msk.bf16.vlgmr.msra.gmra.mrb[0].mxu0 %vm988_vm4, %v9564_v53  ;;  %v188_v3 = vrot.slane %v187_v54, 4  ;;  %v3629_v4 = vor.u32 %v3628_v59, %v3625_v56  ;;  %v183_v8 = vsel %vm12093_vm3, %v178_v62, %v182_v40  ;;  %v3638_v9 = vrot.slane %v3636_v0, 4  ;;  %v91_v54 = vld [vmem:[%s16388_s0 + $0x38] sm:$0x1] }
  0x1d   :  { %10822 = vmatpush3.bf16.msra.mxu0 %v5439_v25  ;;  %v3644_v10 = vrot.slane %v3642_v1, 5  ;;  %v204_v11 = vshll.u32 %v29_v61, 16  ;;  %v197_v18 = vrot.slane %v195_v6, 4  ;;  %v200_v20 = vrot.slane %v198_v7, 5  ;;  %v9478_v1 = vld [vmem:[%s16388_s0 + $0x3c] sm:$0xf] }
  0x1e   :  { %v193_v15 = vsel %vm12093_vm3, %v188_v3, %v192_v50  ;;  %v3630_v17 = vrot.slane %v3629_v4, 4  ;;  %v3639_v25 = vor.u32 %v3638_v9, %v3634_v63  ;;  %v208_v27 = vshrl.u32 %v29_v61, 16  ;;  %v9479_v7 = vld [vmem:[%s16388_s0 + $0x40] sm:$0xf] }
  0x1f   :  { %v9114_v23 = vcombine.low %v183_v8, %v193_v15  ;;  %v206_v26 = vrot.slane %v204_v11, 5  ;;  %v201_v30 = vor.u32 %v200_v20, %v197_v18  ;;  %v214_v31 = vshll.u32 %v90_v5, 16 }
  0x20   :  { %v3635_v28 = vsel %vm12093_vm3, %v3630_v17, %v3634_v63  ;;  %v3647_v32 = vshrl.u32 %v9475_v12, 16  ;;  %v3640_v33 = vrot.slane %v3639_v25, 4  ;;  %v210_v34 = vrot.slane %v208_v27, 4  ;;  %v32_v27 = vld [vmem:[%s16388_s0 + $0x3c] sm:$0xf] }
  0x21   :  { %10497 = vmatprep.mubr.msk.bf16.mxu1 %vm988_vm4, %v9114_v23  ;;  %v3650_v36 = vshll.u32 %v9475_v12, 16  ;;  %v3656_v37 = vshll.u32 %v9476_v21, 16  ;;  %v202_v19 = vrot.slane %v201_v30, 4  ;;  %v216_v38 = vrot.slane %v214_v31, 5  ;;  %v9480_v23 = vld [vmem:[%s16388_s0 + $0x44] sm:$0x1] }
  0x22   :  { %v3649_v39 = vrot.slane %v3647_v32, 4  ;;  %v3660_v40 = vshrl.u32 %v9476_v21, 16  ;;  %v3645_v43 = vsel %vm12093_vm3, %v3640_v33, %v3644_v10  ;;  %v211_v44 = vor.u32 %v210_v34, %v206_v26  ;;  %v33_v33 = vld [vmem:[%s16388_s0 + $0x40] sm:$0xf] }
  0x23   :  { %v3652_v45 = vrot.slane %v3650_v36, 5  ;;  %v3658_v46 = vrot.slane %v3656_v37, 5  ;;  %v9565_v48 = vcombine.low %v3635_v28, %v3645_v43  ;;  %v207_v49 = vsel %vm12093_vm3, %v202_v19, %v206_v26 }
  0x24   :  { %v3662_v50 = vrot.slane %v3660_v40, 4  ;;  %v3666_v51 = vshll.u32 %v9477_v35, 16  ;;  %v212_v52 = vrot.slane %v211_v44, 4  ;;  %v219_v56 = vshrl.u32 %v30_v41, 16 }
  0x25   :  { %v3653_v53 = vor.u32 %v3652_v45, %v3649_v39  ;;  %v222_v59 = vshll.u32 %v30_v41, 16  ;;  %10761 = vmatprep.mubr.msk.bf16.mxu0 %vm988_vm4, %v9565_v48  ;;  %v228_v63 = vshll.u32 %v31_v47, 16  ;;  %v232_v0 = vshrl.u32 %v31_v47, 16  ;;  %v92_v45 = vld [vmem:[%s16388_s0 + $0x44] sm:$0x1] }
  0x26   :  { %v3663_v61 = vor.u32 %v3662_v50, %v3658_v46  ;;  %v3668_v62 = vrot.slane %v3666_v51, 5  ;;  %v217_v3 = vsel %vm12093_vm3, %v212_v52, %v216_v38  ;;  %v221_v5 = vrot.slane %v219_v56, 4  ;;  %v9481_v47 = vld [vmem:[%s16388_s0 + $0x48] sm:$0xf] }
  0x27   :  { %v3654_v4 = vrot.slane %v3653_v53, 4  ;;  %v224_v6 = vrot.slane %v222_v59, 5  ;;  %v9115_v8 = vcombine.low %v207_v49, %v217_v3  ;;  %v230_v10 = vrot.slane %v228_v63, 5  ;;  %v9482_v59 = vld [vmem:[%s16388_s0 + $0x4c] sm:$0xf] }
  0x28   :  { %v3664_v9 = vrot.slane %v3663_v61, 4  ;;  %v234_v11 = vrot.slane %v232_v0, 4  ;;  %v238_v17 = vshll.u32 %v91_v54, 16  ;;  %v3671_v18 = vshrl.u32 %v9478_v1, 16 }
  0x29   :  { %v3659_v12 = vsel %vm12093_vm3, %v3654_v4, %v3658_v46  ;;  %v225_v15 = vor.u32 %v224_v6, %v221_v5  ;;  %10498 = vmatmul.mubr.msk.bf16.gmra.mrb[4].mxu1 %vm988_vm4, %v9115_v8  ;;  %v3674_v25 = vshll.u32 %v9478_v1, 16  ;;  %v3680_v26 = vshll.u32 %v9479_v7, 16  ;;  %v9483_v5 = vld [vmem:[%s16388_s0 + $0x50] sm:$0x1] }
  0x2a   :  { %v3669_v20 = vsel %vm12093_vm3, %v3664_v9, %v3668_v62  ;;  %v235_v21 = vor.u32 %v234_v11, %v230_v10  ;;  %v240_v31 = vrot.slane %v238_v17, 5  ;;  %v3673_v32 = vrot.slane %v3671_v18, 4  ;;  %v35_v18 = vld [vmem:[%s16388_s0 + $0x4c] sm:$0xf] }
  0x2b   :  { %v9566_v28 = vcombine.low %v3659_v12, %v3669_v20  ;;  %v226_v30 = vrot.slane %v225_v15, 4  ;;  %v3676_v35 = vrot.slane %v3674_v25, 5  ;;  %v3682_v36 = vrot.slane %v3680_v26, 5 }
  0x2c   :  { %v236_v34 = vrot.slane %v235_v21, 4  ;;  %v3684_v37 = vshrl.u32 %v9479_v7, 16  ;;  %v3690_v38 = vshll.u32 %v9480_v23, 16  ;;  %v243_v39 = vshrl.u32 %v32_v27, 16 }
  0x2d   :  { %10762 = vmatmul.mubr.msk.bf16.gmra.mrb[4].mxu0 %vm988_vm4, %v9566_v28  ;;  %v231_v19 = vsel %vm12093_vm3, %v226_v30, %v230_v10  ;;  %v246_v40 = vshll.u32 %v32_v27, 16  ;;  %v3677_v43 = vor.u32 %v3676_v35, %v3673_v32  ;;  %v252_v46 = vshll.u32 %v33_v33, 16  ;;  %v93_v30 = vld [vmem:[%s16388_s0 + $0x50] sm:$0x1] }
  0x2e   :  { %v241_v41 = vsel %vm12093_vm3, %v236_v34, %v240_v31  ;;  %v3686_v44 = vrot.slane %v3684_v37, 4  ;;  %v3692_v49 = vrot.slane %v3690_v38, 5  ;;  %v245_v50 = vrot.slane %v243_v39, 4 }
  0x2f   :  { %v9116_v48 = vcombine.low %v231_v19, %v241_v41  ;;  %v248_v51 = vrot.slane %v246_v40, 5  ;;  %v3678_v52 = vrot.slane %v3677_v43, 4  ;;  %v254_v54 = vrot.slane %v252_v46, 5  ;;  %v9485_v40 = vld [vmem:[%s16388_s0 + $0x58] sm:$0xf] }
  0x30   :  { %v3687_v53 = vor.u32 %v3686_v44, %v3682_v36  ;;  %v256_v56 = vshrl.u32 %v33_v33, 16  ;;  %v262_v62 = vshll.u32 %v92_v45, 16  ;;  %v1635_v63 = vsel %vm1085_vm0, %v12161_v42, 0  ;;  %v34_v42 = vld [vmem:[%s16388_s0 + $0x48] sm:$0xf] }
  0x31   :  { %10501 = vmatprep.mubr.msk.bf16.mxu1 %vm988_vm4, %v9116_v48  ;;  %v249_v61 = vor.u32 %v248_v51, %v245_v50  ;;  %v3695_v0 = vshrl.u32 %v9481_v47, 16  ;;  %v3683_v1 = vsel %vm12093_vm3, %v3678_v52, %v3682_v36  ;;  %10558 = vmatpush3.bf16.msra.mxu1 %v1635_v63  ;;  %v3698_v6 = vshll.u32 %v9481_v47, 16  ;;  %v9484_v36 = vld [vmem:[%s16388_s0 + $0x54] sm:$0xf]  ;;  %v9486_v52 = vld [vmem:[%s16388_s0 + $0x5c] sm:$0x1] }
  0x32   :  { %v3688_v3 = vrot.slane %v3687_v53, 4  ;;  %v258_v4 = vrot.slane %v256_v56, 4  ;;  %v264_v8 = vrot.slane %v262_v62, 5  ;;  %v3704_v10 = vshll.u32 %v9482_v59, 16  ;;  %v36_v56 = vld [vmem:[%s16388_s0 + $0x54] sm:$0xf] }
  0x33   :  { %v250_v7 = vrot.slane %v249_v61, 4  ;;  %v3697_v9 = vrot.slane %v3695_v0, 4  ;;  %v3700_v15 = vrot.slane %v3698_v6, 5  ;;  %v3708_v17 = vshrl.u32 %v9482_v59, 16 }
  0x34   :  { %v3693_v11 = vsel %vm12093_vm3, %v3688_v3, %v3692_v49  ;;  %v259_v12 = vor.u32 %v258_v4, %v254_v54  ;;  %v3706_v23 = vrot.slane %v3704_v10, 5  ;;  %v3714_v25 = vshll.u32 %v9483_v5, 16 }
  0x35   :  { %v9567_v20 = vcombine.low %v3683_v1, %v3693_v11  ;;  %v255_v21 = vsel %vm12093_vm3, %v250_v7, %v254_v54  ;;  %v3701_v27 = vor.u32 %v3700_v15, %v3697_v9  ;;  %v3710_v28 = vrot.slane %v3708_v17, 4  ;;  %v9487_v17 = vld [vmem:[%s16388_s0 + $0x60] sm:$0xf] }
  0x36   :  { %v260_v26 = vrot.slane %v259_v12, 4  ;;  %v267_v31 = vshrl.u32 %v34_v42, 16  ;;  %v3716_v32 = vrot.slane %v3714_v25, 5  ;;  %v270_v33 = vshll.u32 %v34_v42, 16  ;;  %v94_v12 = vld [vmem:[%s16388_s0 + $0x5c] sm:$0x1] }
  0x37   :  { %10765 = vmatprep.mubr.msk.bf16.mxu0 %vm988_vm4, %v9567_v20  ;;  %v276_v34 = vshll.u32 %v35_v18, 16  ;;  %v280_v35 = vshrl.u32 %v35_v18, 16  ;;  %v3702_v19 = vrot.slane %v3701_v27, 4  ;;  %v3711_v38 = vor.u32 %v3710_v28, %v3706_v23 }
  0x38   :  { %v265_v37 = vsel %vm12093_vm3, %v260_v26, %v264_v8  ;;  %v269_v39 = vrot.slane %v267_v31, 4  ;;  %v272_v43 = vrot.slane %v270_v33, 5  ;;  %v286_v48 = vshll.u32 %v93_v30, 16  ;;  %v37_v8 = vld [vmem:[%s16388_s0 + $0x58] sm:$0xf] }
  0x39   :  { %v9117_v41 = vcombine.low %v255_v21, %v265_v37  ;;  %v278_v44 = vrot.slane %v276_v34, 5  ;;  %v282_v45 = vrot.slane %v280_v35, 4  ;;  %v3707_v46 = vsel %vm12093_vm3, %v3702_v19, %v3706_v23 }
  0x3a   :  { %v3712_v47 = vrot.slane %v3711_v38, 4  ;;  %v3719_v49 = vshrl.u32 %v9484_v36, 16  ;;  %v273_v50 = vor.u32 %v272_v43, %v269_v39  ;;  %v3722_v53 = vshll.u32 %v9484_v36, 16  ;;  %v9489_v38 = vld [vmem:[%s16388_s0 + $0x68] sm:$0x1] }
  0x3b   :  { %10502 = vmatmul.mubr.msk.bf16.gmra.mrb[8].mxu1 %vm988_vm4, %v9117_v41  ;;  %v283_v51 = vor.u32 %v282_v45, %v278_v44  ;;  %v3728_v54 = vshll.u32 %v9485_v40, 16  ;;  %v288_v61 = vrot.slane %v286_v48, 5  ;;  %v3732_v63 = vshrl.u32 %v9485_v40, 16  ;;  %v38_v39 = vld [vmem:[%s16388_s0 + $0x60] sm:$0xf] }
  0x3c   :  { %v3717_v59 = vsel %vm12093_vm3, %v3712_v47, %v3716_v32  ;;  %v3721_v62 = vrot.slane %v3719_v49, 4  ;;  %v274_v1 = vrot.slane %v273_v50, 4  ;;  %v3724_v4 = vrot.slane %v3722_v53, 5  ;;  %v9488_v32 = vld [vmem:[%s16388_s0 + $0x64] sm:$0xf] }
  0x3d   :  { %v9568_v0 = vcombine.low %v3707_v46, %v3717_v59  ;;  %v284_v3 = vrot.slane %v283_v51, 4  ;;  %v3730_v5 = vrot.slane %v3728_v54, 5  ;;  %v3734_v6 = vrot.slane %v3732_v63, 4 }
  0x3e   :  { %v3738_v7 = vshll.u32 %v9486_v52, 16  ;;  %v291_v9 = vshrl.u32 %v36_v56, 16  ;;  %v279_v10 = vsel %vm12093_vm3, %v274_v1, %v278_v44  ;;  %v3725_v11 = vor.u32 %v3724_v4, %v3721_v62  ;;  %v39_v52 = vld [vmem:[%s16388_s0 + $0x64] sm:$0xf]  ;;  %v9490_v4 = vld [vmem:[%s16388_s0 + $0x6c] sm:$0xf] }
  0x3f   :  { %10766 = vmatmul.mubr.msk.bf16.gmra.mrb[8].mxu0 %vm988_vm4, %v9568_v0  ;;  %v289_v42 = vsel %vm12093_vm3, %v284_v3, %v288_v61  ;;  %v294_v15 = vshll.u32 %v36_v56, 16  ;;  %v3735_v20 = vor.u32 %v3734_v6, %v3730_v5  ;;  %v300_v27 = vshll.u32 %v37_v8, 16  ;;  %v95_v61 = vld [vmem:[%s16388_s0 + $0x68] sm:$0x1] }
  0x40   :  { %v9118_v18 = vcombine.low %v279_v10, %v289_v42  ;;  %v3740_v21 = vrot.slane %v3738_v7, 5  ;;  %v293_v23 = vrot.slane %v291_v9, 4  ;;  %v3726_v25 = vrot.slane %v3725_v11, 4  ;;  %v9491_v9 = vld [vmem:[%s16388_s0 + $0x70] sm:$0xf] }
  0x41   :  { %v296_v26 = vrot.slane %v294_v15, 5  ;;  %v304_v28 = vshrl.u32 %v37_v8, 16  ;;  %v3736_v30 = vrot.slane %v3735_v20, 4  ;;  %v310_v31 = vshll.u32 %v94_v12, 16  ;;  %v9492_v20 = vld [vmem:[%s16388_s0 + $0x74] sm:$0x1] }
  0x42   :  { %10505 = vmatprep.mubr.msk.bf16.mxu1 %vm988_vm4, %v9118_v18  ;;  %v3743_v33 = vshrl.u32 %v9487_v17, 16  ;;  %v3746_v34 = vshll.u32 %v9487_v17, 16  ;;  %v3731_v35 = vsel %vm12093_vm3, %v3726_v25, %v3730_v5  ;;  %v302_v37 = vrot.slane %v300_v27, 5 }
  0x43   :  { %v297_v36 = vor.u32 %v296_v26, %v293_v23  ;;  %v306_v19 = vrot.slane %v304_v28, 4  ;;  %v3741_v40 = vsel %vm12093_vm3, %v3736_v30, %v3740_v21  ;;  %v312_v41 = vrot.slane %v310_v31, 5 }
  0x44   :  { %v3745_v43 = vrot.slane %v3743_v33, 4  ;;  %v3748_v44 = vrot.slane %v3746_v34, 5  ;;  %v9569_v45 = vcombine.low %v3731_v35, %v3741_v40  ;;  %v3752_v48 = vshll.u32 %v9488_v32, 16  ;;  %v40_v33 = vld [vmem:[%s16388_s0 + $0x6c] sm:$0xf] }
  0x45   :  { %v298_v46 = vrot.slane %v297_v36, 4  ;;  %v307_v47 = vor.u32 %v306_v19, %v302_v37  ;;  %v3756_v50 = vshrl.u32 %v9488_v32, 16  ;;  %v3762_v51 = vshll.u32 %v9489_v38, 16  ;;  %v41_v19 = vld [vmem:[%s16388_s0 + $0x70] sm:$0xf] }
  0x46   :  { %v3749_v49 = vor.u32 %v3748_v44, %v3745_v43  ;;  %v315_v53 = vshrl.u32 %v38_v39, 16  ;;  %10769 = vmatprep.mubr.msk.bf16.mxu0 %vm988_vm4, %v9569_v45  ;;  %v3754_v59 = vrot.slane %v3752_v48, 5  ;;  %v318_v62 = vshll.u32 %v38_v39, 16  ;;  %v96_v45 = vld [vmem:[%s16388_s0 + $0x74] sm:$0x1] }
  0x47   :  { %v303_v54 = vsel %vm12093_vm3, %v298_v46, %v302_v37  ;;  %v308_v56 = vrot.slane %v307_v47, 4  ;;  %v3758_v0 = vrot.slane %v3756_v50, 4  ;;  %v3764_v1 = vrot.slane %v3762_v51, 5 }
  0x48   :  { %v3750_v63 = vrot.slane %v3749_v49, 4  ;;  %v317_v3 = vrot.slane %v315_v53, 4  ;;  %v320_v6 = vrot.slane %v318_v62, 5  ;;  %v324_v7 = vshll.u32 %v39_v52, 16 }
  0x49   :  { %v313_v5 = vsel %vm12093_vm3, %v308_v56, %v312_v41  ;;  %v328_v8 = vshrl.u32 %v39_v52, 16  ;;  %v3759_v11 = vor.u32 %v3758_v0, %v3754_v59  ;;  %v334_v12 = vshll.u32 %v95_v61, 16  ;;  %v9493_v52 = vld [vmem:[%s16388_s0 + $0x78] sm:$0xf]  ;;  %v9494_v61 = vld [vmem:[%s16388_s0 + $0x7c] sm:$0xf] }
  0x4a   :  { %v9119_v10 = vcombine.low %v303_v54, %v313_v5  ;;  %v3755_v42 = vsel %vm12093_vm3, %v3750_v63, %v3754_v59  ;;  %v321_v15 = vor.u32 %v320_v6, %v317_v3  ;;  %v326_v17 = vrot.slane %v324_v7, 5  ;;  %v9495_v5 = vld [vmem:[%s16388_s0 + $0x80] sm:$0x1] }
  0x4b   :  { %v330_v18 = vrot.slane %v328_v8, 4  ;;  %v3767_v21 = vshrl.u32 %v9490_v4, 16  ;;  %v3760_v23 = vrot.slane %v3759_v11, 4  ;;  %v336_v25 = vrot.slane %v334_v12, 5  ;;  %v42_v11 = vld [vmem:[%s16388_s0 + $0x78] sm:$0xf] }
  0x4c   :  { %10506 = vmatmul.mubr.msk.bf16.gmra.mrb[12].mxu1 %vm988_vm4, %v9119_v10  ;;  %v3770_v26 = vshll.u32 %v9490_v4, 16  ;;  %v3776_v27 = vshll.u32 %v9491_v9, 16  ;;  %v322_v28 = vrot.slane %v321_v15, 4  ;;  %v3780_v32 = vshrl.u32 %v9491_v9, 16 }
  0x4d   :  { %v331_v30 = vor.u32 %v330_v18, %v326_v17  ;;  %v3769_v31 = vrot.slane %v3767_v21, 4  ;;  %v3765_v34 = vsel %vm12093_vm3, %v3760_v23, %v3764_v1  ;;  %v3786_v37 = vshll.u32 %v9492_v20, 16  ;;  %v43_v20 = vld [vmem:[%s16388_s0 + $0x7c] sm:$0xf] }
  0x4e   :  { %v3772_v35 = vrot.slane %v3770_v26, 5  ;;  %v3778_v36 = vrot.slane %v3776_v27, 5  ;;  %v9570_v38 = vcombine.low %v3755_v42, %v3765_v34  ;;  %v327_v39 = vsel %vm12093_vm3, %v322_v28, %v326_v17  ;;  %v12380_v27 = vld [vmem:[%s16389_s1 + $0xc] sm:$0x3] }
  0x4f   :  { %v332_v40 = vrot.slane %v331_v30, 4  ;;  %v3782_v41 = vrot.slane %v3780_v32, 4  ;;  %v3788_v44 = vrot.slane %v3786_v37, 5  ;;  %v339_v46 = vshrl.u32 %v40_v33, 16  ;;  %11665 = vmatprep.subr.msk.bf16.mxu0 %vm1085_vm0, %v12380_v27 }
  0x50   :  { %v3773_v43 = vor.u32 %v3772_v35, %v3769_v31  ;;  %v342_v47 = vshll.u32 %v40_v33, 16  ;;  %10770 = vmatmul.mubr.msk.bf16.gmra.mrb[12].mxu0 %vm988_vm4, %v9570_v38  ;;  %v348_v50 = vshll.u32 %v41_v19, 16  ;;  %v352_v51 = vshrl.u32 %v41_v19, 16  ;;  %v97_v31 = vld [vmem:[%s16388_s0 + $0x80] sm:$0x1] }
  0x51   :  { %v337_v48 = vsel %vm12093_vm3, %v332_v40, %v336_v25  ;;  %v3783_v49 = vor.u32 %v3782_v41, %v3778_v36  ;;  %v341_v56 = vrot.slane %v339_v46, 4  ;;  %v358_v1 = vshll.u32 %v96_v45, 16  ;;  %v9496_v19 = vld [vmem:[%s16388_s0 + $0x84] sm:$0xf] }
  0x52   :  { %v9120_v53 = vcombine.low %v327_v39, %v337_v48  ;;  %v3774_v54 = vrot.slane %v3773_v43, 4  ;;  %v344_v59 = vrot.slane %v342_v47, 5  ;;  %v350_v63 = vrot.slane %v348_v50, 5  ;;  %v9497_v43 = vld [vmem:[%s16388_s0 + $0x88] sm:$0xf] }
  0x53   :  { %v3784_v62 = vrot.slane %v3783_v49, 4  ;;  %v354_v0 = vrot.slane %v352_v51, 4  ;;  %v3791_v6 = vshrl.u32 %v9493_v52, 16  ;;  %v3794_v7 = vshll.u32 %v9493_v52, 16  ;;  %v9498_v50 = vld [vmem:[%s16388_s0 + $0x8c] sm:$0x1] }
  0x54   :  { %10509 = vmatprep.mubr.msk.bf16.mxu1 %vm988_vm4, %v9120_v53  ;;  %v3779_v3 = vsel %vm12093_vm3, %v3774_v54, %v3778_v36  ;;  %v345_v4 = vor.u32 %v344_v59, %v341_v56  ;;  %v360_v10 = vrot.slane %v358_v1, 5  ;;  %v3800_v42 = vshll.u32 %v9494_v61, 16  ;;  %v44_v1 = vld [vmem:[%s16388_s0 + $0x84] sm:$0xf] }
  0x55   :  { %v3789_v8 = vsel %vm12093_vm3, %v3784_v62, %v3788_v44  ;;  %v355_v9 = vor.u32 %v354_v0, %v350_v63  ;;  %v3793_v17 = vrot.slane %v3791_v6, 4  ;;  %v3796_v18 = vrot.slane %v3794_v7, 5  ;;  %v45_v7 = vld [vmem:[%s16388_s0 + $0x88] sm:$0xf] }
  0x56   :  { %v9571_v12 = vcombine.low %v3779_v3, %v3789_v8  ;;  %v346_v15 = vrot.slane %v345_v4, 4  ;;  %v3802_v23 = vrot.slane %v3800_v42, 5  ;;  %v3804_v25 = vshrl.u32 %v9494_v61, 16 }
  0x57   :  { %v356_v21 = vrot.slane %v355_v9, 4  ;;  %v3810_v26 = vshll.u32 %v9495_v5, 16  ;;  %v3797_v30 = vor.u32 %v3796_v18, %v3793_v17  ;;  %v363_v32 = vshrl.u32 %v42_v11, 16 }
  0x58   :  { %10773 = vmatprep.mubr.msk.bf16.mxu0 %vm988_vm4, %v9571_v12  ;;  %v351_v28 = vsel %vm12093_vm3, %v346_v15, %v350_v63  ;;  %v366_v33 = vshll.u32 %v42_v11, 16  ;;  %v3806_v35 = vrot.slane %v3804_v25, 4  ;;  %v372_v37 = vshll.u32 %v43_v20, 16  ;;  %v98_v11 = vld [vmem:[%s16388_s0 + $0x8c] sm:$0x1] }
  0x59   :  { %v361_v34 = vsel %vm12093_vm3, %v356_v21, %v360_v10  ;;  %v3812_v36 = vrot.slane %v3810_v26, 5  ;;  %v3798_v39 = vrot.slane %v3797_v30, 4  ;;  %v365_v40 = vrot.slane %v363_v32, 4  ;;  %v9499_v26 = vld [vmem:[%s16388_s0 + $0x90] sm:$0xf] }
  0x5a   :  { %v9121_v38 = vcombine.low %v351_v28, %v361_v34  ;;  %v368_v41 = vrot.slane %v366_v33, 5  ;;  %v3807_v44 = vor.u32 %v3806_v35, %v3802_v23  ;;  %v374_v45 = vrot.slane %v372_v37, 5  ;;  %v9500_v33 = vld [vmem:[%s16388_s0 + $0x94] sm:$0xf] }
  0x5b   :  { %v376_v46 = vshrl.u32 %v43_v20, 16  ;;  %v382_v47 = vshll.u32 %v97_v31, 16  ;;  %v3803_v48 = vsel %vm12093_vm3, %v3798_v39, %v3802_v23  ;;  %v3815_v51 = vshrl.u32 %v9496_v19, 16 }
  0x5c   :  { %10510 = vmatmul.mubr.msk.bf16.gmra.mrb[16].mxu1 %vm988_vm4, %v9121_v38  ;;  %v369_v49 = vor.u32 %v368_v41, %v365_v40  ;;  %v3818_v52 = vshll.u32 %v9496_v19, 16  ;;  %v3808_v53 = vrot.slane %v3807_v44, 4  ;;  %v3824_v59 = vshll.u32 %v9497_v43, 16  ;;  %v9501_v40 = vld [vmem:[%s16388_s0 + $0x98] sm:$0x1] }
  0x5d   :  { %v378_v54 = vrot.slane %v376_v46, 4  ;;  %v384_v56 = vrot.slane %v382_v47, 5  ;;  %v3817_v62 = vrot.slane %v3815_v51, 4  ;;  %v3828_v0 = vshrl.u32 %v9497_v43, 16  ;;  %v46_v47 = vld [vmem:[%s16388_s0 + $0x90] sm:$0xf] }
  0x5e   :  { %v370_v61 = vrot.slane %v369_v49, 4  ;;  %v3820_v63 = vrot.slane %v3818_v52, 5  ;;  %v3813_v3 = vsel %vm12093_vm3, %v3808_v53, %v3812_v36  ;;  %v3826_v5 = vrot.slane %v3824_v59, 5  ;;  %v47_v52 = vld [vmem:[%s16388_s0 + $0x94] sm:$0xf] }
  0x5f   :  { %v379_v4 = vor.u32 %v378_v54, %v374_v45  ;;  %v3834_v6 = vshll.u32 %v9498_v50, 16  ;;  %v9572_v8 = vcombine.low %v3803_v48, %v3813_v3  ;;  %v3830_v42 = vrot.slane %v3828_v0, 4 }
  0x60   :  { %v375_v9 = vsel %vm12093_vm3, %v370_v61, %v374_v45  ;;  %v3821_v10 = vor.u32 %v3820_v63, %v3817_v62  ;;  %v387_v17 = vshrl.u32 %v44_v1, 16  ;;  %v390_v18 = vshll.u32 %v44_v1, 16 }
  0x61   :  { %v380_v12 = vrot.slane %v379_v4, 4  ;;  %v3836_v15 = vrot.slane %v3834_v6, 5  ;;  %10774 = vmatmul.mubr.msk.bf16.gmra.mrb[16].mxu0 %vm988_vm4, %v9572_v8  ;;  %v3831_v21 = vor.u32 %v3830_v42, %v3826_v5  ;;  %v396_v23 = vshll.u32 %v45_v7, 16 }
  0x62   :  { %v3822_v20 = vrot.slane %v3821_v10, 4  ;;  %v400_v25 = vshrl.u32 %v45_v7, 16  ;;  %v389_v30 = vrot.slane %v387_v17, 4  ;;  %v392_v31 = vrot.slane %v390_v18, 5  ;;  %v9502_v7 = vld [vmem:[%s16388_s0 + $0x9c] sm:$0xf] }
  0x63   :  { %v385_v28 = vsel %vm12093_vm3, %v380_v12, %v384_v56  ;;  %v406_v32 = vshll.u32 %v98_v11, 16  ;;  %v3832_v36 = vrot.slane %v3831_v21, 4  ;;  %v398_v37 = vrot.slane %v396_v23, 5  ;;  %v9503_v11 = vld [vmem:[%s16388_s0 + $0xa0] sm:$0xf] }
  0x64   :  { %v9122_v34 = vcombine.low %v375_v9, %v385_v28  ;;  %v3827_v35 = vsel %vm12093_vm3, %v3822_v20, %v3826_v5  ;;  %v393_v19 = vor.u32 %v392_v31, %v389_v30  ;;  %v402_v38 = vrot.slane %v400_v25, 4  ;;  %v99_v5 = vld [vmem:[%s16388_s0 + $0x98] sm:$0x1]  ;;  %v9504_v30 = vld [vmem:[%s16388_s0 + $0xa4] sm:$0x1] }
  0x65   :  { %v408_v39 = vrot.slane %v406_v32, 5  ;;  %v3839_v41 = vshrl.u32 %v9499_v26, 16  ;;  %v3837_v43 = vsel %vm12093_vm3, %v3832_v36, %v3836_v15  ;;  %v3842_v44 = vshll.u32 %v9499_v26, 16 }
  0x66   :  { %10513 = vmatprep.mubr.msk.bf16.mxu1 %vm988_vm4, %v9122_v34  ;;  %v3848_v45 = vshll.u32 %v9500_v33, 16  ;;  %v3852_v46 = vshrl.u32 %v9500_v33, 16  ;;  %v9573_v48 = vcombine.low %v3827_v35, %v3837_v43  ;;  %v394_v49 = vrot.slane %v393_v19, 4  ;;  %v48_v33 = vld [vmem:[%s16388_s0 + $0x9c] sm:$0xf] }
  0x67   :  { %v403_v50 = vor.u32 %v402_v38, %v398_v37  ;;  %v3841_v51 = vrot.slane %v3839_v41, 4  ;;  %v3844_v53 = vrot.slane %v3842_v44, 5  ;;  %v3858_v59 = vshll.u32 %v9501_v40, 16  ;;  %v49_v19 = vld [vmem:[%s16388_s0 + $0xa0] sm:$0xf] }
  0x68   :  { %v3850_v54 = vrot.slane %v3848_v45, 5  ;;  %v3854_v56 = vrot.slane %v3852_v46, 4  ;;  %10777 = vmatprep.mubr.msk.bf16.mxu0 %vm988_vm4, %v9573_v48  ;;  %v399_v61 = vsel %vm12093_vm3, %v394_v49, %v398_v37  ;;  %v411_v63 = vshrl.u32 %v46_v47, 16  ;;  %v100_v46 = vld [vmem:[%s16388_s0 + $0xa4] sm:$0x1] }
  0x69   :  { %v404_v62 = vrot.slane %v403_v50, 4  ;;  %v414_v0 = vshll.u32 %v46_v47, 16  ;;  %v3845_v1 = vor.u32 %v3844_v53, %v3841_v51  ;;  %v3860_v4 = vrot.slane %v3858_v59, 5 }
  0x6a   :  { %v3855_v3 = vor.u32 %v3854_v56, %v3850_v54  ;;  %v420_v6 = vshll.u32 %v47_v52, 16  ;;  %v413_v9 = vrot.slane %v411_v63, 4  ;;  %v424_v42 = vshrl.u32 %v47_v52, 16  ;;  %v9505_v52 = vld [vmem:[%s16388_s0 + $0xa8] sm:$0xf] }
  0x6b   :  { %v409_v8 = vsel %vm12093_vm3, %v404_v62, %v408_v39  ;;  %v416_v10 = vrot.slane %v414_v0, 5  ;;  %v3846_v15 = vrot.slane %v3845_v1, 4  ;;  %v430_v23 = vshll.u32 %v99_v5, 16  ;;  %v9506_v1 = vld [vmem:[%s16388_s0 + $0xac] sm:$0xf] }
  0x6c   :  { %v9123_v12 = vcombine.low %v399_v61, %v409_v8  ;;  %v3856_v17 = vrot.slane %v3855_v3, 4  ;;  %v422_v18 = vrot.slane %v420_v6, 5  ;;  %v426_v21 = vrot.slane %v424_v42, 4 }
  0x6d   :  { %v417_v20 = vor.u32 %v416_v10, %v413_v9  ;;  %v3863_v25 = vshrl.u32 %v9502_v7, 16  ;;  %v3851_v26 = vsel %vm12093_vm3, %v3846_v15, %v3850_v54  ;;  %v3866_v31 = vshll.u32 %v9502_v7, 16  ;;  %v9507_v10 = vld [vmem:[%s16388_s0 + $0xb0] sm:$0x1] }
  0x6e   :  { %10514 = vmatmul.mubr.msk.bf16.gmra.mrb[20].mxu1 %vm988_vm4, %v9123_v12  ;;  %v3861_v28 = vsel %vm12093_vm3, %v3856_v17, %v3860_v4  ;;  %v3872_v32 = vshll.u32 %v9503_v11, 16  ;;  %v427_v36 = vor.u32 %v426_v21, %v422_v18  ;;  %v432_v37 = vrot.slane %v430_v23, 5 }
  0x6f   :  { %v9574_v34 = vcombine.low %v3851_v26, %v3861_v28  ;;  %v418_v35 = vrot.slane %v417_v20, 4  ;;  %v3865_v38 = vrot.slane %v3863_v25, 4  ;;  %v3868_v39 = vrot.slane %v3866_v31, 5  ;;  %v51_v26 = vld [vmem:[%s16388_s0 + $0xac] sm:$0xf] }
  0x70   :  { %v3874_v40 = vrot.slane %v3872_v32, 5  ;;  %v3876_v41 = vshrl.u32 %v9503_v11, 16  ;;  %v428_v44 = vrot.slane %v427_v36, 4  ;;  %v3882_v45 = vshll.u32 %v9504_v30, 16  ;;  %v101_v36 = vld [vmem:[%s16388_s0 + $0xb0] sm:$0x1] }
  0x71   :  { %10778 = vmatmul.mubr.msk.bf16.gmra.mrb[20].mxu0 %vm988_vm4, %v9574_v34  ;;  %v423_v43 = vsel %vm12093_vm3, %v418_v35, %v422_v18  ;;  %v435_v47 = vshrl.u32 %v48_v33, 16  ;;  %v3869_v48 = vor.u32 %v3868_v39, %v3865_v38  ;;  %v438_v50 = vshll.u32 %v48_v33, 16  ;;  %v50_v18 = vld [vmem:[%s16388_s0 + $0xa8] sm:$0xf] }
  0x72   :  { %v3878_v49 = vrot.slane %v3876_v41, 4  ;;  %v444_v51 = vshll.u32 %v49_v19, 16  ;;  %v433_v53 = vsel %vm12093_vm3, %v428_v44, %v432_v37  ;;  %v3884_v54 = vrot.slane %v3882_v45, 5  ;;  %v9508_v41 = vld [vmem:[%s16388_s0 + $0xb4] sm:$0xf] }
  0x73   :  { %v437_v56 = vrot.slane %v435_v47, 4  ;;  %v448_v59 = vshrl.u32 %v49_v19, 16  ;;  %v9124_v61 = vcombine.low %v423_v43, %v433_v53  ;;  %v3870_v62 = vrot.slane %v3869_v48, 4  ;;  %v9509_v47 = vld [vmem:[%s16388_s0 + $0xb8] sm:$0xf] }
  0x74   :  { %v3879_v63 = vor.u32 %v3878_v49, %v3874_v40  ;;  %v440_v0 = vrot.slane %v438_v50, 5  ;;  %v446_v3 = vrot.slane %v444_v51, 5  ;;  %v454_v5 = vshll.u32 %v100_v46, 16 }
  0x75   :  { %v450_v4 = vrot.slane %v448_v59, 4  ;;  %v3887_v6 = vshrl.u32 %v9505_v52, 16  ;;  %10517 = vmatprep.mubr.msk.bf16.mxu1 %vm988_vm4, %v9124_v61  ;;  %v3875_v7 = vsel %vm12093_vm3, %v3870_v62, %v3874_v40  ;;  %v3890_v42 = vshll.u32 %v9505_v52, 16 }
  0x76   :  { %v3880_v8 = vrot.slane %v3879_v63, 4  ;;  %v441_v9 = vor.u32 %v440_v0, %v437_v56  ;;  %v456_v12 = vrot.slane %v454_v5, 5  ;;  %v3896_v17 = vshll.u32 %v9506_v1, 16 }
  0x77   :  { %v451_v11 = vor.u32 %v450_v4, %v446_v3  ;;  %v3889_v15 = vrot.slane %v3887_v6, 4  ;;  %v3892_v23 = vrot.slane %v3890_v42, 5  ;;  %v3900_v25 = vshrl.u32 %v9506_v1, 16  ;;  %v52_v1 = vld [vmem:[%s16388_s0 + $0xb4] sm:$0xf] }
  0x78   :  { %v3885_v20 = vsel %vm12093_vm3, %v3880_v8, %v3884_v54  ;;  %v442_v21 = vrot.slane %v441_v9, 4  ;;  %v3898_v31 = vrot.slane %v3896_v17, 5  ;;  %v3906_v32 = vshll.u32 %v9507_v10, 16  ;;  %v9510_v54 = vld [vmem:[%s16388_s0 + $0xbc] sm:$0x1] }
  0x79   :  { %v9575_v28 = vcombine.low %v3875_v7, %v3885_v20  ;;  %v452_v30 = vrot.slane %v451_v11, 4  ;;  %v3893_v34 = vor.u32 %v3892_v23, %v3889_v15  ;;  %v3902_v35 = vrot.slane %v3900_v25, 4  ;;  %v53_v7 = vld [vmem:[%s16388_s0 + $0xb8] sm:$0xf]  ;;  %v102_v11 = vld [vmem:[%s16388_s0 + $0xbc] sm:$0x1] }
  0x7a   :  { %v447_v33 = vsel %vm12093_vm3, %v442_v21, %v446_v3  ;;  %v459_v37 = vshrl.u32 %v50_v18, 16  ;;  %v3908_v38 = vrot.slane %v3906_v32, 5  ;;  %v462_v39 = vshll.u32 %v50_v18, 16  ;;  %v9511_v20 = vld [vmem:[%s16388_s0 + $0xc0] sm:$0xf] }
  0x7b   :  { %10781 = vmatprep.mubr.msk.bf16.mxu0 %vm988_vm4, %v9575_v28  ;;  %v457_v19 = vsel %vm12093_vm3, %v452_v30, %v456_v12  ;;  %v468_v40 = vshll.u32 %v51_v26, 16  ;;  %v3894_v44 = vrot.slane %v3893_v34, 4  ;;  %v3903_v45 = vor.u32 %v3902_v35, %v3898_v31  ;;  %v9512_v28 = vld [vmem:[%s16388_s0 + $0xc4] sm:$0xf] }
  0x7c   :  { %v9125_v43 = vcombine.low %v447_v33, %v457_v19  ;;  %v461_v46 = vrot.slane %v459_v37, 4  ;;  %v464_v48 = vrot.slane %v462_v39, 5  ;;  %v472_v50 = vshrl.u32 %v51_v26, 16 }
  0x7d   :  { %v470_v49 = vrot.slane %v468_v40, 5  ;;  %v478_v51 = vshll.u32 %v101_v36, 16  ;;  %v3899_v52 = vsel %vm12093_vm3, %v3894_v44, %v3898_v31  ;;  %v3904_v53 = vrot.slane %v3903_v45, 4 }
  0x7e   :  { %10518 = vmatmul.mubr.msk.bf16.gmra.mrb[24].mxu1 %vm988_vm4, %v9125_v43  ;;  %v3911_v56 = vshrl.u32 %v9508_v41, 16  ;;  %v3914_v59 = vshll.u32 %v9508_v41, 16  ;;  %v465_v61 = vor.u32 %v464_v48, %v461_v46  ;;  %v474_v62 = vrot.slane %v472_v50, 4  ;;  %v9513_v41 = vld [vmem:[%s16388_s0 + $0xc8] sm:$0x1] }
  0x7f   :  { %v480_v63 = vrot.slane %v478_v51, 5  ;;  %v3920_v0 = vshll.u32 %v9509_v47, 16  ;;  %v3909_v3 = vsel %vm12093_vm3, %v3904_v53, %v3908_v38  ;;  %v3924_v6 = vshrl.u32 %v9509_v47, 16  ;;  %v54_v47 = vld [vmem:[%s16388_s0 + $0xd8] sm:$0xf] }
  0x80   :  { %v3913_v4 = vrot.slane %v3911_v56, 4  ;;  %v3916_v5 = vrot.slane %v3914_v59, 5  ;;  %v9576_v8 = vcombine.low %v3899_v52, %v3909_v3  ;;  %v466_v9 = vrot.slane %v465_v61, 4  ;;  %v9272_v52 = vld [vmem:[%s16389_s1 + $0x4] sm:$0x3] }
  0x81   :  { %v475_v10 = vor.u32 %v474_v62, %v470_v49  ;;  %v3922_v42 = vrot.slane %v3920_v0, 5  ;;  %v3926_v15 = vrot.slane %v3924_v6, 4  ;;  %v3930_v17 = vshll.u32 %v9510_v54, 16  ;;  %v55_v61 = vld [vmem:[%s16388_s0 + $0xdc] sm:$0xf]  ;;  %11660 = vmatprep.subr.msk.bf16.mxu1 %vm1085_vm0, %v9272_v52 }
  0x82   :  { %v3917_v12 = vor.u32 %v3916_v5, %v3913_v4  ;;  %v483_v18 = vshrl.u32 %v52_v1, 16  ;;  %10782 = vmatmul.mubr.msk.bf16.gmra.mrb[24].mxu0 %vm988_vm4, %v9576_v8  ;;  %v471_v21 = vsel %vm12093_vm3, %v466_v9, %v470_v49  ;;  %v486_v25 = vshll.u32 %v52_v1, 16  ;;  %v103_v3 = vld [vmem:[%s16388_s0 + $0xe0] sm:$0x1]  ;;  %v9514_v4 = vld [vmem:[%s16388_s0 + $0xe4] sm:$0xf] }
  0x83   :  { %v476_v23 = vrot.slane %v475_v10, 4  ;;  %v492_v26 = vshll.u32 %v53_v7, 16  ;;  %v3927_v31 = vor.u32 %v3926_v15, %v3922_v42  ;;  %v3932_v32 = vrot.slane %v3930_v17, 5  ;;  %v9515_v9 = vld [vmem:[%s16388_s0 + $0xe8] sm:$0xf] }
  0x84   :  { %v3918_v30 = vrot.slane %v3917_v12, 4  ;;  %v485_v33 = vrot.slane %v483_v18, 4  ;;  %v488_v35 = vrot.slane %v486_v25, 5  ;;  %v496_v37 = vshrl.u32 %v53_v7, 16 }
  0x85   :  { %v481_v34 = vsel %vm12093_vm3, %v476_v23, %v480_v63  ;;  %v494_v36 = vrot.slane %v492_v26, 5  ;;  %v3928_v39 = vrot.slane %v3927_v31, 4  ;;  %v502_v40 = vshll.u32 %v102_v11, 16 }
  0x86   :  { %v9126_v19 = vcombine.low %v471_v21, %v481_v34  ;;  %v3923_v38 = vsel %vm12093_vm3, %v3918_v30, %v3922_v42  ;;  %v489_v43 = vor.u32 %v488_v35, %v485_v33  ;;  %v498_v44 = vrot.slane %v496_v37, 4  ;;  %v9516_v35 = vld [vmem:[%s16388_s0 + $0xec] sm:$0x1] }
  0x87   :  { %v3935_v45 = vshrl.u32 %v9511_v20, 16  ;;  %v3938_v46 = vshll.u32 %v9511_v20, 16  ;;  %v3933_v48 = vsel %vm12093_vm3, %v3928_v39, %v3932_v32  ;;  %v504_v49 = vrot.slane %v502_v40, 5 }
  0x88   :  { %10521 = vmatprep.mubr.msk.bf16.mxu1 %vm988_vm4, %v9126_v19  ;;  %v3944_v50 = vshll.u32 %v9512_v28, 16  ;;  %v3948_v51 = vshrl.u32 %v9512_v28, 16  ;;  %v9577_v53 = vcombine.low %v3923_v38, %v3933_v48  ;;  %v490_v54 = vrot.slane %v489_v43, 4  ;;  %v56_v19 = vld [vmem:[%s16388_s0 + $0xe4] sm:$0xf] }
  0x89   :  { %v499_v56 = vor.u32 %v498_v44, %v494_v36  ;;  %v3937_v59 = vrot.slane %v3935_v45, 4  ;;  %v3940_v62 = vrot.slane %v3938_v46, 5  ;;  %v3954_v1 = vshll.u32 %v9513_v41, 16  ;;  %v57_v43 = vld [vmem:[%s16388_s0 + $0xe8] sm:$0xf] }
  0x8a   :  { %v3946_v63 = vrot.slane %v3944_v50, 5  ;;  %v3950_v0 = vrot.slane %v3948_v51, 4  ;;  %10785 = vmatprep.mubr.msk.bf16.mxu0 %vm988_vm4, %v9577_v53  ;;  %v495_v5 = vsel %vm12093_vm3, %v490_v54, %v494_v36  ;;  %v507_v7 = vshrl.u32 %v54_v47, 16  ;;  %v104_v48 = vld [vmem:[%s16388_s0 + $0xec] sm:$0x1] }
  0x8b   :  { %v500_v6 = vrot.slane %v499_v56, 4  ;;  %v510_v8 = vshll.u32 %v54_v47, 16  ;;  %v3941_v10 = vor.u32 %v3940_v62, %v3937_v59  ;;  %v3956_v11 = vrot.slane %v3954_v1, 5 }
  0x8c   :  { %v3951_v42 = vor.u32 %v3950_v0, %v3946_v63  ;;  %v516_v12 = vshll.u32 %v55_v61, 16  ;;  %v509_v17 = vrot.slane %v507_v7, 4  ;;  %v520_v20 = vshrl.u32 %v55_v61, 16  ;;  %v9518_v7 = vld [vmem:[%s16388_s0 + $0xf4] sm:$0xf] }
  0x8d   :  { %v505_v15 = vsel %vm12093_vm3, %v500_v6, %v504_v49  ;;  %v512_v18 = vrot.slane %v510_v8, 5  ;;  %v3942_v23 = vrot.slane %v3941_v10, 4  ;;  %v526_v31 = vshll.u32 %v103_v3, 16  ;;  %v9517_v49 = vld [vmem:[%s16388_s0 + $0xf0] sm:$0xf] }
  0x8e   :  { %v9127_v21 = vcombine.low %v495_v5, %v505_v15  ;;  %v3952_v25 = vrot.slane %v3951_v42, 4  ;;  %v518_v26 = vrot.slane %v516_v12, 5  ;;  %v522_v30 = vrot.slane %v520_v20, 4  ;;  %v58_v20 = vld [vmem:[%s16388_s0 + $0xf0] sm:$0xf] }
  0x8f   :  { %v513_v28 = vor.u32 %v512_v18, %v509_v17  ;;  %v3959_v32 = vshrl.u32 %v9514_v4, 16  ;;  %v3947_v33 = vsel %vm12093_vm3, %v3942_v23, %v3946_v63  ;;  %v3962_v36 = vshll.u32 %v9514_v4, 16  ;;  %v9519_v17 = vld [vmem:[%s16388_s0 + $0xf8] sm:$0x1] }
  0x90   :  { %10522 = vmatmul.mubr.msk.bf16.gmra.mrb[28].mxu1 %vm988_vm4, %v9127_v21  ;;  %v3957_v34 = vsel %vm12093_vm3, %v3952_v25, %v3956_v11  ;;  %v3968_v37 = vshll.u32 %v9515_v9, 16  ;;  %v523_v40 = vor.u32 %v522_v30, %v518_v26  ;;  %v528_v41 = vrot.slane %v526_v31, 5 }
  0x91   :  { %v9578_v38 = vcombine.low %v3947_v33, %v3957_v34  ;;  %v514_v39 = vrot.slane %v513_v28, 4  ;;  %v3961_v44 = vrot.slane %v3959_v32, 4  ;;  %v3964_v45 = vrot.slane %v3962_v36, 5  ;;  %v59_v28 = vld [vmem:[%s16388_s0 + $0xf4] sm:$0xf] }
  0x92   :  { %v3970_v46 = vrot.slane %v3968_v37, 5  ;;  %v3972_v47 = vshrl.u32 %v9515_v9, 16  ;;  %v524_v51 = vrot.slane %v523_v40, 4  ;;  %v3978_v52 = vshll.u32 %v9516_v35, 16  ;;  %v105_v34 = vld [vmem:[%s16388_s0 + $0xf8] sm:$0x1] }
  0x93   :  { %10786 = vmatmul.mubr.msk.bf16.gmra.mrb[28].mxu0 %vm988_vm4, %v9578_v38  ;;  %v519_v50 = vsel %vm12093_vm3, %v514_v39, %v518_v26  ;;  %v531_v53 = vshrl.u32 %v56_v19, 16  ;;  %v3965_v54 = vor.u32 %v3964_v45, %v3961_v44  ;;  %v534_v59 = vshll.u32 %v56_v19, 16 }
  0x94   :  { %v3974_v56 = vrot.slane %v3972_v47, 4  ;;  %v540_v61 = vshll.u32 %v57_v43, 16  ;;  %v529_v62 = vsel %vm12093_vm3, %v524_v51, %v528_v41  ;;  %v3980_v63 = vrot.slane %v3978_v52, 5  ;;  %v9627_v51 = vld [vmem:[%s16388_s0 + $0xc] sm:$0xe] }
  0x95   :  { %v533_v0 = vrot.slane %v531_v53, 4  ;;  %v544_v1 = vshrl.u32 %v57_v43, 16  ;;  %v9128_v3 = vcombine.low %v519_v50, %v529_v62  ;;  %v3966_v4 = vrot.slane %v3965_v54, 4 }
  0x96   :  { %v3975_v5 = vor.u32 %v3974_v56, %v3970_v46  ;;  %v536_v6 = vrot.slane %v534_v59, 5  ;;  %v542_v8 = vrot.slane %v540_v61, 5  ;;  %v550_v10 = vshll.u32 %v104_v48, 16  ;;  %v60_v59 = vld [vmem:[%s16388_s0 + $0xfc] sm:$0xf] }
  0x97   :  { %v546_v9 = vrot.slane %v544_v1, 4  ;;  %v3983_v42 = vshrl.u32 %v9517_v49, 16  ;;  %10525 = vmatprep.mubr.msk.bf16.mxu1 %vm988_vm4, %v9128_v3  ;;  %v3971_v11 = vsel %vm12093_vm3, %v3966_v4, %v3970_v46  ;;  %v3986_v18 = vshll.u32 %v9517_v49, 16 }
  0x98   :  { %v3976_v12 = vrot.slane %v3975_v5, 4  ;;  %v537_v15 = vor.u32 %v536_v6, %v533_v0  ;;  %v552_v23 = vrot.slane %v550_v10, 5  ;;  %v3992_v26 = vshll.u32 %v9518_v7, 16  ;;  %v61_v5 = vld [vmem:[%s16388_s0 + $0x100] sm:$0xf] }
  0x99   :  { %v547_v21 = vor.u32 %v546_v9, %v542_v8  ;;  %v3985_v25 = vrot.slane %v3983_v42, 4  ;;  %v3988_v32 = vrot.slane %v3986_v18, 5  ;;  %v3996_v33 = vshrl.u32 %v9518_v7, 16 }
  0x9a   :  { %v3981_v30 = vsel %vm12093_vm3, %v3976_v12, %v3980_v63  ;;  %v538_v31 = vrot.slane %v537_v15, 4  ;;  %v3994_v37 = vrot.slane %v3992_v26, 5  ;;  %v4002_v19 = vshll.u32 %v9519_v17, 16  ;;  %v9628_v17 = vld [vmem:[%s16388_s0 + $0x18] sm:$0xe] }
  0x9b   :  { %v9579_v35 = vcombine.low %v3971_v11, %v3981_v30  ;;  %v548_v36 = vrot.slane %v547_v21, 4  ;;  %v3989_v39 = vor.u32 %v3988_v32, %v3985_v25  ;;  %v3998_v40 = vrot.slane %v3996_v33, 4  ;;  %v62_v25 = vld [vmem:[%s16388_s0 + $0x108] sm:$0xf] }
  0x9c   :  { %v543_v38 = vsel %vm12093_vm3, %v538_v31, %v542_v8  ;;  %v555_v41 = vshrl.u32 %v58_v20, 16  ;;  %v4004_v44 = vrot.slane %v4002_v19, 5  ;;  %v558_v45 = vshll.u32 %v58_v20, 16  ;;  %v106_v8 = vld [vmem:[%s16388_s0 + $0x104] sm:$0x1] }
  0x9d   :  { %10789 = vmatprep.mubr.msk.bf16.mxu0 %vm988_vm4, %v9579_v35  ;;  %v553_v43 = vsel %vm12093_vm3, %v548_v36, %v552_v23  ;;  %v564_v46 = vshll.u32 %v59_v28, 16  ;;  %v3990_v48 = vrot.slane %v3989_v39, 4  ;;  %v3999_v49 = vor.u32 %v3998_v40, %v3994_v37 }
  0x9e   :  { %v9129_v47 = vcombine.low %v543_v38, %v553_v43  ;;  %v557_v50 = vrot.slane %v555_v41, 4  ;;  %v560_v52 = vrot.slane %v558_v45, 5  ;;  %v568_v54 = vshrl.u32 %v59_v28, 16  ;;  %v64_v43 = vld [vmem:[%s16388_s0 + $0x114] sm:$0xf] }
  0x9f   :  { %v566_v53 = vrot.slane %v564_v46, 5  ;;  %v574_v56 = vshll.u32 %v105_v34, 16  ;;  %v3995_v61 = vsel %vm12093_vm3, %v3990_v48, %v3994_v37  ;;  %v4000_v62 = vrot.slane %v3999_v49, 4  ;;  %v107_v37 = vld [vmem:[%s16388_s0 + $0x110] sm:$0x1] }
  0xa0   :  { %10526 = vmatmul.mubr.msk.bf16.gmra.mrb[32].mxu1 %vm988_vm4, %v9129_v47  ;;  %vm2023_vm6 = vcmask 1046532   ;;  %v561_v63 = vor.u32 %v560_v52, %v557_v50  ;;  %v570_v0 = vrot.slane %v568_v54, 4  ;;  %v9659_v4 = vrot.slane %v9627_v51, 9  ;;  %v65_v46 = vld [vmem:[%s16388_s0 + $0x118] sm:$0xf] }
  0xa1   :  { %v576_v1 = vrot.slane %v574_v56, 5  ;;  %vm12629_vm7 = vmor %vm2022_vm5, %vm2023_vm6  ;;  %v4005_v6 = vsel %vm12093_vm3, %v4000_v62, %v4004_v44  ;;  %v5024_v7 = vrot.slane %v5022_v57, 4  ;;  %v579_v9 = vshrl.u32 %v60_v59, 16  ;;  %v108_v51 = vld [vmem:[%s16388_s0 + $0x11c] sm:$0x1] }
  0xa2   :  { %v582_v10 = vshll.u32 %v60_v59, 16  ;;  %v9580_v42 = vcombine.low %v3995_v61, %v4005_v6  ;;  %v562_v11 = vrot.slane %v561_v63, 4  ;;  %v571_v12 = vor.u32 %v570_v0, %v566_v53  ;;  %v11768_v56 = vld [vmem:[%s16388_s0 + $0x28] sm:$0xf]  ;;  %v11769_v63 = vld [vmem:[%s16388_s0 + $0x2c] sm:$0x1] }
  0xa3   :  { %v5023_v15 = vsel %vm12629_vm7, %v9659_v4, %v5022_v57  ;;  %v5026_v18 = vsel %vm12629_vm7, %v5024_v7, %v5025_v58  ;;  %v581_v20 = vrot.slane %v579_v9, 4  ;;  %v588_v23 = vshll.u32 %v61_v5, 16  ;;  %v63_v58 = vld [vmem:[%s16388_s0 + $0x10c] sm:$0xf] }
  0xa4   :  { %v584_v21 = vrot.slane %v582_v10, 5  ;;  %10790 = vmatmul.mubr.msk.bf16.gmra.mrb[32].mxu0 %vm988_vm4, %v9580_v42  ;;  %v567_v13 = vsel %vm12093_vm3, %v562_v11, %v566_v53  ;;  %v572_v57 = vrot.slane %v571_v12, 4  ;;  %v9692_v26 = vcombine.low %v5023_v15, %v5026_v18  ;;  %v9630_v11 = vld [vmem:[%s16388_s0 + $0x30] sm:$0xe] }
  0xa5   :  { %v592_v28 = vshrl.u32 %v61_v5, 16  ;;  %v590_v14 = vrot.slane %v588_v23, 5  ;;  %v598_v31 = vshll.u32 %v106_v8, 16  ;;  %v9660_v32 = vrot.slane %v9628_v17, 9 }
  0xa6   :  { %v585_v30 = vor.u32 %v584_v21, %v581_v20  ;;  %v577_v33 = vsel %vm12093_vm3, %v572_v57, %v576_v1  ;;  %10823 = vmatprep.mubr.msk.bf16.mxu0 %vm988_vm4, %v9692_v26  ;;  %v5033_v35 = vsel %vm12629_vm7, %v12143_v24, %v5032_v22  ;;  %v6118_v36 = vsel %vm1085_vm0, %v12380_v27, 0  ;;  %v67_v57 = vld [vmem:[%s16388_s0 + $0x124] sm:$0xf] }
  0xa7   :  { %v594_v34 = vrot.slane %v592_v28, 4  ;;  %v9130_v19 = vcombine.low %v567_v13, %v577_v33  ;;  %v600_v39 = vrot.slane %v598_v31, 5  ;;  %v5030_v40 = vsel %vm12629_vm7, %v9660_v32, %v5029_v16  ;;  %v66_v13 = vld [vmem:[%s16388_s0 + $0x120] sm:$0xf]  ;;  %v109_v31 = vld [vmem:[%s16388_s0 + $0x128] sm:$0x1] }
  0xa8   :  { %v586_v38 = vrot.slane %v585_v30, 4  ;;  %v9693_v24 = vcombine.low %v5030_v40, %v5033_v35  ;;  %v603_v41 = vshrl.u32 %v62_v25, 16  ;;  %v606_v27 = vshll.u32 %v62_v25, 16  ;;  %v11770_v33 = vld [vmem:[%s16388_s0 + $0x34] sm:$0xf] }
  0xa9   :  { %v595_v22 = vor.u32 %v594_v34, %v590_v14  ;;  %10529 = vmatprep.mubr.msk.bf16.mxu1 %vm988_vm4, %v9130_v19  ;;  %v612_v44 = vshll.u32 %v63_v58, 16  ;;  %v616_v45 = vshrl.u32 %v63_v58, 16  ;;  %v622_v16 = vshll.u32 %v107_v37, 16  ;;  %v11771_v35 = vld [vmem:[%s16388_s0 + $0x38] sm:$0x1] }
  0xaa   :  { %v591_v55 = vsel %vm12093_vm3, %v586_v38, %v590_v14  ;;  %v605_v48 = vrot.slane %v603_v41, 4  ;;  %v608_v49 = vrot.slane %v606_v27, 5  ;;  %v9661_v50 = vrot.slane %v9629_v60, 9  ;;  %v9631_v37 = vld [vmem:[%s16388_s0 + $0x3c] sm:$0xe] }
  0xab   :  { %v596_v47 = vrot.slane %v595_v22, 4  ;;  %v614_v52 = vrot.slane %v612_v44, 5  ;;  %v618_v53 = vrot.slane %v616_v45, 4  ;;  %v624_v54 = vrot.slane %v622_v16, 5 }
  0xac   :  { %v5036_v59 = vrot.slane %v11768_v56, 5  ;;  %10824 = vmatmul.mubr.msk.bf16.vlgmr.msra.gmra.mrb[0].mxu0 %vm988_vm4, %v9693_v24  ;;  %v609_v62 = vor.u32 %v608_v49, %v605_v48  ;;  %v5039_v0 = vrot.slane %v11769_v63, 5  ;;  %v627_v1 = vshrl.u32 %v64_v43, 16  ;;  %v68_v48 = vld [vmem:[%s16388_s0 + $0x12c] sm:$0xf] }
  0xad   :  { %v601_v61 = vsel %vm12093_vm3, %v596_v47, %v600_v39  ;;  %10888 = vmatpush3.bf16.msra.mxu0 %v6118_v36  ;;  %v619_v5 = vor.u32 %v618_v53, %v614_v52  ;;  %v630_v10 = vshll.u32 %v64_v43, 16  ;;  %v636_v42 = vshll.u32 %v65_v46, 16  ;;  %v69_v53 = vld [vmem:[%s16388_s0 + $0x130] sm:$0xf]  ;;  %v110_v63 = vld [vmem:[%s16388_s0 + $0x134] sm:$0x1] }
  0xae   :  { %v9131_v4 = vcombine.low %v591_v55, %v601_v61  ;;  %v5037_v6 = vsel %vm12629_vm7, %v9661_v50, %v5036_v59  ;;  %v5038_v7 = vrot.slane %v5036_v59, 4  ;;  %v610_v8 = vrot.slane %v609_v62, 4  ;;  %v11772_v61 = vld [vmem:[%s16388_s0 + $0x40] sm:$0xf] }
  0xaf   :  { %v629_v9 = vrot.slane %v627_v1, 4  ;;  %v620_v12 = vrot.slane %v619_v5, 4  ;;  %v640_v17 = vshrl.u32 %v65_v46, 16  ;;  %v646_v18 = vshll.u32 %v108_v51, 16  ;;  %v11773_v1 = vld [vmem:[%s16388_s0 + $0x44] sm:$0x1] }
  0xb0   :  { %10530 = vmatmul.mubr.msk.bf16.gmra.mrb[36].mxu1 %vm988_vm4, %v9131_v4  ;;  %v5040_v15 = vsel %vm12629_vm7, %v5038_v7, %v5039_v0  ;;  %v615_v20 = vsel %vm12093_vm3, %v610_v8, %v614_v52  ;;  %v632_v23 = vrot.slane %v630_v10, 5  ;;  %v638_v25 = vrot.slane %v636_v42, 5  ;;  %v9632_v7 = vld [vmem:[%s16388_s0 + $0x48] sm:$0xe] }
  0xb1   :  { %v9694_v21 = vcombine.low %v5037_v6, %v5040_v15  ;;  %v625_v26 = vsel %vm12093_vm3, %v620_v12, %v624_v54  ;;  %v642_v28 = vrot.slane %v640_v17, 4  ;;  %v648_v30 = vrot.slane %v646_v18, 5 }
  0xb2   :  { %v9662_v14 = vrot.slane %v9630_v11, 9  ;;  %v9132_v32 = vcombine.low %v615_v20, %v625_v26  ;;  %v633_v58 = vor.u32 %v632_v23, %v629_v9  ;;  %v5043_v34 = vrot.slane %v11770_v33, 5  ;;  %v70_v11 = vld [vmem:[%s16388_s0 + $0x138] sm:$0xf]  ;;  %v71_v20 = vld [vmem:[%s16388_s0 + $0x13c] sm:$0xf] }
  0xb3   :  { %10827 = vmatprep.mubr.msk.bf16.mxu0 %vm988_vm4, %v9694_v21  ;;  %v5046_v36 = vrot.slane %v11771_v35, 5  ;;  %v643_v19 = vor.u32 %v642_v28, %v638_v25  ;;  %v651_v38 = vshrl.u32 %v66_v13, 16  ;;  %v654_v39 = vshll.u32 %v66_v13, 16 }
  0xb4   :  { %v660_v40 = vshll.u32 %v67_v57, 16  ;;  %10533 = vmatprep.mubr.msk.bf16.mxu1 %vm988_vm4, %v9132_v32  ;;  %v634_v60 = vrot.slane %v633_v58, 4  ;;  %v5044_v22 = vsel %vm12629_vm7, %v9662_v14, %v5043_v34  ;;  %v5045_v24 = vrot.slane %v5043_v34, 4  ;;  %v111_v14 = vld [vmem:[%s16388_s0 + $0x140] sm:$0x1] }
  0xb5   :  { %v664_v41 = vshrl.u32 %v67_v57, 16  ;;  %v644_v27 = vrot.slane %v643_v19, 4  ;;  %v653_v43 = vrot.slane %v651_v38, 4  ;;  %v656_v55 = vrot.slane %v654_v39, 5  ;;  %v11774_v58 = vld [vmem:[%s16388_s0 + $0x4c] sm:$0xf] }
  0xb6   :  { %v662_v44 = vrot.slane %v660_v40, 5  ;;  %v639_v45 = vsel %vm12093_vm3, %v634_v60, %v638_v25  ;;  %v5047_v16 = vsel %vm12629_vm7, %v5045_v24, %v5046_v36  ;;  %v670_v47 = vshll.u32 %v109_v31, 16  ;;  %v11775_v34 = vld [vmem:[%s16388_s0 + $0x50] sm:$0x1]  ;;  %v9633_v36 = vld [vmem:[%s16388_s0 + $0x54] sm:$0xe] }
  0xb7   :  { %v666_v46 = vrot.slane %v664_v41, 4  ;;  %v649_v49 = vsel %vm12093_vm3, %v644_v27, %v648_v30  ;;  %v9695_v50 = vcombine.low %v5044_v22, %v5047_v16  ;;  %v657_v51 = vor.u32 %v656_v55, %v653_v43  ;;  %v9981_v40 = vld [vmem:[%s16389_s1 + $0xe] sm:$0x3]  ;;  %v72_v27 = vld [vmem:[%s16388_s0 + $0x144] sm:$0xf] }
  0xb8   :  { %v9663_v52 = vrot.slane %v9631_v37, 9  ;;  %v9133_v54 = vcombine.low %v639_v45, %v649_v49  ;;  %v672_v59 = vrot.slane %v670_v47, 5  ;;  %v5050_v62 = vrot.slane %v11772_v61, 5  ;;  %11666 = vmatprep.subr.msk.bf16.mxu0 %vm1085_vm0, %v9981_v40  ;;  %v73_v16 = vld [vmem:[%s16388_s0 + $0x148] sm:$0xf] }
  0xb9   :  { %v667_v56 = vor.u32 %v666_v46, %v662_v44  ;;  %10828 = vmatmul.mubr.msk.bf16.gmra.mrb[4].mxu0 %vm988_vm4, %v9695_v50  ;;  %v658_v0 = vrot.slane %v657_v51, 4  ;;  %v5053_v4 = vrot.slane %v11773_v1, 5  ;;  %v675_v5 = vshrl.u32 %v68_v48, 16  ;;  %v11776_v61 = vld [vmem:[%s16388_s0 + $0x58] sm:$0xf] }
  0xba   :  { %v678_v6 = vshll.u32 %v68_v48, 16  ;;  %10534 = vmatmul.mubr.msk.bf16.gmra.mrb[40].mxu1 %vm988_vm4, %v9133_v54  ;;  %v5051_v9 = vsel %vm12629_vm7, %v9663_v52, %v5050_v62  ;;  %v5052_v10 = vrot.slane %v5050_v62, 4  ;;  %v684_v42 = vshll.u32 %v69_v53, 16  ;;  %v11777_v1 = vld [vmem:[%s16388_s0 + $0x5c] sm:$0x1] }
  0xbb   :  { %v668_v8 = vrot.slane %v667_v56, 4  ;;  %v663_v12 = vsel %vm12093_vm3, %v658_v0, %v662_v44  ;;  %v677_v15 = vrot.slane %v675_v5, 4  ;;  %v688_v18 = vshrl.u32 %v69_v53, 16 }
  0xbc   :  { %v680_v17 = vrot.slane %v678_v6, 5  ;;  %v5054_v23 = vsel %vm12629_vm7, %v5052_v10, %v5053_v4  ;;  %v686_v25 = vrot.slane %v684_v42, 5  ;;  %v694_v13 = vshll.u32 %v110_v63, 16  ;;  %v112_v63 = vld [vmem:[%s16388_s0 + $0x14c] sm:$0x1] }
  0xbd   :  { %v673_v21 = vsel %vm12093_vm3, %v668_v8, %v672_v59  ;;  %v9696_v26 = vcombine.low %v5051_v9, %v5054_v23  ;;  %v690_v30 = vrot.slane %v688_v18, 4  ;;  %v9664_v32 = vrot.slane %v9632_v7, 9  ;;  %v9634_v7 = vld [vmem:[%s16388_s0 + $0x60] sm:$0xe] }
  0xbe   :  { %v9134_v57 = vcombine.low %v663_v12, %v673_v21  ;;  %v681_v28 = vor.u32 %v680_v17, %v677_v15  ;;  %v696_v31 = vrot.slane %v694_v13, 5  ;;  %v5057_v33 = vrot.slane %v11774_v58, 5  ;;  %v11778_v58 = vld [vmem:[%s16388_s0 + $0x64] sm:$0xf] }
  0xbf   :  { %v5060_v35 = vrot.slane %v11775_v34, 5  ;;  %10831 = vmatprep.mubr.msk.bf16.mxu0 %vm988_vm4, %v9696_v26  ;;  %v691_v19 = vor.u32 %v690_v30, %v686_v25  ;;  %v699_v38 = vshrl.u32 %v70_v11, 16  ;;  %v702_v39 = vshll.u32 %v70_v11, 16  ;;  %v74_v11 = vld [vmem:[%s16388_s0 + $0x150] sm:$0xf] }
  0xc0   :  { %10537 = vmatprep.mubr.msk.bf16.mxu1 %vm988_vm4, %v9134_v57  ;;  %v682_v37 = vrot.slane %v681_v28, 4  ;;  %v5058_v60 = vsel %vm12629_vm7, %v9664_v32, %v5057_v33  ;;  %v5059_v22 = vrot.slane %v5057_v33, 4  ;;  %v708_v24 = vshll.u32 %v71_v20, 16  ;;  %v11779_v34 = vld [vmem:[%s16388_s0 + $0x68] sm:$0x1] }
  0xc1   :  { %v712_v41 = vshrl.u32 %v71_v20, 16  ;;  %v692_v55 = vrot.slane %v691_v19, 4  ;;  %v701_v44 = vrot.slane %v699_v38, 4  ;;  %v704_v45 = vrot.slane %v702_v39, 5  ;;  %v75_v20 = vld [vmem:[%s16388_s0 + $0x154] sm:$0xf] }
  0xc2   :  { %v687_v43 = vsel %vm12093_vm3, %v682_v37, %v686_v25  ;;  %v5061_v46 = vsel %vm12629_vm7, %v5059_v22, %v5060_v35  ;;  %v710_v47 = vrot.slane %v708_v24, 5  ;;  %v718_v49 = vshll.u32 %v111_v14, 16  ;;  %v113_v14 = vld [vmem:[%s16388_s0 + $0x158] sm:$0x1] }
  0xc3   :  { %v714_v48 = vrot.slane %v712_v41, 4  ;;  %v697_v50 = vsel %vm12093_vm3, %v692_v55, %v696_v31  ;;  %v9697_v51 = vcombine.low %v5058_v60, %v5061_v46  ;;  %v705_v52 = vor.u32 %v704_v45, %v701_v44  ;;  %v76_v41 = vld [vmem:[%s16388_s0 + $0x15c] sm:$0xf]  ;;  %v77_v45 = vld [vmem:[%s16388_s0 + $0x160] sm:$0xf] }
  0xc4   :  { %v9665_v53 = vrot.slane %v9633_v36, 9  ;;  %v9135_v54 = vcombine.low %v687_v43, %v697_v50  ;;  %v720_v59 = vrot.slane %v718_v49, 5  ;;  %v5064_v62 = vrot.slane %v11776_v61, 5  ;;  %v9635_v36 = vld [vmem:[%s16388_s0 + $0x6c] sm:$0xe] }
  0xc5   :  { %v715_v56 = vor.u32 %v714_v48, %v710_v47  ;;  %10832 = vmatmul.mubr.msk.bf16.gmra.mrb[8].mxu0 %vm988_vm4, %v9697_v51  ;;  %v706_v0 = vrot.slane %v705_v52, 4  ;;  %v5067_v4 = vrot.slane %v11777_v1, 5  ;;  %v723_v5 = vshrl.u32 %v72_v27, 16  ;;  %v11780_v61 = vld [vmem:[%s16388_s0 + $0x70] sm:$0xf] }
  0xc6   :  { %v726_v6 = vshll.u32 %v72_v27, 16  ;;  %10538 = vmatmul.mubr.msk.bf16.gmra.mrb[44].mxu1 %vm988_vm4, %v9135_v54  ;;  %v5065_v9 = vsel %vm12629_vm7, %v9665_v53, %v5064_v62  ;;  %v5066_v10 = vrot.slane %v5064_v62, 4  ;;  %v732_v42 = vshll.u32 %v73_v16, 16  ;;  %v114_v53 = vld [vmem:[%s16388_s0 + $0x164] sm:$0x1] }
  0xc7   :  { %v716_v8 = vrot.slane %v715_v56, 4  ;;  %v711_v12 = vsel %vm12093_vm3, %v706_v0, %v710_v47  ;;  %v725_v15 = vrot.slane %v723_v5, 4  ;;  %v736_v18 = vshrl.u32 %v73_v16, 16  ;;  %v11781_v0 = vld [vmem:[%s16388_s0 + $0x74] sm:$0x1] }
  0xc8   :  { %v728_v17 = vrot.slane %v726_v6, 5  ;;  %v5068_v23 = vsel %vm12629_vm7, %v5066_v10, %v5067_v4  ;;  %v734_v25 = vrot.slane %v732_v42, 5  ;;  %v742_v13 = vshll.u32 %v112_v63, 16  ;;  %v9636_v6 = vld [vmem:[%s16388_s0 + $0x78] sm:$0xe] }
  0xc9   :  { %v721_v21 = vsel %vm12093_vm3, %v716_v8, %v720_v59  ;;  %v9698_v26 = vcombine.low %v5065_v9, %v5068_v23  ;;  %v738_v30 = vrot.slane %v736_v18, 4  ;;  %v9666_v32 = vrot.slane %v9634_v7, 9  ;;  %v12885_v42 = vld [vmem:[%s16388_s0 + $0x168] sm:$0xf] }
  0xca   :  { %v9136_v57 = vcombine.low %v711_v12, %v721_v21  ;;  %v729_v28 = vor.u32 %v728_v17, %v725_v15  ;;  %v744_v31 = vrot.slane %v742_v13, 5  ;;  %v5071_v33 = vrot.slane %v11778_v58, 5 }
  0xcb   :  { %v5074_v35 = vrot.slane %v11779_v34, 5  ;;  %10835 = vmatprep.mubr.msk.bf16.mxu0 %vm988_vm4, %v9698_v26  ;;  %v739_v19 = vor.u32 %v738_v30, %v734_v25  ;;  %v747_v38 = vshrl.u32 %v74_v11, 16  ;;  %v750_v39 = vshll.u32 %v74_v11, 16  ;;  %v115_v30 = vld [vmem:[%s16388_s0 + $0x170] sm:$0x1] }
  0xcc   :  { %10541 = vmatprep.mubr.msk.bf16.mxu1 %vm988_vm4, %v9136_v57  ;;  %v730_v37 = vrot.slane %v729_v28, 4  ;;  %v5072_v40 = vsel %vm12629_vm7, %v9666_v32, %v5071_v33  ;;  %v5073_v60 = vrot.slane %v5071_v33, 4  ;;  %v756_v22 = vshll.u32 %v75_v20, 16  ;;  %v11782_v32 = vld [vmem:[%s16388_s0 + $0x7c] sm:$0xf] }
  0xcd   :  { %v760_v24 = vshrl.u32 %v75_v20, 16  ;;  %v740_v43 = vrot.slane %v739_v19, 4  ;;  %v749_v55 = vrot.slane %v747_v38, 4  ;;  %v752_v44 = vrot.slane %v750_v39, 5  ;;  %v11783_v33 = vld [vmem:[%s16388_s0 + $0x80] sm:$0x1] }
  0xce   :  { %v735_v27 = vsel %vm12093_vm3, %v730_v37, %v734_v25  ;;  %v5075_v16 = vsel %vm12629_vm7, %v5073_v60, %v5074_v35  ;;  %v758_v46 = vrot.slane %v756_v22, 5  ;;  %v766_v48 = vshll.u32 %v113_v14, 16  ;;  %v12896_v25 = vld [vmem:[%s16388_s0 + $0x16c] sm:$0xf]  ;;  %v9637_v35 = vld [vmem:[%s16388_s0 + $0x84] sm:$0xe] }
  0xcf   :  { %v762_v47 = vrot.slane %v760_v24, 4  ;;  %v745_v49 = vsel %vm12093_vm3, %v740_v43, %v744_v31  ;;  %v9699_v50 = vcombine.low %v5072_v40, %v5075_v16  ;;  %v753_v51 = vor.u32 %v752_v44, %v749_v55  ;;  %v12921_v24 = vld [vmem:[%s16388_s0 + $0x174] sm:$0xf]  ;;  %v12928_v44 = vld [vmem:[%s16388_s0 + $0x178] sm:$0xf] }
  0xd0   :  { %v9667_v52 = vrot.slane %v9635_v36, 9  ;;  %v9137_v54 = vcombine.low %v735_v27, %v745_v49  ;;  %v768_v59 = vrot.slane %v766_v48, 5  ;;  %v5078_v62 = vrot.slane %v11780_v61, 5  ;;  %v116_v61 = vld [vmem:[%s16388_s0 + $0x17c] sm:$0x1] }
  0xd1   :  { %v763_v56 = vor.u32 %v762_v47, %v758_v46  ;;  %10836 = vmatmul.mubr.msk.bf16.gmra.mrb[12].mxu0 %vm988_vm4, %v9699_v50  ;;  %v754_v63 = vrot.slane %v753_v51, 4  ;;  %v5081_v1 = vrot.slane %v11781_v0, 5  ;;  %v771_v4 = vshrl.u32 %v76_v41, 16 }
  0xd2   :  { %v774_v5 = vshll.u32 %v76_v41, 16  ;;  %10542 = vmatmul.mubr.msk.bf16.gmra.mrb[48].mxu1 %vm988_vm4, %v9137_v54  ;;  %v5079_v8 = vsel %vm12629_vm7, %v9667_v52, %v5078_v62  ;;  %v5080_v9 = vrot.slane %v5078_v62, 4  ;;  %v780_v10 = vshll.u32 %v77_v45, 16 }
  0xd3   :  { %v764_v7 = vrot.slane %v763_v56, 4  ;;  %v759_v11 = vsel %vm12093_vm3, %v754_v63, %v758_v46  ;;  %v773_v12 = vrot.slane %v771_v4, 4  ;;  %v784_v17 = vshrl.u32 %v77_v45, 16  ;;  %v11784_v56 = vld [vmem:[%s16388_s0 + $0x88] sm:$0xf] }
  0xd4   :  { %v776_v15 = vrot.slane %v774_v5, 5  ;;  %v5082_v20 = vsel %vm12629_vm7, %v5080_v9, %v5081_v1  ;;  %v782_v21 = vrot.slane %v780_v10, 5  ;;  %v790_v23 = vshll.u32 %v114_v53, 16  ;;  %v11785_v63 = vld [vmem:[%s16388_s0 + $0x8c] sm:$0x1] }
  0xd5   :  { %v769_v18 = vsel %vm12093_vm3, %v764_v7, %v768_v59  ;;  %v9700_v57 = vcombine.low %v5079_v8, %v5082_v20  ;;  %v786_v28 = vrot.slane %v784_v17, 4  ;;  %v9668_v31 = vrot.slane %v9636_v6, 9  ;;  %v9638_v5 = vld [vmem:[%s16388_s0 + $0x90] sm:$0xe]  ;;  %v12956_v10 = vld [vmem:[%s16388_s0 + $0x180] sm:$0xf] }
  0xd6   :  { %v9138_v13 = vcombine.low %v759_v11, %v769_v18  ;;  %v777_v26 = vor.u32 %v776_v15, %v773_v12  ;;  %v792_v14 = vrot.slane %v790_v23, 5  ;;  %v5085_v58 = vrot.slane %v11782_v32, 5  ;;  %v12964_v18 = vld [vmem:[%s16388_s0 + $0x184] sm:$0xf] }
  0xd7   :  { %v5088_v34 = vrot.slane %v11783_v33, 5  ;;  %10839 = vmatprep.mubr.msk.bf16.mxu0 %vm988_vm4, %v9700_v57  ;;  %v787_v37 = vor.u32 %v786_v28, %v782_v21  ;;  %v795_v19 = vshrl.u32 %v12885_v42, 16  ;;  %v798_v38 = vshll.u32 %v12885_v42, 16 }
  0xd8   :  { %10545 = vmatprep.mubr.msk.bf16.mxu1 %vm988_vm4, %v9138_v13  ;;  %v778_v36 = vrot.slane %v777_v26, 4  ;;  %v5086_v39 = vsel %vm12629_vm7, %v9668_v31, %v5085_v58  ;;  %v5087_v40 = vrot.slane %v5085_v58, 4  ;;  %v804_v60 = vshll.u32 %v12896_v25, 16  ;;  %v11786_v58 = vld [vmem:[%s16388_s0 + $0x94] sm:$0xf] }
  0xd9   :  { %v808_v22 = vshrl.u32 %v12896_v25, 16  ;;  %v788_v27 = vrot.slane %v787_v37, 4  ;;  %v797_v43 = vrot.slane %v795_v19, 4  ;;  %v800_v55 = vrot.slane %v798_v38, 5 }
  0xda   :  { %v783_v41 = vsel %vm12093_vm3, %v778_v36, %v782_v21  ;;  %v5089_v45 = vsel %vm12629_vm7, %v5087_v40, %v5088_v34  ;;  %v806_v16 = vrot.slane %v804_v60, 5  ;;  %v814_v47 = vshll.u32 %v115_v30, 16  ;;  %v11787_v34 = vld [vmem:[%s16388_s0 + $0x98] sm:$0x1]  ;;  %v9639_v36 = vld [vmem:[%s16388_s0 + $0x9c] sm:$0xe] }
  0xdb   :  { %v810_v46 = vrot.slane %v808_v22, 4  ;;  %v793_v48 = vsel %vm12093_vm3, %v788_v27, %v792_v14  ;;  %v9701_v49 = vcombine.low %v5086_v39, %v5089_v45  ;;  %v801_v50 = vor.u32 %v800_v55, %v797_v43  ;;  %v117_v14 = vld [vmem:[%s16388_s0 + $0x188] sm:$0x1]  ;;  %v12993_v27 = vld [vmem:[%s16388_s0 + $0x18c] sm:$0xf] }
  0xdc   :  { %v9669_v51 = vrot.slane %v9637_v35, 9  ;;  %v9139_v52 = vcombine.low %v783_v41, %v793_v48  ;;  %v816_v54 = vrot.slane %v814_v47, 5  ;;  %v5092_v59 = vrot.slane %v11784_v56, 5  ;;  %v118_v56 = vld [vmem:[%s16388_s0 + $0x194] sm:$0x1] }
  0xdd   :  { %v811_v53 = vor.u32 %v810_v46, %v806_v16  ;;  %10840 = vmatmul.mubr.msk.bf16.gmra.mrb[16].mxu0 %vm988_vm4, %v9701_v49  ;;  %v802_v62 = vrot.slane %v801_v50, 4  ;;  %v5095_v0 = vrot.slane %v11785_v63, 5  ;;  %v819_v1 = vshrl.u32 %v12921_v24, 16  ;;  %v13000_v46 = vld [vmem:[%s16388_s0 + $0x190] sm:$0xf] }
  0xde   :  { %v822_v4 = vshll.u32 %v12921_v24, 16  ;;  %10546 = vmatmul.mubr.msk.bf16.gmra.mrb[52].mxu1 %vm988_vm4, %v9139_v52  ;;  %v5093_v7 = vsel %vm12629_vm7, %v9669_v51, %v5092_v59  ;;  %v5094_v8 = vrot.slane %v5092_v59, 4  ;;  %v828_v9 = vshll.u32 %v12928_v44, 16  ;;  %v11788_v63 = vld [vmem:[%s16388_s0 + $0xa0] sm:$0xf] }
  0xdf   :  { %v812_v6 = vrot.slane %v811_v53, 4  ;;  %v807_v11 = vsel %vm12093_vm3, %v802_v62, %v806_v16  ;;  %v821_v12 = vrot.slane %v819_v1, 4  ;;  %v832_v17 = vshrl.u32 %v12928_v44, 16 }
  0xe0   :  { %v824_v15 = vrot.slane %v822_v4, 5  ;;  %v5096_v21 = vsel %vm12629_vm7, %v5094_v8, %v5095_v0  ;;  %v830_v23 = vrot.slane %v828_v9, 5  ;;  %v838_v13 = vshll.u32 %v116_v61, 16  ;;  %v11789_v4 = vld [vmem:[%s16388_s0 + $0xa4] sm:$0x1] }
  0xe1   :  { %v817_v20 = vsel %vm12093_vm3, %v812_v6, %v816_v54  ;;  %v9702_v26 = vcombine.low %v5093_v7, %v5096_v21  ;;  %v834_v30 = vrot.slane %v832_v17, 4  ;;  %v9670_v32 = vrot.slane %v9638_v5, 9  ;;  %v9640_v8 = vld [vmem:[%s16388_s0 + $0xa8] sm:$0xe]  ;;  %v9641_v17 = vld [vmem:[%s16388_s0 + $0xb4] sm:$0xe] }
  0xe2   :  { %v9140_v57 = vcombine.low %v807_v11, %v817_v20  ;;  %v825_v28 = vor.u32 %v824_v15, %v821_v12  ;;  %v840_v31 = vrot.slane %v838_v13, 5  ;;  %v5099_v33 = vrot.slane %v11786_v58, 5 }
  0xe3   :  { %v5102_v35 = vrot.slane %v11787_v34, 5  ;;  %10843 = vmatprep.mubr.msk.bf16.mxu0 %vm988_vm4, %v9702_v26  ;;  %v835_v19 = vor.u32 %v834_v30, %v830_v23  ;;  %v843_v38 = vshrl.u32 %v12956_v10, 16  ;;  %v846_v39 = vshll.u32 %v12956_v10, 16 }
  0xe4   :  { %10549 = vmatprep.mubr.msk.bf16.mxu1 %vm988_vm4, %v9140_v57  ;;  %v826_v37 = vrot.slane %v825_v28, 4  ;;  %v5100_v40 = vsel %vm12629_vm7, %v9670_v32, %v5099_v33  ;;  %v5101_v60 = vrot.slane %v5099_v33, 4  ;;  %v852_v22 = vshll.u32 %v12964_v18, 16 }
  0xe5   :  { %v856_v41 = vshrl.u32 %v12964_v18, 16  ;;  %v836_v55 = vrot.slane %v835_v19, 4  ;;  %v845_v45 = vrot.slane %v843_v38, 4  ;;  %v848_v16 = vrot.slane %v846_v39, 5 }
  0xe6   :  { %v831_v43 = vsel %vm12093_vm3, %v826_v37, %v830_v23  ;;  %v5103_v47 = vsel %vm12629_vm7, %v5101_v60, %v5102_v35  ;;  %v854_v48 = vrot.slane %v852_v22, 5  ;;  %v862_v50 = vshll.u32 %v117_v14, 16  ;;  %v9642_v14 = vld [vmem:[%s16388_s0 + $0xc0] sm:$0xe]  ;;  %v11790_v35 = vld [vmem:[%s16388_s0 + $0xac] sm:$0xf] }
  0xe7   :  { %v858_v49 = vrot.slane %v856_v41, 4  ;;  %v841_v51 = vsel %vm12093_vm3, %v836_v55, %v840_v31  ;;  %v9703_v52 = vcombine.low %v5100_v40, %v5103_v47  ;;  %v849_v53 = vor.u32 %v848_v16, %v845_v45  ;;  %v11791_v37 = vld [vmem:[%s16388_s0 + $0xb0] sm:$0x1]  ;;  %v11793_v45 = vld [vmem:[%s16388_s0 + $0xbc] sm:$0x1] }
  0xe8   :  { %v9671_v54 = vrot.slane %v9639_v36, 9  ;;  %v9141_v59 = vcombine.low %v831_v43, %v841_v51  ;;  %v864_v62 = vrot.slane %v862_v50, 5  ;;  %v5106_v0 = vrot.slane %v11788_v63, 5  ;;  %v11792_v43 = vld [vmem:[%s16388_s0 + $0xb8] sm:$0xf] }
  0xe9   :  { %v859_v61 = vor.u32 %v858_v49, %v854_v48  ;;  %10844 = vmatmul.mubr.msk.bf16.gmra.mrb[20].mxu0 %vm988_vm4, %v9703_v52  ;;  %v850_v1 = vrot.slane %v849_v53, 4  ;;  %v5109_v5 = vrot.slane %v11789_v4, 5  ;;  %v867_v6 = vshrl.u32 %v12993_v27, 16  ;;  %v9643_v47 = vld [vmem:[%s16388_s0 + $0xe4] sm:$0xe] }
  0xea   :  { %v870_v7 = vshll.u32 %v12993_v27, 16  ;;  %10550 = vmatmul.mubr.msk.bf16.gmra.mrb[56].mxu1 %vm988_vm4, %v9141_v59  ;;  %v5107_v11 = vsel %vm12629_vm7, %v9671_v54, %v5106_v0  ;;  %v5108_v12 = vrot.slane %v5106_v0, 4  ;;  %v876_v15 = vshll.u32 %v13000_v46, 16  ;;  %v11794_v54 = vld [vmem:[%s16388_s0 + $0xc4] sm:$0xf] }
  0xeb   :  { %v860_v9 = vrot.slane %v859_v61, 4  ;;  %v855_v20 = vsel %vm12093_vm3, %v850_v1, %v854_v48  ;;  %v869_v21 = vrot.slane %v867_v6, 4  ;;  %v880_v13 = vshrl.u32 %v13000_v46, 16  ;;  %v13074_v63 = vld [vmem:[%s16388_s0 + $0x4] sm:$0xf] }
  0xec   :  { %v872_v23 = vrot.slane %v870_v7, 5  ;;  %v5110_v26 = vsel %vm12629_vm7, %v5108_v12, %v5109_v5  ;;  %v878_v28 = vrot.slane %v876_v15, 5  ;;  %v886_v30 = vshll.u32 %v118_v56, 16  ;;  %v11797_v1 = vld [vmem:[%s16388_s0 + $0xc8] sm:$0x1] }
  0xed   :  { %v865_v57 = vsel %vm12093_vm3, %v860_v9, %v864_v62  ;;  %v9704_v32 = vcombine.low %v5107_v11, %v5110_v26  ;;  %v882_v33 = vrot.slane %v880_v13, 4  ;;  %v9672_v34 = vrot.slane %v9640_v8, 9  ;;  %v11795_v62 = vld [vmem:[%s16388_s0] sm:$0xf]  ;;  %v9644_v5 = vld [vmem:[%s16388_s0 + $0xf0] sm:$0xe] }
  0xee   :  { %v9142_v31 = vcombine.low %v855_v20, %v865_v57  ;;  %v873_v58 = vor.u32 %v872_v23, %v869_v21  ;;  %v5113_v36 = vrot.slane %v11790_v35, 5  ;;  %v5116_v19 = vrot.slane %v11791_v37, 5  ;;  %v11798_v12 = vld [vmem:[%s16388_s0 + $0xe8] sm:$0xf]  ;;  %v11800_v13 = vld [vmem:[%s16388_s0 + $0xf4] sm:$0xf] }
  0xef   :  { %10847 = vmatprep.mubr.msk.bf16.mxu0 %vm988_vm4, %v9704_v32  ;;  %v883_v39 = vor.u32 %v882_v33, %v878_v28  ;;  %v888_v40 = vrot.slane %v886_v30, 5  ;;  %v9673_v60 = vrot.slane %v9641_v17, 9  ;;  %v5120_v55 = vrot.slane %v11792_v43, 5  ;;  %v11799_v17 = vld [vmem:[%s16388_s0 + $0xec] sm:$0x1] }
  0xf0   :  { %10553 = vmatprep.mubr.msk.bf16.mxu1 %vm988_vm4, %v9142_v31  ;;  %v874_v38 = vrot.slane %v873_v58, 4  ;;  %v5114_v22 = vsel %vm12629_vm7, %v9672_v34, %v5113_v36  ;;  %v5115_v41 = vrot.slane %v5113_v36, 4  ;;  %v5123_v16 = vrot.slane %v11793_v45, 5  ;;  %v9521_v26 = vld [vmem:[%s16388_s0 + $0x100] sm:$0xf] }
  0xf1   :  { %v884_v49 = vrot.slane %v883_v39, 4  ;;  %v9674_v50 = vrot.slane %v9642_v14, 9  ;;  %v5121_v52 = vsel %vm12629_vm7, %v9673_v60, %v5120_v55  ;;  %v5122_v53 = vrot.slane %v5120_v55, 4  ;;  %v9522_v14 = vld [vmem:[%s16388_s0 + $0x104] sm:$0x1] }
  0xf2   :  { %v879_v48 = vsel %vm12093_vm3, %v874_v38, %v878_v28  ;;  %v5117_v51 = vsel %vm12629_vm7, %v5115_v41, %v5116_v19  ;;  %v5127_v56 = vrot.slane %v11794_v54, 5  ;;  %v9176_v0 = vcombine.low %v11795_v62, %v13074_v63  ;;  %v9645_v31 = vld [vmem:[%s16388_s0 + $0xfc] sm:$0xe]  ;;  %v11801_v34 = vld [vmem:[%s16388_s0 + $0xf8] sm:$0x1] }
  0xf3   :  { %v889_v59 = vsel %vm12093_vm3, %v884_v49, %v888_v40  ;;  %v9705_v61 = vcombine.low %v5114_v22, %v5117_v51  ;;  %v5130_v4 = vrot.slane %v11797_v1, 5  ;;  %v5124_v7 = vsel %vm12629_vm7, %v5122_v53, %v5123_v16  ;;  %v13121_v37 = vld [vmem:[%s16388_s0 + $0x10c] sm:$0xf]  ;;  %v13129_v38 = vld [vmem:[%s16388_s0 + $0x10] sm:$0xf] }
  0xf4   :  { %v9143_v6 = vcombine.low %v879_v48, %v889_v59  ;;  %v5129_v8 = vrot.slane %v5127_v56, 4  ;;  %v9706_v9 = vcombine.low %v5121_v52, %v5124_v7  ;;  %v9675_v11 = vrot.slane %v9643_v47, 9  ;;  %v11802_v19 = vld [vmem:[%s16388_s0 + $0xc] sm:$0xf]  ;;  %v11804_v41 = vld [vmem:[%s16388_s0 + $0x18] sm:$0xf] }
  0xf5   :  { %10848 = vmatmul.mubr.msk.bf16.gmra.mrb[24].mxu0 %vm988_vm4, %v9705_v61  ;;  %v5134_v15 = vrot.slane %v11798_v12, 5  ;;  %v5137_v20 = vrot.slane %v11799_v17, 5  ;;  %v5128_v21 = vsel %vm12629_vm7, %v9674_v50, %v5127_v56  ;;  %v5141_v57 = vrot.slane %v11800_v13, 5  ;;  %v13138_v43 = vld [vmem:[%s16388_s0 + $0x1c] sm:$0xf] }
  0xf6   :  { %10554 = vmatmul.mubr.msk.bf16.gmra.mrb[60].mxu1 %vm988_vm4, %v9143_v6  ;;  %v5131_v23 = vsel %vm12629_vm7, %v5129_v8, %v5130_v4  ;;  %10851 = vmatprep.mubr.msk.bf16.mxu0 %vm988_vm4, %v9706_v9  ;;  %v9676_v32 = vrot.slane %v9644_v5, 9  ;;  %v5144_v35 = vrot.slane %v11801_v34, 5  ;;  %v5148_v36 = vrot.slane %v9521_v26, 5  ;;  %v11806_v47 = vld [vmem:[%s16389_s1 + $0x4] sm:$0x3] }
  0xf7   :  { %10559 = vmatprep.mubr.msk.bf16.mxu1 %vm988_vm4, %v9176_v0  ;;  %v5135_v28 = vsel %vm12629_vm7, %v9675_v11, %v5134_v15  ;;  %v5136_v30 = vrot.slane %v5134_v15, 4  ;;  %v9707_v58 = vcombine.low %v5128_v21, %v5131_v23  ;;  %v9177_v39 = vcombine.low %v11802_v19, %v13129_v38  ;;  %v9527_v49 = vld [vmem:[%s16388_s0 + $0x118] sm:$0xf]  ;;  %v13158_v52 = vld [vmem:[%s16388_s0 + $0x110] sm:$0x1] }
  0xf8   :  { %v5143_v60 = vrot.slane %v5141_v57, 4  ;;  %v9677_v22 = vrot.slane %v9645_v31, 9  ;;  %v9178_v55 = vcombine.low %v11804_v41, %v13138_v43  ;;  %v5150_v45 = vrot.slane %v5148_v36, 4  ;;  %v9646_v59 = vld [vmem:[%s16388_s0 + $0x108] sm:$0xe] }
  0xf9   :  { %v5138_v33 = vsel %vm12629_vm7, %v5136_v30, %v5137_v20  ;;  %v5151_v16 = vrot.slane %v9522_v14, 5  ;;  %v2444_v48 = vsel %vm1085_vm0, %v11806_v47, 0  ;;  %v5142_v50 = vsel %vm12629_vm7, %v9676_v32, %v5141_v57  ;;  %v9528_v61 = vld [vmem:[%s16388_s0 + $0x11c] sm:$0x1]  ;;  %v9647_v0 = vld [vmem:[%s16388_s0 + $0x114] sm:$0xe] }
  0xfa   :  { %v9708_v40 = vcombine.low %v5135_v28, %v5138_v33  ;;  %v5145_v51 = vsel %vm12629_vm7, %v5143_v60, %v5144_v35  ;;  %v5155_v53 = vrot.slane %v13121_v37, 5  ;;  %v5149_v54 = vsel %vm12629_vm7, %v9677_v22, %v5148_v36  ;;  %v11807_v1 = vld [vmem:[%s16388_s0 + $0x24] sm:$0xf]  ;;  %v13181_v4 = vld [vmem:[%s16388_s0 + $0x28] sm:$0xf] }
  0xfb   :  { %v5152_v56 = vsel %vm12629_vm7, %v5150_v45, %v5151_v16  ;;  %v5162_v62 = vrot.slane %v9527_v49, 5  ;;  %v9179_v5 = vcombine.low %v11807_v1, %v13181_v4  ;;  %v9709_v6 = vcombine.low %v5142_v50, %v5145_v51 }
  0xfc   :  { %v9710_v7 = vcombine.low %v5149_v54, %v5152_v56  ;;  %v9678_v8 = vrot.slane %v9646_v59, 9  ;;  %v5157_v9 = vrot.slane %v5155_v53, 4  ;;  %v5158_v11 = vrot.slane %v13158_v52, 5 }
  0xfd   :  { %10852 = vmatmul.mubr.msk.bf16.gmra.mrb[28].mxu0 %vm988_vm4, %v9707_v58 }
  0xfe   :  { %10560 = vmatmul.mubr.msk.bf16.vlgmr.msra.gmra.mrb[0].mxu1 %vm988_vm4, %v9177_v39  ;;  %10855 = vmatprep.mubr.msk.bf16.mxu0 %vm988_vm4, %v9708_v40 }
  0xff   :  { %10563 = vmatprep.mubr.msk.bf16.mxu1 %vm988_vm4, %v9178_v55  ;;  %10624 = vmatpush3.bf16.msra.mxu1 %v2444_v48 }
 0x100   :  { %10 = vsyncpa [#allocation3], 0  ;;  %v11809_v12 = vld [vmem:[%s16388_s0 + $0x30] sm:$0xf]  ;;  %v13191_v15 = vld [vmem:[%s16388_s0 + $0x34] sm:$0xf]  ;;  %v5156_v26 = vsel %vm12629_vm7, %v9678_v8, %v5155_v53  ;;  %v5159_v28 = vsel %vm12629_vm7, %v5157_v9, %v5158_v11 }
 0x101   :  { %v9180_v17 = vcombine.low %v11809_v12, %v13191_v15  ;;  %v9679_v20 = vrot.slane %v9647_v0, 9  ;;  %v5164_v21 = vrot.slane %v5162_v62, 4  ;;  %v5165_v23 = vrot.slane %v9528_v61, 5  ;;  %v9530_v13 = vld [vmem:[%s16388_s0 + $0x124] sm:$0xf]  ;;  %s12012_s22 = smov [#allocation2]  }
 0x102   :  { %v9533_v57 = vld [vmem:[%s16388_s0 + $0x130] sm:$0xf]  ;;  %v9531_v30 = vld [vmem:[%s16388_s0 + $0x128] sm:$0x1]  ;;  %v5169_v14 = vrot.slane %v9530_v13, 5  ;;  %v9711_v60 = vcombine.low %v5156_v26, %v5159_v28  ;;  %vm12010_vm8 = vmmov 0  }
 0x103   :  { %v5163_v31 = vsel %vm12629_vm7, %v9679_v20, %v5162_v62  ;;  %v5166_v32 = vsel %vm12629_vm7, %v5164_v21, %v5165_v23  ;;  %v9648_v58 = vld [vmem:[%s16388_s0 + $0x120] sm:$0xe]  ;;  %v5176_v33 = vrot.slane %v9533_v57, 5  ;;  %v13221_v34 = vld [vmem:[%s16389_s1 + $0x6] sm:$0x3]  ;;  %v5172_v45 = vrot.slane %v9531_v30, 5 }
 0x104   :  { %v9534_v35 = vld [vmem:[%s16388_s0 + $0x134] sm:$0x1]  ;;  %v9649_v36 = vld [vmem:[%s16388_s0 + $0x12c] sm:$0xe]  ;;  %11661 = vmatprep.subr.msk.bf16.mxu1 %vm1085_vm0, %v13221_v34  ;;  %v11811_v19 = vld [vmem:[%s16388_s0 + $0x3c] sm:$0xf]  ;;  %v9712_v22 = vcombine.low %v5163_v31, %v5166_v32 }
 0x105   :  { %10856 = vmatmul.mubr.msk.bf16.gmra.mrb[32].mxu0 %vm988_vm4, %v9709_v6  ;;  %v13237_v39 = vld [vmem:[%s16388_s0 + $0x40] sm:$0xf]  ;;  %v9680_v41 = vrot.slane %v9648_v58, 9  ;;  %v5171_v55 = vrot.slane %v5169_v14, 4  ;;  %v11813_v16 = vld [vmem:[%s16388_s0 + $0x48] sm:$0xf] }
 0x106   :  { %10564 = vmatmul.mubr.msk.bf16.gmra.mrb[4].mxu1 %vm988_vm4, %v9179_v5  ;;  %10859 = vmatprep.mubr.msk.bf16.mxu0 %vm988_vm4, %v9710_v7  ;;  %v9181_v40 = vcombine.low %v11811_v19, %v13237_v39  ;;  %v13246_v47 = vld [vmem:[%s16388_s0 + $0x4c] sm:$0xf]  ;;  %v9681_v49 = vrot.slane %v9649_v36, 9  ;;  %v5178_v50 = vrot.slane %v5176_v33, 4  ;;  %v5179_v51 = vrot.slane %v9534_v35, 5  ;;  %s9103_s23 = sshll.u32 %s12012_s22, 4  ;;  %s9104_s23 = int_to_ptr.vmem [resolvable:$true] %s9103_s23 }
 0x107   :  { %10567 = vmatprep.mubr.msk.bf16.mxu1 %vm988_vm4, %v9180_v17  ;;  %v9182_v48 = vcombine.low %v11813_v16, %v13246_v47  ;;  %v9536_v53 = vld [vmem:[%s16388_s0 + $0x13c] sm:$0xf]  ;;  %v9539_v54 = vld [vmem:[%s16388_s0 + $0x148] sm:$0xf]  ;;  %v5170_v56 = vsel %vm12629_vm7, %v9680_v41, %v5169_v14  ;;  %v5173_v59 = vsel %vm12629_vm7, %v5171_v55, %v5172_v45  ;;  %v9537_v1 = vld [vmem:[%s16388_s0 + $0x140] sm:$0x1]  ;;  %p11990_p1 = scmp.lt.s32.totalorder %s9104_s23, %s9104_s23 }
 0x108   :  { %v5183_v61 = vrot.slane %v9536_v53, 5  ;;  %v5177_v62 = vsel %vm12629_vm7, %v9681_v49, %v5176_v33  ;;  %v5180_v0 = vsel %vm12629_vm7, %v5178_v50, %v5179_v51  ;;  %v9650_v5 = vld [vmem:[%s16388_s0 + $0x138] sm:$0xe]  ;;  %v5190_v6 = vrot.slane %v9539_v54, 5  ;;  %v9540_v7 = vld [vmem:[%s16388_s0 + $0x14c] sm:$0x1] }
 0x109   :  { %v9651_v8 = vld [vmem:[%s16388_s0 + $0x144] sm:$0xe]  ;;  %v11815_v9 = vld [vmem:[%s16388_s0 + $0x54] sm:$0xf]  ;;  %v13285_v11 = vld [vmem:[%s16388_s0 + $0x58] sm:$0xf]  ;;  %v9713_v17 = vcombine.low %v5170_v56, %v5173_v59  ;;  %v9714_v20 = vcombine.low %v5177_v62, %v5180_v0 }
 0x10a   :  { %v9183_v12 = vcombine.low %v11815_v9, %v13285_v11  ;;  %v9682_v21 = vrot.slane %v9650_v5, 9  ;;  %v5185_v23 = vrot.slane %v5183_v61, 4  ;;  %v5186_v13 = vrot.slane %v9537_v1, 5  ;;  %v11817_v57 = vld [vmem:[%s16388_s0 + $0x60] sm:$0xf]  ;;  %s11985_s24 = scalar_lea.vmem %s9104_s23, 32 }
 0x10b   :  { %v13294_v26 = vld [vmem:[%s16388_s0 + $0x64] sm:$0xf]  ;;  %v9683_v30 = vrot.slane %v9651_v8, 9  ;;  %v5192_v14 = vrot.slane %v5190_v6, 4  ;;  %v5193_v31 = vrot.slane %v9540_v7, 5  ;;  %vm9023_vm9 = vcmask 1041409   ;;  %p11986_p0 = scmp.ne.s32.totalorder %s9104_s23, %s11985_s24  ;;  %p11991_p2 = scmp.lt.s32.totalorder %s11985_s24, %s11985_s24 }
 0x10c   :  { %v9184_v28 = vcombine.low %v11817_v57, %v13294_v26  ;;  %v9542_v32 = vld [vmem:[%s16388_s0 + $0x154] sm:$0xf]  ;;  %v9545_v58 = vld [vmem:[%s16388_s0 + $0x160] sm:$0xf]  ;;  %v5184_v33 = vsel %vm12629_vm7, %v9682_v21, %v5183_v61  ;;  %v5187_v35 = vsel %vm12629_vm7, %v5185_v23, %v5186_v13  ;;  %v9546_v55 = vld [vmem:[%s16388_s0 + $0x164] sm:$0x1] }
 0x10d   :  { %10860 = vmatmul.mubr.msk.bf16.gmra.mrb[36].mxu0 %vm988_vm4, %v9711_v60  ;;  %v5197_v36 = vrot.slane %v9542_v32, 5  ;;  %v5191_v19 = vsel %vm12629_vm7, %v9683_v30, %v5190_v6  ;;  %v9543_v60 = vld [vmem:[%s16388_s0 + $0x158] sm:$0x1]  ;;  %v5204_v41 = vrot.slane %v9545_v58, 5  ;;  %v9653_v45 = vld [vmem:[%s16388_s0 + $0x15c] sm:$0xe]  ;;  %v9715_v50 = vcombine.low %v5184_v33, %v5187_v35  ;;  %p11992_p3 = por %p11991_p2, %p11990_p1 }
 0x10e   :  { %10568 = vmatmul.mubr.msk.bf16.gmra.mrb[8].mxu1 %vm988_vm4, %v9181_v40  ;;  %10863 = vmatprep.mubr.msk.bf16.mxu0 %vm988_vm4, %v9712_v22  ;;  %v5194_v40 = vsel %vm12629_vm7, %v5192_v14, %v5193_v31  ;;  %v9652_v22 = vld [vmem:[%s16388_s0 + $0x150] sm:$0xe]  ;;  %v11819_v16 = vld [vmem:[%s16388_s0 + $0x6c] sm:$0xf]  ;;  %v5200_v56 = vrot.slane %v9543_v60, 5  ;;  %v9685_v0 = vrot.slane %v9653_v45, 9 }
 0x10f   :  { %10571 = vmatprep.mubr.msk.bf16.mxu1 %vm988_vm4, %v9182_v48  ;;  %v13333_v48 = vld [vmem:[%s16388_s0 + $0x70] sm:$0xf]  ;;  %v9716_v51 = vcombine.low %v5191_v19, %v5194_v40  ;;  %v9684_v53 = vrot.slane %v9652_v22, 9  ;;  %v5199_v54 = vrot.slane %v5197_v36, 4  ;;  %v11821_v59 = vld [vmem:[%s16388_s0 + $0x78] sm:$0xf]  ;;  %p11993_p4 = pnand %p11992_p3, %p11986_p0 }
 0x110   :  { %v9185_v49 = vcombine.low %v11819_v16, %v13333_v48  ;;  %v13342_v61 = vld [vmem:[%s16388_s0 + $0x7c] sm:$0xf]  ;;  %v5206_v1 = vrot.slane %v5204_v41, 4  ;;  %v5207_v5 = vrot.slane %v9546_v55, 5  ;;  %v9548_v6 = vld [vmem:[%s16388_s0 + $0x16c] sm:$0xf] }
 0x111   :  { %v9186_v62 = vcombine.low %v11821_v59, %v13342_v61  ;;  %v9551_v7 = vld [vmem:[%s16388_s0 + $0x178] sm:$0xf]  ;;  %v5198_v8 = vsel %vm12629_vm7, %v9684_v53, %v5197_v36  ;;  %v5201_v9 = vsel %vm12629_vm7, %v5199_v54, %v5200_v56  ;;  %v9549_v21 = vld [vmem:[%s16388_s0 + $0x170] sm:$0x1]  ;;  %v9654_v23 = vld [vmem:[%s16388_s0 + $0x168] sm:$0xe] }
 0x112   :  { %v5218_v13 = vrot.slane %v9551_v7, 5  ;;  %v9552_v57 = vld [vmem:[%s16388_s0 + $0x17c] sm:$0x1]  ;;  %v11823_v30 = vld [vmem:[%s16388_s0 + $0x84] sm:$0xf]  ;;  %v9717_v32 = vcombine.low %v5198_v8, %v5201_v9  ;;  %v9686_v33 = vrot.slane %v9654_v23, 9 }
 0x113   :  { %v13381_v14 = vld [vmem:[%s16388_s0 + $0x88] sm:$0xf]  ;;  %v5214_v36 = vrot.slane %v9549_v21, 5  ;;  %v11825_v19 = vld [vmem:[%s16388_s0 + $0x90] sm:$0xf]  ;;  %v5221_v55 = vrot.slane %v9552_v57, 5 }
 0x114   :  { %v9187_v31 = vcombine.low %v11823_v30, %v13381_v14  ;;  %v13390_v40 = vld [vmem:[%s16388_s0 + $0x94] sm:$0xf]  ;;  %v9554_v45 = vld [vmem:[%s16388_s0 + $0x184] sm:$0xf]  ;;  %v9557_v16 = vld [vmem:[%s16388_s0 + $0x190] sm:$0xf] }
 0x115   :  { %10864 = vmatmul.mubr.msk.bf16.gmra.mrb[40].mxu0 %vm988_vm4, %v9713_v17  ;;  %v5205_v17 = vsel %vm12629_vm7, %v9685_v0, %v5204_v41  ;;  %v9188_v60 = vcombine.low %v11825_v19, %v13390_v40  ;;  %v5220_v41 = vrot.slane %v5218_v13, 4  ;;  %v9555_v56 = vld [vmem:[%s16388_s0 + $0x188] sm:$0x1]  ;;  %v9656_v59 = vld [vmem:[%s16388_s0 + $0x180] sm:$0xe] }
 0x116   :  { %10572 = vmatmul.mubr.msk.bf16.gmra.mrb[12].mxu1 %vm988_vm4, %v9183_v12  ;;  %10867 = vmatprep.mubr.msk.bf16.mxu0 %vm988_vm4, %v9714_v20  ;;  %v5211_v12 = vrot.slane %v9548_v6, 5  ;;  %v5208_v20 = vsel %vm12629_vm7, %v5206_v1, %v5207_v5  ;;  %v9558_v0 = vld [vmem:[%s16388_s0 + $0x194] sm:$0x1]  ;;  %v9657_v1 = vld [vmem:[%s16388_s0 + $0x18c] sm:$0xe] }
 0x117   :  { %10575 = vmatprep.mubr.msk.bf16.mxu1 %vm988_vm4, %v9184_v28  ;;  %v9655_v28 = vld [vmem:[%s16388_s0 + $0x174] sm:$0xe]  ;;  %v9718_v58 = vcombine.low %v5205_v17, %v5208_v20  ;;  %v5222_v54 = vsel %vm12629_vm7, %v5220_v41, %v5221_v55  ;;  %v11827_v5 = vld [vmem:[%s16388_s0 + $0x9c] sm:$0xf]  ;;  %v13429_v6 = vld [vmem:[%s16388_s0 + $0xa0] sm:$0xf] }
 0x118   :  { %v5213_v35 = vrot.slane %v5211_v12, 4  ;;  %v9687_v22 = vrot.slane %v9655_v28, 9  ;;  %v9189_v7 = vcombine.low %v11827_v5, %v13429_v6  ;;  %v5228_v20 = vrot.slane %v9555_v56, 5  ;;  %v11829_v21 = vld [vmem:[%s16388_s0 + $0xa8] sm:$0xf] }
 0x119   :  { %v13438_v23 = vld [vmem:[%s16388_s0 + $0xac] sm:$0xf]  ;;  %v9689_v57 = vrot.slane %v9657_v1, 9  ;;  %v5235_v30 = vrot.slane %v9558_v0, 5  ;;  %v9561_v19 = vld [vmem:[%s16388_s0 + $0x1a0] sm:$0x1] }
 0x11a   :  { %v5219_v53 = vsel %vm12629_vm7, %v9687_v22, %v5218_v13  ;;  %v9190_v13 = vcombine.low %v11829_v21, %v13438_v23  ;;  %v11831_v22 = vld [vmem:[%s16388_s0 + $0xb4] sm:$0xf]  ;;  %v13468_v41 = vld [vmem:[%s16388_s0 + $0xb8] sm:$0xf]  ;;  %v11835_v1 = vld [vmem:[%s16388_s0 + $0xe4] sm:$0xf] }
 0x11b   :  { %v9720_v9 = vcombine.low %v5219_v53, %v5222_v54  ;;  %v9191_v55 = vcombine.low %v11831_v22, %v13468_v41  ;;  %v11833_v53 = vld [vmem:[%s16388_s0 + $0xd8] sm:$0xf]  ;;  %v13477_v54 = vld [vmem:[%s16388_s0 + $0xdc] sm:$0xf]  ;;  %v13494_v5 = vld [vmem:[%s16388_s0 + $0xe8] sm:$0xf] }
 0x11c   :  { %v9192_v56 = vcombine.low %v11833_v53, %v13477_v54  ;;  %v11839_v21 = vld [vmem:[%s16388_s0 + $0xfc] sm:$0xf]  ;;  %v13589_v53 = vld [vmem:[%s16388_s0 + $0x130] sm:$0xf]  ;;  %v11981_v29 = vld [vmem:[%s16388_s0 + $0x194] sm:$0x1] }
 0x11d   :  { %10868 = vmatmul.mubr.msk.bf16.gmra.mrb[44].mxu0 %vm988_vm4, %v9715_v50  ;;  %v5215_v50 = vsel %vm12629_vm7, %v5213_v35, %v5214_v36 }
 0x11e   :  { %10576 = vmatmul.mubr.msk.bf16.gmra.mrb[16].mxu1 %vm988_vm4, %v9185_v49  ;;  %10871 = vmatprep.mubr.msk.bf16.mxu0 %vm988_vm4, %v9716_v51  ;;  %v5212_v49 = vsel %vm12629_vm7, %v9686_v33, %v5211_v12  ;;  %v5225_v51 = vrot.slane %v9554_v45, 5  ;;  %v9688_v12 = vrot.slane %v9656_v59, 9 }
 0x11f   :  { %10579 = vmatprep.mubr.msk.bf16.mxu1 %vm988_vm4, %v9186_v62  ;;  %v5232_v62 = vrot.slane %v9557_v16, 5  ;;  %v9719_v8 = vcombine.low %v5212_v49, %v5215_v50 }
 0x120   :  { %v5227_v17 = vrot.slane %v5225_v51, 4 }
 0x121   :  { %v5234_v28 = vrot.slane %v5232_v62, 4  ;;  %v5233_v35 = vsel %vm12629_vm7, %v9689_v57, %v5232_v62 }
 0x123   :  { %v5236_v36 = vsel %vm12629_vm7, %v5234_v28, %v5235_v30  ;;  %v11841_v28 = vld [vmem:[%s16389_s1 + $0xe] sm:$0x3] }
 0x124   :  { %v9722_v16 = vcombine.low %v5233_v35, %v5236_v36  ;;  %v7532_v30 = vsel %vm1085_vm0, %v11841_v28, 0  ;;  %v13545_v35 = vld [vmem:[%s16389_s1 + $0x10] sm:$0x3]  ;;  %v11697_v36 = vld [vmem:[%s16388_s0 + $0x3c] sm:$0xff]  }
 0x125   :  { %10872 = vmatmul.mubr.msk.bf16.gmra.mrb[48].mxu0 %vm988_vm4, %v9717_v32  ;;  %v5226_v32 = vsel %vm12629_vm7, %v9688_v12, %v5225_v51  ;;  %v5242_v51 = vrot.slane %v9561_v19, 5  ;;  %v13506_v12 = vld [vmem:[%s16388_s0 + $0xf4] sm:$0xf] }
 0x126   :  { %10580 = vmatmul.mubr.msk.bf16.gmra.mrb[20].mxu1 %vm988_vm4, %v9187_v31  ;;  %10875 = vmatprep.mubr.msk.bf16.mxu0 %vm988_vm4, %v9718_v58  ;;  %v9560_v31 = vld [vmem:[%s16388_s0 + $0x19c] sm:$0xf]  ;;  %v5229_v58 = vsel %vm12629_vm7, %v5227_v17, %v5228_v20  ;;  %v11693_v20 = vld [vmem:[%s16388_s0 + $0x24] sm:$0xff]   ;;  %v11844_v19 = vld [vmem:[%s16388_s0 + $0x114] sm:$0xf] }
 0x127   :  { %10583 = vmatprep.mubr.msk.bf16.mxu1 %vm988_vm4, %v9188_v60  ;;  %v5239_v33 = vrot.slane %v9560_v31, 5  ;;  %v9658_v60 = vld [vmem:[%s16388_s0 + $0x198] sm:$0xe]  ;;  %v9721_v45 = vcombine.low %v5226_v32, %v5229_v58  ;;  %v11842_v31 = vld [vmem:[%s16388_s0 + $0x108] sm:$0xf] }
 0x128   :  { %v9690_v49 = vrot.slane %v9658_v60, 9  ;;  %v13535_v32 = vld [vmem:[%s16388_s0 + $0x10c] sm:$0xf]  ;;  %v13561_v60 = vld [vmem:[%s16388_s0 + $0x118] sm:$0xf] }
 0x129   :  { %v5241_v50 = vrot.slane %v5239_v33, 4  ;;  %v9196_v58 = vcombine.low %v11842_v31, %v13535_v32  ;;  %v9197_v22 = vcombine.low %v11844_v19, %v13561_v60  ;;  %v11856_v31 = vld [vmem:[%s16388_s0 + $0x15c] sm:$0xf]  ;;  %v9204_v19 = vcombine.low %v12885_v42, %v12896_v25  ;;  %v1928_v25 = vld [vmem:[%s16388_s0 + $0x18] sm:$0xe] }
 0x12a   :  { %v5240_v59 = vsel %vm12629_vm7, %v9690_v49, %v5239_v33  ;;  %v11695_v33 = vld [vmem:[%s16388_s0 + $0x30] sm:$0xff]   ;;  %v4044_v42 = vshrl.u32 %v13121_v37, 16 }
 0x12b   :  { %v5243_v62 = vsel %vm12629_vm7, %v5241_v50, %v5242_v51  ;;  %v11701_v50 = vld [vmem:[%s16388_s0 + $0x54] sm:$0xff]   ;;  %v11848_v51 = vld [vmem:[%s16388_s0 + $0x12c] sm:$0xf] }
 0x12c   :  { %v9723_v0 = vcombine.low %v5240_v59, %v5243_v62  ;;  %v11703_v59 = vld [vmem:[%s16388_s0 + $0x60] sm:$0xff]   ;;  %v11850_v62 = vld [vmem:[%s16388_s0 + $0x138] sm:$0xf] }
 0x12d   :  { %10876 = vmatmul.mubr.msk.bf16.gmra.mrb[52].mxu0 %vm988_vm4, %v9719_v8  ;;  %v11691_v8 = vld [vmem:[%s16388_s0 + $0x18] sm:$0xff]  }
 0x12e   :  { %10584 = vmatmul.mubr.msk.bf16.gmra.mrb[24].mxu1 %vm988_vm4, %v9189_v7  ;;  %10879 = vmatprep.mubr.msk.bf16.mxu0 %vm988_vm4, %v9720_v9  ;;  %v9193_v7 = vcombine.low %v11835_v1, %v13494_v5  ;;  %v11837_v9 = vld [vmem:[%s16388_s0 + $0xf0] sm:$0xf] }
 0x12f   :  { %10587 = vmatprep.mubr.msk.bf16.mxu1 %vm988_vm4, %v9190_v13  ;;  %v9194_v17 = vcombine.low %v11837_v9, %v13506_v12  ;;  %v13522_v13 = vld [vmem:[%s16388_s0 + $0x100] sm:$0xf]  ;;  %v13617_v9 = vld [vmem:[%s16388_s0 + $0x148] sm:$0xf] }
 0x130   :  { %v9195_v57 = vcombine.low %v11839_v21, %v13522_v13  ;;  %v11854_v21 = vld [vmem:[%s16388_s0 + $0x150] sm:$0xf] }
 0x135   :  { %10880 = vmatmul.mubr.msk.bf16.gmra.mrb[56].mxu0 %vm988_vm4, %v9721_v45  ;;  %v11846_v45 = vld [vmem:[%s16388_s0 + $0x120] sm:$0xf] }
 0x136   :  { %10588 = vmatmul.mubr.msk.bf16.gmra.mrb[28].mxu1 %vm988_vm4, %v9191_v55  ;;  %10883 = vmatprep.mubr.msk.bf16.mxu0 %vm988_vm4, %v9722_v16  ;;  %v11699_v55 = vld [vmem:[%s16388_s0 + $0x48] sm:$0xff]   ;;  %v13573_v16 = vld [vmem:[%s16388_s0 + $0x124] sm:$0xf] }
 0x137   :  { %10591 = vmatprep.mubr.msk.bf16.mxu1 %vm988_vm4, %v9192_v56  ;;  %v9198_v49 = vcombine.low %v11846_v45, %v13573_v16  ;;  %v9199_v56 = vcombine.low %v11848_v51, %v13589_v53  ;;  %v2027_v45 = vrot.slane %v13074_v63, 5  ;;  %v4040_v51 = vshll.u32 %v13121_v37, 16  ;;  %v11858_v63 = vld [vmem:[%s16388_s0 + $0x8] sm:$0x1]  ;;  %v11859_v37 = vld [vmem:[%s16388_s0 + $0x14] sm:$0x1] }
 0x13d   :  { %10884 = vmatmul.mubr.msk.bf16.gmra.mrb[60].mxu0 %vm988_vm4, %v9723_v0  ;;  %v13601_v0 = vld [vmem:[%s16388_s0 + $0x13c] sm:$0xf] }
 0x13e   :  { %10592 = vmatmul.mubr.msk.bf16.gmra.mrb[32].mxu1 %vm988_vm4, %v9193_v7  ;;  %10889 = vmatprep.mubr.msk.bf16.mxu0 %vm988_vm4, %v11691_v8  ;;  %v9200_v1 = vcombine.low %v11850_v62, %v13601_v0  ;;  %v11705_v7 = vld [vmem:[%s16388_s0 + $0x6c] sm:$0xff]   ;;  %v11852_v8 = vld [vmem:[%s16388_s0 + $0x144] sm:$0xf] }
 0x13f   :  { %10595 = vmatprep.mubr.msk.bf16.mxu1 %vm988_vm4, %v9194_v17  ;;  %v9201_v17 = vcombine.low %v11852_v8, %v13617_v9  ;;  %v2029_v8 = vrot.slane %v2027_v45, 4 }
 0x145   :  { %10890 = vmatmul.mubr.msk.bf16.vlgmr.msra.gmra.mrb[0].mxu0 %vm988_vm4, %v11693_v20  ;;  %v11707_v20 = vld [vmem:[%s16388_s0 + $0x78] sm:$0xff]  }
 0x146   :  { %10596 = vmatmul.mubr.msk.bf16.gmra.mrb[36].mxu1 %vm988_vm4, %v9195_v57  ;;  %10954 = vmatpush3.bf16.msra.mxu0 %v7532_v30  ;;  %v13629_v57 = vld [vmem:[%s16388_s0 + $0x154] sm:$0xf]  ;;  %v11709_v30 = vld [vmem:[%s16388_s0 + $0x84] sm:$0xff]  }
 0x147   :  { %10599 = vmatprep.mubr.msk.bf16.mxu1 %vm988_vm4, %v9196_v58  ;;  %10893 = vmatprep.mubr.msk.bf16.mxu0 %vm988_vm4, %v11695_v33  ;;  %16407 = vst [vmem:[#allocation6_spill] sm:$0xff] %v13629_v57  ;;  %v9202_v28 = vcombine.low %v11854_v21, %v13629_v57  ;;  %v13645_v58 = vld [vmem:[%s16388_s0 + $0x160] sm:$0xf] }
 0x148   :  { %11667 = vmatprep.subr.msk.bf16.mxu0 %vm1085_vm0, %v13545_v35  ;;  %16408 = vst [vmem:[#allocation7_spill] sm:$0xff] %v13645_v58  ;;  %v9203_v33 = vcombine.low %v11856_v31, %v13645_v58  ;;  %v13689_v31 = vrot.slane %v4044_v42, 4  ;;  %v2055_v42 = vrot.slane %v13191_v15, 5 }
 0x14a   :  { %16410 = vst [vmem:[#allocation9_spill] sm:$0xff] %v13689_v31 }
 0x14d   :  { %10894 = vmatmul.mubr.msk.bf16.gmra.mrb[4].mxu0 %vm988_vm4, %v11697_v36  ;;  %v11711_v36 = vld [vmem:[%s16388_s0 + $0x90] sm:$0xff]  }
 0x14e   :  { %10600 = vmatmul.mubr.msk.bf16.gmra.mrb[40].mxu1 %vm988_vm4, %v9197_v22  ;;  %10897 = vmatprep.mubr.msk.bf16.mxu0 %vm988_vm4, %v11699_v55  ;;  %v2034_v22 = vrot.slane %v13129_v38, 5  ;;  %v1926_v55 = vld [vmem:[%s16388_s0] sm:$0xe]  ;;  %v2030_v38 = vrot.slane %v11858_v63, 5  ;;  %v9207_v63 = vcombine.low %v12993_v27, %v13000_v46  ;;  %v11862_v27 = vld [vmem:[%s16388_s0 + $0x38] sm:$0x1] }
 0x14f   :  { %10603 = vmatprep.mubr.msk.bf16.mxu1 %vm988_vm4, %v9198_v49  ;;  %v1927_v49 = vld [vmem:[%s16388_s0 + $0xc] sm:$0xe]  ;;  %v9240_v62 = vrot.slane %v1926_v55, 9  ;;  %v1930_v55 = vld [vmem:[%s16388_s0 + $0x30] sm:$0xe]  ;;  %v2058_v46 = vrot.slane %v11862_v27, 5 }
 0x155   :  { %10898 = vmatmul.mubr.msk.bf16.gmra.mrb[8].mxu0 %vm988_vm4, %v11701_v50  ;;  %v2041_v50 = vrot.slane %v13138_v43, 5  ;;  %v2037_v43 = vrot.slane %v11859_v37, 5  ;;  %v1931_v37 = vld [vmem:[%s16388_s0 + $0x3c] sm:$0xe] }
 0x156   :  { %10604 = vmatmul.mubr.msk.bf16.gmra.mrb[44].mxu1 %vm988_vm4, %v9199_v56  ;;  %10901 = vmatprep.mubr.msk.bf16.mxu0 %vm988_vm4, %v11703_v59  ;;  %v4050_v56 = vshll.u32 %v13158_v52, 16  ;;  %v11713_v59 = vld [vmem:[%s16388_s0 + $0x9c] sm:$0xff]  }
 0x157   :  { %10607 = vmatprep.mubr.msk.bf16.mxu1 %vm988_vm4, %v9200_v1  ;;  %v9241_v1 = vrot.slane %v1927_v49, 9  ;;  %v11860_v52 = vld [vmem:[%s16388_s0 + $0x20] sm:$0x1] }
 0x158   :  { %v2044_v21 = vrot.slane %v11860_v52, 5  ;;  %v13700_v49 = vrot.slane %v4050_v56, 5  ;;  %v1933_v52 = vld [vmem:[%s16388_s0 + $0x54] sm:$0xe] }
 0x15a   :  { %16411 = vst [vmem:[#allocation10_spill] sm:$0xff] %v13700_v49 }
 0x15d   :  { %10902 = vmatmul.mubr.msk.bf16.gmra.mrb[12].mxu0 %vm988_vm4, %v11705_v7  ;;  %v2036_v7 = vrot.slane %v2034_v22, 4 }
 0x15e   :  { %10608 = vmatmul.mubr.msk.bf16.gmra.mrb[48].mxu1 %vm988_vm4, %v9201_v17  ;;  %10905 = vmatprep.mubr.msk.bf16.mxu0 %vm988_vm4, %v11707_v20  ;;  %v9242_v17 = vrot.slane %v1928_v25, 9  ;;  %v2043_v20 = vrot.slane %v2041_v50, 4 }
 0x15f   :  { %10611 = vmatprep.mubr.msk.bf16.mxu1 %vm988_vm4, %v9202_v28  ;;  %v1929_v28 = vld [vmem:[%s16388_s0 + $0x24] sm:$0xe] }
 0x160   :  { %v9243_v25 = vrot.slane %v1929_v28, 9  ;;  %v13726_v15 = vsel %vm12629_vm7, %v2043_v20, %v2044_v21  ;;  %v2069_v20 = vrot.slane %v13246_v47, 5  ;;  %v9245_v28 = vrot.slane %v1931_v37, 9  ;;  %v11865_v37 = vld [vmem:[%s16388_s0 + $0x5c] sm:$0x1] }
 0x161   :  { %v2083_v47 = vrot.slane %v13294_v26, 5  ;;  %v1935_v26 = vld [vmem:[%s16388_s0 + $0x6c] sm:$0xe]  ;;  %v2079_v27 = vrot.slane %v11865_v37, 5  ;;  %v1936_v37 = vld [vmem:[%s16388_s0 + $0x78] sm:$0xe] }
 0x165   :  { %10906 = vmatmul.mubr.msk.bf16.gmra.mrb[16].mxu0 %vm988_vm4, %v11709_v30  ;;  %v13687_v30 = vrot.slane %v4040_v51, 5  ;;  %v9206_v51 = vcombine.low %v12956_v10, %v12964_v18  ;;  %v2031_v10 = vsel %vm12629_vm7, %v2029_v8, %v2030_v38  ;;  %v13722_v18 = vsel %vm12629_vm7, %v9242_v17, %v2041_v50  ;;  %v11861_v50 = vld [vmem:[%s16388_s0 + $0x2c] sm:$0x1]  ;;  %v1932_v17 = vld [vmem:[%s16388_s0 + $0x48] sm:$0xe] }
 0x166   :  { %10612 = vmatmul.mubr.msk.bf16.gmra.mrb[52].mxu1 %vm988_vm4, %v9203_v33  ;;  %10909 = vmatprep.mubr.msk.bf16.mxu0 %vm988_vm4, %v11711_v36  ;;  %v9205_v33 = vcombine.low %v12921_v24, %v12928_v44  ;;  %v11715_v36 = vld [vmem:[%s16388_s0 + $0xa8] sm:$0xff]   ;;  %v13707_v24 = vsel %vm12629_vm7, %v9240_v62, %v2027_v45  ;;  %v13711_v44 = vsel %vm12629_vm7, %v9241_v1, %v2034_v22  ;;  %v9244_v22 = vrot.slane %v1930_v55, 9 }
 0x167   :  { %10615 = vmatprep.mubr.msk.bf16.mxu1 %vm988_vm4, %v9204_v19  ;;  %16409 = vst [vmem:[#allocation8_spill] sm:$0xff] %v13687_v30  ;;  %v2048_v19 = vrot.slane %v13181_v4, 5  ;;  %v13715_v4 = vsel %vm12629_vm7, %v2036_v7, %v2037_v43  ;;  %v2051_v56 = vrot.slane %v11861_v50, 5  ;;  %v2062_v62 = vrot.slane %v13237_v39, 5  ;;  %v11717_v39 = vld [vmem:[%s16388_s0 + $0xb4] sm:$0xff]  }
 0x168   :  { %v9274_v43 = vcombine.low %v13711_v44, %v13715_v4  ;;  %v9273_v1 = vcombine.low %v13707_v24, %v2031_v10  ;;  %v9275_v7 = vcombine.low %v13722_v18, %v13726_v15  ;;  %v13766_v21 = vsel %vm12629_vm7, %v9244_v22, %v2055_v42 }
 0x169   :  { %v2050_v38 = vrot.slane %v2048_v19, 4  ;;  %v13752_v8 = vsel %vm12629_vm7, %v9243_v25, %v2048_v19  ;;  %v11718_v19 = vld [vmem:[%s16388_s0 + $0xc0] sm:$0xff]   ;;  %v2090_v24 = vrot.slane %v13333_v48, 5  ;;  %v2064_v10 = vrot.slane %v2062_v62, 4 }
 0x16a   :  { %v9246_v22 = vrot.slane %v1932_v17, 9  ;;  %v9249_v45 = vrot.slane %v1935_v26, 9 }
 0x16b   :  { %v13778_v55 = vsel %vm12629_vm7, %v2050_v38, %v2051_v56  ;;  %v11864_v38 = vld [vmem:[%s16388_s0 + $0x50] sm:$0x1]  ;;  %v2071_v56 = vrot.slane %v2069_v20, 4 }
 0x16c   :  { %v2072_v50 = vrot.slane %v11864_v38, 5  ;;  %v2092_v38 = vrot.slane %v2090_v24, 4 }
 0x16d   :  { %10910 = vmatmul.mubr.msk.bf16.gmra.mrb[20].mxu0 %vm988_vm4, %v11713_v59  ;;  %v2057_v59 = vrot.slane %v2055_v42, 4 }
 0x16e   :  { %10616 = vmatmul.mubr.msk.bf16.gmra.mrb[56].mxu1 %vm988_vm4, %v9205_v33  ;;  %10913 = vmatprep.mubr.msk.bf16.mxu0 %vm988_vm4, %v11715_v36  ;;  %v2076_v33 = vrot.slane %v13285_v11, 5  ;;  %v1934_v36 = vld [vmem:[%s16388_s0 + $0x60] sm:$0xe]  ;;  %v13785_v11 = vsel %vm1085_vm0, %v13221_v34, 0  ;;  %v9247_v34 = vrot.slane %v1933_v52, 9  ;;  %v2104_v52 = vrot.slane %v13381_v14, 5 }
 0x16f   :  { %10619 = vmatprep.mubr.msk.bf16.mxu1 %vm988_vm4, %v9206_v51  ;;  %v11863_v51 = vld [vmem:[%s16388_s0 + $0x44] sm:$0x1]  ;;  %v13793_v25 = vsel %vm12629_vm7, %v2057_v59, %v2058_v46  ;;  %v2085_v59 = vrot.slane %v2083_v47, 4  ;;  %v11866_v46 = vld [vmem:[%s16388_s0 + $0x68] sm:$0x1]  ;;  %v11719_v14 = vld [vmem:[%s16388_s0 + $0xcc] sm:$0xff]  }
 0x170   :  { %v2065_v42 = vrot.slane %v11863_v51, 5  ;;  %v9248_v51 = vrot.slane %v1934_v36, 9  ;;  %v2078_v48 = vrot.slane %v2076_v33, 4  ;;  %v2086_v17 = vrot.slane %v11866_v46, 5 }
 0x171   :  { %v2097_v46 = vrot.slane %v13342_v61, 5  ;;  %v13833_v61 = vsel %vm12629_vm7, %v9246_v22, %v2069_v20  ;;  %v11720_v22 = vld [vmem:[%s16388_s0 + $0xf0] sm:$0xff]  }
 0x172   :  { %v13825_v26 = vsel %vm12629_vm7, %v2064_v10, %v2065_v42  ;;  %v13852_v20 = vsel %vm12629_vm7, %v2078_v48, %v2079_v27  ;;  %v13856_v42 = vsel %vm12629_vm7, %v2085_v59, %v2086_v17  ;;  %v9250_v10 = vrot.slane %v1936_v37, 9  ;;  %v1939_v17 = vld [vmem:[%s16388_s0 + $0x9c] sm:$0xe]  ;;  %v1940_v37 = vld [vmem:[%s16388_s0 + $0xa8] sm:$0xe] }
 0x173   :  { %v2106_v27 = vrot.slane %v2104_v52, 4  ;;  %v2111_v59 = vrot.slane %v13390_v40, 5  ;;  %v9254_v15 = vrot.slane %v1940_v37, 9 }
 0x175   :  { %10914 = vmatmul.mubr.msk.bf16.gmra.mrb[24].mxu0 %vm988_vm4, %v11717_v39  ;;  %v11867_v39 = vld [vmem:[%s16388_s0 + $0x74] sm:$0x1]  ;;  %v2113_v4 = vrot.slane %v2111_v59, 4 }
 0x176   :  { %10620 = vmatmul.mubr.msk.bf16.gmra.mrb[60].mxu1 %vm988_vm4, %v9207_v63  ;;  %10917 = vmatprep.mubr.msk.bf16.mxu0 %vm988_vm4, %v11718_v19  ;;  %v2093_v36 = vrot.slane %v11867_v39, 5  ;;  %v13821_v19 = vsel %vm12629_vm7, %v9245_v28, %v2062_v62  ;;  %v1937_v39 = vld [vmem:[%s16388_s0 + $0x84] sm:$0xe]  ;;  %v13841_v62 = vsel %vm12629_vm7, %v9247_v34, %v2076_v33  ;;  %v13845_v28 = vsel %vm12629_vm7, %v9248_v51, %v2083_v47  ;;  %v1938_v47 = vld [vmem:[%s16388_s0 + $0x90] sm:$0xe] }
 0x177   :  { %10625 = vmatprep.mubr.msk.bf16.mxu1 %vm988_vm4, %v9273_v1  ;;  %v13837_v1 = vsel %vm12629_vm7, %v2071_v56, %v2072_v50  ;;  %v13860_v33 = vsel %vm12629_vm7, %v9249_v45, %v2090_v24  ;;  %v2099_v56 = vrot.slane %v2097_v46, 4  ;;  %v11868_v34 = vld [vmem:[%s16388_s0 + $0x80] sm:$0x1]  ;;  %v9251_v24 = vrot.slane %v1937_v39, 9  ;;  %v11869_v51 = vld [vmem:[%s16388_s0 + $0x8c] sm:$0x1] }
 0x178   :  { %v13870_v50 = vsel %vm12629_vm7, %v2092_v38, %v2093_v36  ;;  %v2100_v45 = vrot.slane %v11868_v34, 5  ;;  %v2107_v48 = vrot.slane %v11869_v51, 5  ;;  %v2118_v38 = vrot.slane %v13429_v6, 5 }
 0x179   :  { %v9252_v34 = vrot.slane %v1938_v47, 9  ;;  %v13896_v6 = vsel %vm12629_vm7, %v9250_v10, %v2097_v46  ;;  %v2125_v36 = vrot.slane %v13438_v23, 5  ;;  %v13916_v10 = vsel %vm12629_vm7, %v9251_v24, %v2104_v52  ;;  %v11870_v23 = vld [vmem:[%s16388_s0 + $0x98] sm:$0x1]  ;;  %v11871_v52 = vld [vmem:[%s16388_s0 + $0xa4] sm:$0x1] }
 0x17a   :  { %v13912_v46 = vsel %vm12629_vm7, %v2099_v56, %v2100_v45  ;;  %v2114_v47 = vrot.slane %v11870_v23, 5  ;;  %v9253_v51 = vrot.slane %v1939_v17, 9  ;;  %v13928_v44 = vsel %vm12629_vm7, %v2106_v27, %v2107_v48  ;;  %v9886_v56 = vld [vmem:[%s16388_s0 + $0x1c] sm:$0xf]  ;;  %v11872_v24 = vld [vmem:[%s16389_s1 + $0x8] sm:$0x3] }
 0x17b   :  { %v13938_v18 = vsel %vm12629_vm7, %v9252_v34, %v2111_v59  ;;  %v11721_v27 = vld [vmem:[%s16388_s0 + $0xfc] sm:$0xff]   ;;  %v2127_v59 = vrot.slane %v2125_v36, 4  ;;  %v11873_v17 = vld [vmem:[%s16388_s0 + $0xb0] sm:$0x1]  ;;  %v2132_v34 = vrot.slane %v13468_v41, 5  ;;  %v6579_v48 = vshll.u32 %v9886_v56, 16 }
 0x17c   :  { %v2128_v37 = vrot.slane %v11873_v17, 5  ;;  %v6583_v40 = vshrl.u32 %v9886_v56, 16  ;;  %v13967_v17 = vsel %vm12629_vm7, %v2113_v4, %v2114_v47  ;;  %v13971_v41 = vsel %vm12629_vm7, %v9253_v51, %v2118_v38 }
 0x17d   :  { %10918 = vmatmul.mubr.msk.bf16.gmra.mrb[28].mxu0 %vm988_vm4, %v11719_v14  ;;  %v9885_v14 = vld [vmem:[%s16388_s0 + $0x18] sm:$0xf]  ;;  %v13979_v63 = vsel %vm12629_vm7, %v9254_v15, %v2125_v36 }
 0x17e   :  { %10626 = vmatmul.mubr.msk.bf16.vlgmr.msra.gmra.mrb[0].mxu1 %vm988_vm4, %v9274_v43  ;;  %10921 = vmatprep.mubr.msk.bf16.mxu0 %vm988_vm4, %v11720_v22  ;;  %v2120_v43 = vrot.slane %v2118_v38, 4  ;;  %v2121_v22 = vrot.slane %v11871_v52, 5  ;;  %v6573_v45 = vshll.u32 %v9885_v14, 16  ;;  %v1942_v52 = vld [vmem:[%s16388_s0 + $0xd8] sm:$0xe]  ;;  %16412 = vst [vmem:[#allocation11_spill] sm:$0xff] %v13979_v63  ;;  %v13990_v51 = vsel %vm12629_vm7, %v2127_v59, %v2128_v37 }
 0x17f   :  { %10629 = vmatprep.mubr.msk.bf16.mxu1 %vm988_vm4, %v9275_v7  ;;  %10690 = vmatpush3.bf16.msra.mxu1 %v13785_v11  ;;  %v1941_v7 = vld [vmem:[%s16388_s0 + $0xb4] sm:$0xe]  ;;  %v6570_v11 = vshrl.u32 %v9885_v14, 16  ;;  %v11722_v14 = vld [vmem:[%s16388_s0 + $0x108] sm:$0xff]   ;;  %v9888_v38 = vld [vmem:[%s16388_s0 + $0x24] sm:$0xf] }
 0x180   :  { %11663 = vmatprep.subr.msk.bf16.mxu1 %vm1085_vm0, %v11872_v24  ;;  %v2139_v24 = vrot.slane %v13477_v54, 5  ;;  %v13975_v39 = vsel %vm12629_vm7, %v2120_v43, %v2121_v22  ;;  %v9255_v23 = vrot.slane %v1941_v7, 9  ;;  %v11874_v54 = vld [vmem:[%s16388_s0 + $0xbc] sm:$0x1]  ;;  %v6575_v4 = vrot.slane %v6573_v45, 5  ;;  %16413 = vst [vmem:[#allocation12_spill] sm:$0xff] %v13990_v51 }
 0x181   :  { %v2135_v56 = vrot.slane %v11874_v54, 5  ;;  %v6572_v47 = vrot.slane %v6570_v11, 4  ;;  %v2134_v43 = vrot.slane %v2132_v34, 4  ;;  %v9256_v36 = vrot.slane %v1942_v52, 9  ;;  %v11875_v22 = vld [vmem:[%s16388_s0 + $0xe0] sm:$0x1] }
 0x182   :  { %v2142_v15 = vrot.slane %v11875_v22, 5  ;;  %v1943_v7 = vld [vmem:[%s16388_s0 + $0xe4] sm:$0xe]  ;;  %v16414_v11 = vcombine.low %v13752_v8, %v13778_v55  ;;  %v2141_v45 = vrot.slane %v2139_v24, 4  ;;  %v9887_v59 = vld [vmem:[%s16388_s0 + $0x20] sm:$0x1]  ;;  %v16415_v54 = vcombine.low %v13766_v21, %v13793_v25 }
 0x183   :  { %v14007_v37 = vrot.slane %v6579_v48, 5  ;;  %v6585_v52 = vrot.slane %v6583_v40, 4  ;;  %v14019_v22 = vsel %vm12629_vm7, %v9255_v23, %v2132_v34  ;;  %v11876_v40 = vld [vmem:[%s16388_s0 + $0xec] sm:$0x1]  ;;  %v2153_v21 = vrot.slane %v13506_v12, 5 }
 0x184   :  { %v2149_v48 = vrot.slane %v11876_v40, 5  ;;  %v6576_v25 = vor.u32 %v6575_v4, %v6572_v47  ;;  %v14035_v23 = vsel %vm12629_vm7, %v2134_v43, %v2135_v56  ;;  %v1944_v12 = vld [vmem:[%s16388_s0 + $0xf0] sm:$0xe]  ;;  %v6589_v47 = vshll.u32 %v9887_v59, 16  ;;  %v11724_v4 = vld [vmem:[%s16388_s0 + $0x120] sm:$0xff]  }
 0x185   :  { %10922 = vmatmul.mubr.msk.bf16.gmra.mrb[32].mxu0 %vm988_vm4, %v11721_v27  ;;  %v2146_v27 = vrot.slane %v13494_v5, 5  ;;  %v6597_v5 = vshll.u32 %v9888_v38, 16  ;;  %v14045_v40 = vsel %vm12629_vm7, %v9256_v36, %v2139_v24  ;;  %v14049_v34 = vsel %vm12629_vm7, %v2141_v45, %v2142_v15  ;;  %v9891_v59 = vld [vmem:[%s16388_s0 + $0x30] sm:$0xf]  ;;  %v9892_v15 = vld [vmem:[%s16388_s0 + $0x34] sm:$0xf] }
 0x186   :  { %10630 = vmatmul.mubr.msk.bf16.gmra.mrb[4].mxu1 %vm988_vm4, %v16414_v11  ;;  %10925 = vmatprep.mubr.msk.bf16.mxu0 %vm988_vm4, %v11722_v14  ;;  %v6594_v14 = vshrl.u32 %v9888_v38, 16  ;;  %v9889_v11 = vld [vmem:[%s16388_s0 + $0x28] sm:$0xf]  ;;  %v11723_v38 = vld [vmem:[%s16388_s0 + $0x114] sm:$0xff]   ;;  %v6586_v43 = vor.u32 %v6585_v52, %v14007_v37  ;;  %v2160_v55 = vrot.slane %v13522_v13, 5  ;;  %v9258_v45 = vrot.slane %v1944_v12, 9 }
 0x187   :  { %10633 = vmatprep.mubr.msk.bf16.mxu1 %vm988_vm4, %v16415_v54  ;;  %v9257_v54 = vrot.slane %v1943_v7, 9  ;;  %v2148_v56 = vrot.slane %v2146_v27, 4  ;;  %v1945_v7 = vld [vmem:[%s16388_s0 + $0xfc] sm:$0xe]  ;;  %v6599_v24 = vrot.slane %v6597_v5, 5  ;;  %v6603_v36 = vshll.u32 %v9889_v11, 16 }
 0x188   :  { %v6596_v8 = vrot.slane %v6594_v14, 4  ;;  %v2155_v2 = vrot.slane %v2153_v21, 4  ;;  %v11877_v52 = vld [vmem:[%s16388_s0 + $0xf8] sm:$0x1]  ;;  %v6577_v30 = vrot.slane %v6576_v25, 4  ;;  %v6591_v31 = vrot.slane %v6589_v47, 5 }
 0x189   :  { %v2156_v49 = vrot.slane %v11877_v52, 5  ;;  %v6607_v58 = vshrl.u32 %v9889_v11, 16  ;;  %v6618_v13 = vshrl.u32 %v9891_v59, 16  ;;  %v6621_v14 = vshll.u32 %v9891_v59, 16 }
 0x18a   :  { %v16416_v5 = vcombine.low %v13821_v19, %v13825_v26  ;;  %v6587_v12 = vrot.slane %v6586_v43, 4  ;;  %v9259_v57 = vrot.slane %v1945_v7, 9  ;;  %v6627_v51 = vshll.u32 %v9892_v15, 16  ;;  %v11878_v19 = vld [vmem:[%s16388_s0 + $0x104] sm:$0x1] }
 0x18b   :  { %v6631_v63 = vshrl.u32 %v9892_v15, 16  ;;  %v16417_v25 = vcombine.low %v13833_v61, %v13837_v1  ;;  %v14077_v11 = vsel %vm12629_vm7, %v9257_v54, %v2146_v27  ;;  %v2163_v26 = vrot.slane %v11878_v19, 5 }
 0x18c   :  { %v6600_v47 = vor.u32 %v6599_v24, %v6596_v8  ;;  %v14088_v61 = vsel %vm12629_vm7, %v9258_v45, %v2153_v21  ;;  %v14092_v1 = vsel %vm12629_vm7, %v2155_v2, %v2156_v49  ;;  %v6582_v27 = vsel %vm12093_vm3, %v6577_v30, %v14007_v37  ;;  %v9890_v8 = vld [vmem:[%s16388_s0 + $0x2c] sm:$0x1]  ;;  %v11726_v2 = vld [vmem:[%s16388_s0 + $0x138] sm:$0xff]   ;;  %v1946_v37 = vld [vmem:[%s16388_s0 + $0x108] sm:$0xe] }
 0x18d   :  { %10926 = vmatmul.mubr.msk.bf16.gmra.mrb[36].mxu0 %vm988_vm4, %v11723_v38  ;;  %v2162_v38 = vrot.slane %v2160_v55, 4  ;;  %v14103_v54 = vrot.slane %v6603_v36, 5  ;;  %v6609_v21 = vrot.slane %v6607_v58, 4  ;;  %v6623_v43 = vrot.slane %v6621_v14, 5  ;;  %v9894_v14 = vld [vmem:[%s16388_s0 + $0x3c] sm:$0xf] }
 0x18e   :  { %10634 = vmatmul.mubr.msk.bf16.gmra.mrb[8].mxu1 %vm988_vm4, %v16416_v5  ;;  %10929 = vmatprep.mubr.msk.bf16.mxu0 %vm988_vm4, %v11724_v4  ;;  %v14084_v4 = vsel %vm12629_vm7, %v2148_v56, %v2149_v48  ;;  %v11725_v48 = vld [vmem:[%s16388_s0 + $0x12c] sm:$0xff]   ;;  %v6620_v56 = vrot.slane %v6618_v13, 4  ;;  %v6592_v30 = vsel %vm12093_vm3, %v6587_v12, %v6591_v31  ;;  %v14112_v49 = vsel %vm12629_vm7, %v9259_v57, %v2160_v55  ;;  %v9893_v57 = vld [vmem:[%s16388_s0 + $0x38] sm:$0x1]  ;;  %v9895_v5 = vld [vmem:[%s16388_s0 + $0x40] sm:$0xf] }
 0x18f   :  { %10637 = vmatprep.mubr.msk.bf16.mxu1 %vm988_vm4, %v16417_v25  ;;  %v14117_v7 = vrot.slane %v6627_v51, 5  ;;  %v6633_v58 = vrot.slane %v6631_v63, 4  ;;  %v14121_v59 = vsel %vm12629_vm7, %v2162_v38, %v2163_v26  ;;  %v14123_v24 = vrot.slane %v6600_v47, 4  ;;  %v1947_v26 = vld [vmem:[%s16388_s0 + $0x114] sm:$0xe] }
 0x190   :  { %v6613_v36 = vshll.u32 %v9890_v8, 16  ;;  %v2167_v31 = vrot.slane %v13535_v32, 5  ;;  %v9288_v55 = vcombine.low %v14019_v22, %v14035_v23  ;;  %v9289_v51 = vcombine.low %v14045_v40, %v14049_v34  ;;  %v16428_v23 = vld [vmem:[#allocation6_spill] sm:$0xff] }
 0x191   :  { %v9290_v63 = vcombine.low %v14077_v11, %v14084_v4  ;;  %v14138_v45 = vcombine.low %v6582_v27, %v6592_v30  ;;  %v6610_v32 = vor.u32 %v6609_v21, %v14103_v54  ;;  %v9260_v52 = vrot.slane %v1946_v37, 9 }
 0x192   :  { %v6624_v13 = vor.u32 %v6623_v43, %v6620_v56  ;;  %v16418_v12 = vcombine.low %v13841_v62, %v13852_v20  ;;  %v6634_v38 = vor.u32 %v6633_v58, %v14117_v7  ;;  %v6637_v19 = vshll.u32 %v9893_v57, 16 }
 0x193   :  { %v2174_v47 = vrot.slane %v13561_v60, 5  ;;  %v16419_v27 = vcombine.low %v13845_v28, %v13856_v42  ;;  %v6606_v62 = vsel %vm12093_vm3, %v14123_v24, %v14103_v54  ;;  %v6615_v20 = vrot.slane %v6613_v36, 5  ;;  %v9897_v60 = vld [vmem:[%s16388_s0 + $0x48] sm:$0xf]  ;;  %v11728_v36 = vld [vmem:[%s16388_s0 + $0x150] sm:$0xff]  }
 0x194   :  { %v2169_v8 = vrot.slane %v2167_v31, 4  ;;  %v6642_v56 = vshrl.u32 %v9894_v14, 16  ;;  %v6645_v28 = vshll.u32 %v9894_v14, 16  ;;  %v6651_v42 = vshll.u32 %v9895_v5, 16  ;;  %v11727_v54 = vld [vmem:[%s16388_s0 + $0x144] sm:$0xff]  }
 0x195   :  { %10930 = vmatmul.mubr.msk.bf16.gmra.mrb[40].mxu0 %vm988_vm4, %v11725_v48  ;;  %v11879_v48 = vld [vmem:[%s16388_s0 + $0x110] sm:$0x1]  ;;  %v6655_v43 = vshrl.u32 %v9895_v5, 16  ;;  %v6611_v30 = vrot.slane %v6610_v32, 4  ;;  %v14181_v37 = vsel %vm12629_vm7, %v9260_v52, %v2167_v31  ;;  %v6625_v58 = vrot.slane %v6624_v13, 4 }
 0x196   :  { %10638 = vmatmul.mubr.msk.bf16.gmra.mrb[12].mxu1 %vm988_vm4, %v16418_v12  ;;  %10933 = vmatprep.mubr.msk.bf16.mxu0 %vm988_vm4, %v11726_v2  ;;  %v2170_v21 = vrot.slane %v11879_v48, 5  ;;  %v9898_v2 = vld [vmem:[%s16388_s0 + $0x4c] sm:$0xf]  ;;  %v9261_v24 = vrot.slane %v1947_v26, 9  ;;  %v6635_v57 = vrot.slane %v6634_v38, 4  ;;  %v6639_v14 = vrot.slane %v6637_v19, 5 }
 0x197   :  { %10641 = vmatprep.mubr.msk.bf16.mxu1 %vm988_vm4, %v16419_v27  ;;  %v2176_v5 = vrot.slane %v2174_v47, 4  ;;  %v11880_v12 = vld [vmem:[%s16388_s0 + $0x11c] sm:$0x1]  ;;  %v9896_v32 = vld [vmem:[%s16388_s0 + $0x44] sm:$0x1]  ;;  %v6666_v31 = vshrl.u32 %v9897_v60, 16  ;;  %v6616_v19 = vsel %vm12093_vm3, %v6611_v30, %v6615_v20 }
 0x198   :  { %v2177_v27 = vrot.slane %v11880_v12, 5  ;;  %v6669_v52 = vshll.u32 %v9897_v60, 16  ;;  %v6675_v13 = vshll.u32 %v9898_v2, 16  ;;  %v6679_v26 = vshrl.u32 %v9898_v2, 16  ;;  %v11729_v30 = vld [vmem:[%s16388_s0 + $0x15c] sm:$0xff]  }
 0x199   :  { %v6644_v48 = vrot.slane %v6642_v56, 4  ;;  %v6647_v25 = vrot.slane %v6645_v28, 5  ;;  %v14192_v15 = vrot.slane %v6651_v42, 5  ;;  %v6657_v38 = vrot.slane %v6655_v43, 4 }
 0x19a   :  { %v14199_v12 = vsel %vm12629_vm7, %v2169_v8, %v2170_v21  ;;  %v6630_v60 = vsel %vm12093_vm3, %v6625_v58, %v14117_v7  ;;  %v14206_v56 = vsel %vm12629_vm7, %v9261_v24, %v2174_v47  ;;  %v16420_v28 = vcombine.low %v13860_v33, %v13870_v50  ;;  %v1948_v7 = vld [vmem:[%s16388_s0 + $0x120] sm:$0xe]  ;;  %v9899_v50 = vld [vmem:[%s16388_s0 + $0x50] sm:$0x1]  ;;  %v9900_v24 = vld [vmem:[%s16388_s0 + $0x54] sm:$0xf] }
 0x19b   :  { %v6640_v20 = vsel %vm12093_vm3, %v6635_v57, %v6639_v14  ;;  %v14217_v8 = vsel %vm12629_vm7, %v2176_v5, %v2177_v27  ;;  %v6661_v21 = vshll.u32 %v9896_v32, 16  ;;  %v2181_v47 = vrot.slane %v13573_v16, 5  ;;  %v9903_v27 = vld [vmem:[%s16388_s0 + $0x60] sm:$0xf] }
 0x19c   :  { %v16421_v33 = vcombine.low %v13896_v6, %v13912_v46  ;;  %v6668_v42 = vrot.slane %v6666_v31, 4  ;;  %v6671_v43 = vrot.slane %v6669_v52, 5  ;;  %v14230_v2 = vrot.slane %v6675_v13, 5 }
 0x19d   :  { %10934 = vmatmul.mubr.msk.bf16.gmra.mrb[44].mxu0 %vm988_vm4, %v11727_v54  ;;  %v6681_v54 = vrot.slane %v6679_v26, 4  ;;  %v14237_v16 = vsel %vm1085_vm0, %v13545_v35, 0  ;;  %v6648_v46 = vor.u32 %v6647_v25, %v6644_v48  ;;  %v6658_v58 = vor.u32 %v6657_v38, %v14192_v15  ;;  %v9901_v25 = vld [vmem:[%s16388_s0 + $0x58] sm:$0xf]  ;;  %v9904_v26 = vld [vmem:[%s16388_s0 + $0x64] sm:$0xf] }
 0x19e   :  { %10642 = vmatmul.mubr.msk.bf16.gmra.mrb[16].mxu1 %vm988_vm4, %v16420_v28  ;;  %10937 = vmatprep.mubr.msk.bf16.mxu0 %vm988_vm4, %v11728_v36  ;;  %v11730_v36 = vld [vmem:[%s16388_s0 + $0x168] sm:$0xff]   ;;  %v14248_v57 = vcombine.low %v6606_v62, %v6616_v19  ;;  %v14250_v14 = vcombine.low %v6630_v60, %v6640_v20  ;;  %v9262_v5 = vrot.slane %v1948_v7, 9  ;;  %v6663_v32 = vrot.slane %v6661_v21, 5 }
 0x19f   :  { %10645 = vmatprep.mubr.msk.bf16.mxu1 %vm988_vm4, %v16421_v33  ;;  %v2183_v31 = vrot.slane %v2181_v47, 4  ;;  %v11881_v62 = vld [vmem:[%s16388_s0 + $0x128] sm:$0x1]  ;;  %v6685_v13 = vshll.u32 %v9899_v50, 16  ;;  %v6672_v48 = vor.u32 %v6671_v43, %v6668_v42  ;;  %v6682_v38 = vor.u32 %v6681_v54, %v14230_v2 }
 0x1a0   :  { %v2184_v52 = vrot.slane %v11881_v62, 5  ;;  %v6690_v19 = vshrl.u32 %v9900_v24, 16  ;;  %v6693_v60 = vshll.u32 %v9900_v24, 16  ;;  %v6649_v28 = vrot.slane %v6648_v46, 4 }
 0x1a1   :  { %v6659_v20 = vrot.slane %v6658_v58, 4  ;;  %v6699_v7 = vshll.u32 %v9901_v25, 16  ;;  %v6703_v21 = vshrl.u32 %v9901_v25, 16  ;;  %v6714_v33 = vshrl.u32 %v9903_v27, 16  ;;  %v1949_v58 = vld [vmem:[%s16388_s0 + $0x12c] sm:$0xe] }
 0x1a2   :  { %v6717_v35 = vshll.u32 %v9903_v27, 16  ;;  %v6723_v6 = vshll.u32 %v9904_v26, 16  ;;  %v6727_v62 = vshrl.u32 %v9904_v26, 16  ;;  %v16422_v50 = vcombine.low %v13916_v10, %v13928_v44  ;;  %v9906_v26 = vld [vmem:[%s16388_s0 + $0x6c] sm:$0xf] }
 0x1a3   :  { %v14275_v42 = vsel %vm12629_vm7, %v9262_v5, %v2181_v47  ;;  %v14279_v43 = vsel %vm12629_vm7, %v2183_v31, %v2184_v52  ;;  %v6687_v54 = vrot.slane %v6685_v13, 5  ;;  %v16423_v46 = vcombine.low %v13938_v18, %v13967_v17  ;;  %v9902_v17 = vld [vmem:[%s16388_s0 + $0x5c] sm:$0x1] }
 0x1a4   :  { %v6673_v10 = vrot.slane %v6672_v48, 4  ;;  %v6683_v44 = vrot.slane %v6682_v38, 4  ;;  %v6692_v47 = vrot.slane %v6690_v19, 4  ;;  %v6695_v24 = vrot.slane %v6693_v60, 5  ;;  %v9905_v19 = vld [vmem:[%s16388_s0 + $0x68] sm:$0x1] }
 0x1a5   :  { %10938 = vmatmul.mubr.msk.bf16.gmra.mrb[48].mxu0 %vm988_vm4, %v11729_v30  ;;  %v2188_v30 = vrot.slane %v13589_v53, 5  ;;  %v6654_v53 = vsel %vm12093_vm3, %v6649_v28, %v14192_v15  ;;  %v6664_v18 = vsel %vm12093_vm3, %v6659_v20, %v6663_v32  ;;  %v14300_v5 = vrot.slane %v6699_v7, 5  ;;  %v11732_v15 = vld [vmem:[%s16388_s0 + $0x180] sm:$0xff]  }
 0x1a6   :  { %10646 = vmatmul.mubr.msk.bf16.gmra.mrb[20].mxu1 %vm988_vm4, %v16422_v50  ;;  %10941 = vmatprep.mubr.msk.bf16.mxu0 %vm988_vm4, %v11730_v36  ;;  %v11731_v36 = vld [vmem:[%s16388_s0 + $0x174] sm:$0xff]   ;;  %v6705_v25 = vrot.slane %v6703_v21, 4  ;;  %v6716_v27 = vrot.slane %v6714_v33, 4  ;;  %v6719_v31 = vrot.slane %v6717_v35, 5  ;;  %v14302_v52 = vrot.slane %v6723_v6, 5 }
 0x1a7   :  { %10649 = vmatprep.mubr.msk.bf16.mxu1 %vm988_vm4, %v16423_v46  ;;  %v6729_v13 = vrot.slane %v6727_v62, 4  ;;  %v9295_v32 = vcombine.low %v14275_v42, %v14279_v43  ;;  %v9263_v48 = vrot.slane %v1949_v58, 9  ;;  %v2190_v38 = vrot.slane %v2188_v30, 4  ;;  %v11882_v35 = vld [vmem:[%s16388_s0 + $0x134] sm:$0x1] }
 0x1a8   :  { %v2191_v6 = vrot.slane %v11882_v35, 5  ;;  %v6678_v60 = vsel %vm12093_vm3, %v6673_v10, %v14230_v2  ;;  %v6688_v28 = vsel %vm12093_vm3, %v6683_v44, %v6687_v54  ;;  %v6696_v20 = vor.u32 %v6695_v24, %v6692_v47  ;;  %v1950_v33 = vld [vmem:[%s16388_s0 + $0x138] sm:$0xe] }
 0x1a9   :  { %v6709_v7 = vshll.u32 %v9902_v17, 16  ;;  %v6706_v21 = vor.u32 %v6705_v25, %v14300_v5  ;;  %v2195_v62 = vrot.slane %v13601_v0, 5  ;;  %v6738_v50 = vshrl.u32 %v9906_v26, 16  ;;  %v9909_v35 = vld [vmem:[%s16388_s0 + $0x78] sm:$0xf] }
 0x1aa   :  { %v6741_v46 = vshll.u32 %v9906_v26, 16  ;;  %v14329_v58 = vcombine.low %v6654_v53, %v6664_v18  ;;  %v6720_v2 = vor.u32 %v6719_v31, %v6716_v27  ;;  %v6730_v10 = vor.u32 %v6729_v13, %v14302_v52  ;;  %v16426_v53 = vld [vmem:[#allocation12_spill] sm:$0xff] }
 0x1ab   :  { %v6733_v54 = vshll.u32 %v9905_v19, 16  ;;  %v16424_v44 = vcombine.low %v13971_v41, %v13975_v39  ;;  %v14337_v47 = vcombine.low %v6678_v60, %v6688_v28  ;;  %v14341_v0 = vsel %vm12629_vm7, %v9263_v48, %v2188_v30  ;;  %v16425_v41 = vld [vmem:[#allocation11_spill] sm:$0xff]  ;;  %v11883_v31 = vld [vmem:[%s16388_s0 + $0x140] sm:$0x1] }
 0x1ac   :  { %v14345_v24 = vsel %vm12629_vm7, %v2190_v38, %v2191_v6  ;;  %v2202_v39 = vrot.slane %v13617_v9, 5  ;;  %v16427_v18 = vcombine.low %v16425_v41, %v16426_v53  ;;  %v11733_v30 = vld [vmem:[%s16388_s0 + $0x18c] sm:$0xff]   ;;  %v6697_v17 = vrot.slane %v6696_v20, 4  ;;  %v9910_v20 = vld [vmem:[%s16388_s0 + $0x7c] sm:$0xf] }
 0x1ad   :  { %10942 = vmatmul.mubr.msk.bf16.gmra.mrb[52].mxu0 %vm988_vm4, %v11731_v36  ;;  %v1951_v36 = vld [vmem:[%s16388_s0 + $0x144] sm:$0xe]  ;;  %v6711_v25 = vrot.slane %v6709_v7, 5  ;;  %v9264_v27 = vrot.slane %v1950_v33, 9  ;;  %v2198_v13 = vrot.slane %v11883_v31, 5  ;;  %v6707_v26 = vrot.slane %v6706_v21, 4 }
 0x1ae   :  { %10650 = vmatmul.mubr.msk.bf16.gmra.mrb[24].mxu1 %vm988_vm4, %v16424_v44  ;;  %10945 = vmatprep.mubr.msk.bf16.mxu0 %vm988_vm4, %v11732_v15  ;;  %v9907_v9 = vld [vmem:[%s16388_s0 + $0x70] sm:$0xf]  ;;  %v2197_v15 = vrot.slane %v2195_v62, 4  ;;  %v6740_v48 = vrot.slane %v6738_v50, 4  ;;  %v6743_v38 = vrot.slane %v6741_v46, 5  ;;  %v6721_v6 = vrot.slane %v6720_v2, 4 }
 0x1af   :  { %10653 = vmatprep.mubr.msk.bf16.mxu1 %vm988_vm4, %v16427_v18  ;;  %v6731_v19 = vrot.slane %v6730_v10, 4  ;;  %v6735_v60 = vrot.slane %v6733_v54, 5  ;;  %v9265_v28 = vrot.slane %v1951_v36, 9  ;;  %v11734_v7 = vld [vmem:[%s16388_s0 + $0x198] sm:$0xff]   ;;  %v2204_v21 = vrot.slane %v2202_v39, 4 }
 0x1b0   :  { %v11884_v33 = vld [vmem:[%s16388_s0 + $0x14c] sm:$0x1]  ;;  %v6747_v46 = vshll.u32 %v9907_v9, 16  ;;  %v6751_v44 = vshrl.u32 %v9907_v9, 16  ;;  %v6702_v2 = vsel %vm12093_vm3, %v6697_v17, %v14300_v5  ;;  %v14381_v10 = vsel %vm12629_vm7, %v9264_v27, %v2195_v62  ;;  %v9908_v54 = vld [vmem:[%s16388_s0 + $0x74] sm:$0x1] }
 0x1b1   :  { %v2205_v50 = vrot.slane %v11884_v33, 5  ;;  %v6762_v36 = vshrl.u32 %v9909_v35, 16  ;;  %v6765_v41 = vshll.u32 %v9909_v35, 16  ;;  %v14388_v53 = vsel %vm12629_vm7, %v2197_v15, %v2198_v13  ;;  %v1952_v31 = vld [vmem:[%s16388_s0 + $0x150] sm:$0xe] }
 0x1b2   :  { %v6744_v18 = vor.u32 %v6743_v38, %v6740_v48  ;;  %v6771_v5 = vshll.u32 %v9910_v20, 16  ;;  %v6775_v17 = vshrl.u32 %v9910_v20, 16  ;;  %v6712_v62 = vsel %vm12093_vm3, %v6707_v26, %v6711_v25 }
 0x1b3   :  { %v6726_v27 = vsel %vm12093_vm3, %v6721_v6, %v14302_v52  ;;  %v6736_v13 = vsel %vm12093_vm3, %v6731_v19, %v6735_v60  ;;  %v14403_v9 = vsel %vm12629_vm7, %v9265_v28, %v2202_v39  ;;  %v14414_v25 = vrot.slane %v6747_v46, 5  ;;  %v9912_v39 = vld [vmem:[%s16388_s0 + $0x84] sm:$0xf] }
 0x1b4   :  { %v6753_v52 = vrot.slane %v6751_v44, 4  ;;  %v6757_v26 = vshll.u32 %v9908_v54, 16  ;;  %v9266_v22 = vrot.slane %v1952_v31, 9  ;;  %v6764_v15 = vrot.slane %v6762_v36, 4  ;;  %v11735_v60 = vld [vmem:[%s16388_s0 + $0x1a4] sm:$0xff]  }
 0x1b5   :  { %10946 = vmatmul.mubr.msk.bf16.gmra.mrb[56].mxu0 %vm988_vm4, %v11733_v30  ;;  %v14412_v30 = vsel %vm12629_vm7, %v2204_v21, %v2205_v50  ;;  %v6767_v48 = vrot.slane %v6765_v41, 5  ;;  %v9296_v38 = vcombine.low %v14341_v0, %v14345_v24  ;;  %v14426_v35 = vrot.slane %v6744_v18, 4  ;;  %v11885_v50 = vld [vmem:[%s16388_s0 + $0x158] sm:$0x1]  ;;  %v9913_v44 = vld [vmem:[%s16388_s0 + $0x88] sm:$0xf] }
 0x1b6   :  { %10654 = vmatmul.mubr.msk.bf16.gmra.mrb[28].mxu1 %vm988_vm4, %v9288_v55  ;;  %10949 = vmatprep.mubr.msk.bf16.mxu0 %vm988_vm4, %v11734_v7  ;;  %v2209_v55 = vrot.slane %v16428_v23, 5  ;;  %v14428_v6 = vrot.slane %v6771_v5, 5  ;;  %v6777_v19 = vrot.slane %v6775_v17, 4  ;;  %v14433_v34 = vcombine.low %v6702_v2, %v6712_v62  ;;  %v9915_v18 = vld [vmem:[%s16388_s0 + $0x90] sm:$0xf] }
 0x1b7   :  { %10657 = vmatprep.mubr.msk.bf16.mxu1 %vm988_vm4, %v9289_v51  ;;  %v9297_v40 = vcombine.low %v14381_v10, %v14388_v53  ;;  %v9911_v51 = vld [vmem:[%s16388_s0 + $0x80] sm:$0x1]  ;;  %v6786_v28 = vshrl.u32 %v9912_v39, 16  ;;  %v6789_v20 = vshll.u32 %v9912_v39, 16  ;;  %v14440_v7 = vcombine.low %v6726_v27, %v6736_v13  ;;  %v9916_v31 = vld [vmem:[%s16388_s0 + $0x94] sm:$0xf] }
 0x1b8   :  { %v9298_v21 = vcombine.low %v14403_v9, %v14412_v30  ;;  %v14444_v33 = vrot.slane %v6757_v26, 5  ;;  %v2212_v46 = vrot.slane %v11885_v50, 5  ;;  %v6754_v2 = vor.u32 %v6753_v52, %v14414_v25  ;;  %v1953_v27 = vld [vmem:[%s16388_s0 + $0x15c] sm:$0xe]  ;;  %v16429_v13 = vld [vmem:[#allocation7_spill] sm:$0xff] }
 0x1b9   :  { %v14455_v54 = vsel %vm12629_vm7, %v9266_v22, %v2209_v55  ;;  %v2211_v36 = vrot.slane %v2209_v55, 4  ;;  %v6768_v41 = vor.u32 %v6767_v48, %v6764_v15  ;;  %v6750_v5 = vsel %vm12093_vm3, %v14426_v35, %v14414_v25  ;;  %v9929_v30 = vld [vmem:[%s16388_s0 + $0xc8] sm:$0x1] }
 0x1ba   :  { %v6778_v17 = vor.u32 %v6777_v19, %v14428_v6  ;;  %v6781_v62 = vshll.u32 %v9911_v51, 16  ;;  %v2216_v52 = vrot.slane %v16429_v13, 5  ;;  %v6788_v26 = vrot.slane %v6786_v28, 4 }
 0x1bb   :  { %v6791_v39 = vrot.slane %v6789_v20, 5  ;;  %v6795_v22 = vshll.u32 %v9913_v44, 16  ;;  %v6799_v23 = vshrl.u32 %v9913_v44, 16  ;;  %v6810_v25 = vshrl.u32 %v9915_v18, 16 }
 0x1bc   :  { %v6813_v55 = vshll.u32 %v9915_v18, 16  ;;  %v6819_v15 = vshll.u32 %v9916_v31, 16  ;;  %v6823_v48 = vshrl.u32 %v9916_v31, 16  ;;  %v16430_v35 = vcombine.low %v14088_v61, %v14092_v1  ;;  %v9914_v61 = vld [vmem:[%s16388_s0 + $0x8c] sm:$0x1] }
 0x1bd   :  { %10950 = vmatmul.mubr.msk.bf16.gmra.mrb[60].mxu0 %vm988_vm4, %v11735_v60  ;;  %v6755_v19 = vrot.slane %v6754_v2, 4  ;;  %v14485_v60 = vsel %vm12629_vm7, %v2211_v36, %v2212_v46  ;;  %v6769_v11 = vrot.slane %v6768_v41, 4  ;;  %v9267_v4 = vrot.slane %v1953_v27, 9  ;;  %v1954_v46 = vld [vmem:[%s16388_s0 + $0x168] sm:$0xe] }
 0x1be   :  { %10658 = vmatmul.mubr.msk.bf16.gmra.mrb[32].mxu1 %vm988_vm4, %v9290_v63  ;;  %10955 = vmatprep.mubr.msk.bf16.mxu0 %vm988_vm4, %v14138_v45  ;;  %v6779_v63 = vrot.slane %v6778_v17, 4  ;;  %v6783_v51 = vrot.slane %v6781_v62, 5  ;;  %v2218_v28 = vrot.slane %v2216_v52, 4  ;;  %v11886_v45 = vld [vmem:[%s16388_s0 + $0x164] sm:$0x1]  ;;  %v6792_v1 = vor.u32 %v6791_v39, %v6788_v26 }
 0x1bf   :  { %10661 = vmatprep.mubr.msk.bf16.mxu1 %vm988_vm4, %v16430_v35  ;;  %v2219_v20 = vrot.slane %v11886_v45, 5  ;;  %v14493_v50 = vrot.slane %v6795_v22, 5  ;;  %v6801_v44 = vrot.slane %v6799_v23, 4  ;;  %v11887_v2 = vld [vmem:[%s16388_s0 + $0x16c] sm:$0xf]  ;;  %v6812_v41 = vrot.slane %v6810_v25, 4 }
 0x1c0   :  { %v2223_v36 = vrot.slane %v11887_v2, 5  ;;  %v6815_v18 = vrot.slane %v6813_v55, 5  ;;  %v14501_v31 = vrot.slane %v6819_v15, 5  ;;  %v6825_v17 = vrot.slane %v6823_v48, 4  ;;  %v9917_v39 = vld [vmem:[%s16388_s0 + $0x98] sm:$0x1] }
 0x1c1   :  { %v6760_v62 = vsel %vm12093_vm3, %v6755_v19, %v14444_v33  ;;  %v9299_v27 = vcombine.low %v14455_v54, %v14485_v60  ;;  %v6774_v13 = vsel %vm12093_vm3, %v6769_v11, %v14428_v6  ;;  %v14513_v26 = vsel %vm12629_vm7, %v9267_v4, %v2216_v52  ;;  %v9918_v6 = vld [vmem:[%s16388_s0 + $0x9c] sm:$0xf]  ;;  %v9919_v52 = vld [vmem:[%s16388_s0 + $0xa0] sm:$0xf]  ;;  %v11888_v35 = vld [vmem:[%s16388_s0 + $0x170] sm:$0x1] }
 0x1c2   :  { %v6784_v22 = vsel %vm12093_vm3, %v6779_v63, %v6783_v51  ;;  %v14522_v33 = vsel %vm12629_vm7, %v2218_v28, %v2219_v20  ;;  %v6805_v23 = vshll.u32 %v9914_v61, 16  ;;  %v9268_v25 = vrot.slane %v1954_v46, 9  ;;  %v11889_v46 = vld [vmem:[%s16388_s0 + $0x178] sm:$0xf]  ;;  %v9937_v60 = vld [vmem:[%s16388_s0 + $0x100] sm:$0xf] }
 0x1c3   :  { %v14532_v55 = vrot.slane %v6792_v1, 4  ;;  %v6802_v15 = vor.u32 %v6801_v44, %v14493_v50  ;;  %v2225_v48 = vrot.slane %v2223_v36, 4  ;;  %v2226_v19 = vrot.slane %v11888_v35, 5 }
 0x1c4   :  { %v16431_v11 = vcombine.low %v14112_v49, %v14121_v59  ;;  %v14543_v4 = vcombine.low %v6750_v5, %v6760_v62  ;;  %v6826_v63 = vor.u32 %v6825_v17, %v14501_v31  ;;  %v6829_v51 = vshll.u32 %v9917_v39, 16  ;;  %v1955_v49 = vld [vmem:[%s16388_s0 + $0x174] sm:$0xe] }
 0x1c5   :  { %10956 = vmatmul.mubr.msk.bf16.vlgmr.msra.gmra.mrb[0].mxu0 %vm988_vm4, %v14248_v57  ;;  %v6816_v57 = vor.u32 %v6815_v18, %v6812_v41  ;;  %v16432_v28 = vcombine.low %v14181_v37, %v14199_v12  ;;  %v6834_v59 = vshrl.u32 %v9918_v6, 16  ;;  %v6843_v5 = vshll.u32 %v9919_v52, 16  ;;  %v9922_v41 = vld [vmem:[%s16388_s0 + $0xac] sm:$0xf] }
 0x1c6   :  { %10662 = vmatmul.mubr.msk.bf16.gmra.mrb[36].mxu1 %vm988_vm4, %v16431_v11  ;;  %11020 = vmatpush3.bf16.msra.mxu0 %v14237_v16  ;;  %v6837_v16 = vshll.u32 %v9918_v6, 16  ;;  %v6847_v45 = vshrl.u32 %v9919_v52, 16  ;;  %v14555_v20 = vcombine.low %v6774_v13, %v6784_v22  ;;  %v9300_v61 = vcombine.low %v14513_v26, %v14522_v33 }
 0x1c7   :  { %10665 = vmatprep.mubr.msk.bf16.mxu1 %vm988_vm4, %v16432_v28  ;;  %10959 = vmatprep.mubr.msk.bf16.mxu0 %vm988_vm4, %v14250_v14  ;;  %v6807_v1 = vrot.slane %v6805_v23, 5  ;;  %v14561_v37 = vsel %vm12629_vm7, %v9268_v25, %v2223_v36  ;;  %v6798_v12 = vsel %vm12093_vm3, %v14532_v55, %v14493_v50  ;;  %v6803_v14 = vrot.slane %v6802_v15, 4  ;;  %v9921_v36 = vld [vmem:[%s16388_s0 + $0xa8] sm:$0xf]  ;;  %v9920_v25 = vld [vmem:[%s16388_s0 + $0xa4] sm:$0x1] }
 0x1c8   :  { %v14569_v44 = vsel %vm12629_vm7, %v2225_v48, %v2226_v19  ;;  %v2230_v2 = vrot.slane %v11889_v46, 5  ;;  %v6817_v18 = vrot.slane %v6816_v57, 4  ;;  %v6827_v50 = vrot.slane %v6826_v63, 4  ;;  %v11890_v19 = vld [vmem:[%s16388_s0 + $0x17c] sm:$0x1] }
 0x1c9   :  { %v6831_v17 = vrot.slane %v6829_v51, 5  ;;  %v9269_v62 = vrot.slane %v1955_v49, 9  ;;  %v6836_v13 = vrot.slane %v6834_v59, 4  ;;  %v6839_v39 = vrot.slane %v6837_v16, 5  ;;  %v11891_v57 = vld [vmem:[%s16388_s0 + $0x184] sm:$0xf] }
 0x1ca   :  { %v14580_v22 = vrot.slane %v6843_v5, 5  ;;  %v6849_v23 = vrot.slane %v6847_v45, 4  ;;  %v6858_v6 = vshrl.u32 %v9921_v36, 16  ;;  %v6861_v52 = vshll.u32 %v9921_v36, 16  ;;  %v16433_v51 = vld [vmem:[#allocation9_spill] sm:$0xff]  ;;  %v16434_v28 = vld [vmem:[#allocation8_spill] sm:$0xff] }
 0x1cb   :  { %v6867_v55 = vshll.u32 %v9922_v41, 16  ;;  %v6871_v15 = vshrl.u32 %v9922_v41, 16  ;;  %v6808_v48 = vsel %vm12093_vm3, %v6803_v14, %v6807_v1  ;;  %v2232_v35 = vrot.slane %v2230_v2, 4  ;;  %v9924_v14 = vld [vmem:[%s16388_s0 + $0xb4] sm:$0xf] }
 0x1cc   :  { %v2233_v11 = vrot.slane %v11890_v19, 5  ;;  %v2237_v63 = vrot.slane %v11891_v57, 5  ;;  %v16435_v49 = vor.u32 %v16433_v51, %v16434_v28  ;;  %v9301_v16 = vcombine.low %v14561_v37, %v14569_v44  ;;  %v9925_v46 = vld [vmem:[%s16388_s0 + $0xb8] sm:$0xf]  ;;  %v9927_v51 = vld [vmem:[%s16388_s0 + $0xc0] sm:$0xf] }
 0x1cd   :  { %10960 = vmatmul.mubr.msk.bf16.gmra.mrb[4].mxu0 %vm988_vm4, %v14329_v58  ;;  %v16436_v58 = vcombine.low %v14206_v56, %v14217_v8  ;;  %v6822_v5 = vsel %vm12093_vm3, %v6817_v18, %v14501_v31  ;;  %v14613_v45 = vsel %vm12629_vm7, %v9269_v62, %v2230_v2  ;;  %v1956_v56 = vld [vmem:[%s16388_s0 + $0x180] sm:$0xe]  ;;  %v6832_v8 = vsel %vm12093_vm3, %v6827_v50, %v6831_v17  ;;  %v11892_v50 = vld [vmem:[%s16388_s0 + $0x188] sm:$0x1]  ;;  %v9923_v62 = vld [vmem:[%s16388_s0 + $0xb0] sm:$0x1] }
 0x1ce   :  { %v14598_v59 = vrot.slane %v16435_v49, 4  ;;  %10963 = vmatprep.mubr.msk.bf16.mxu0 %vm988_vm4, %v14337_v47  ;;  %v6840_v47 = vor.u32 %v6839_v39, %v6836_v13  ;;  %v6850_v1 = vor.u32 %v6849_v23, %v14580_v22  ;;  %v6853_v31 = vshll.u32 %v9920_v25, 16  ;;  %v9942_v44 = vld [vmem:[%s16388_s0 + $0x114] sm:$0xf] }
 0x1cf   :  { %10666 = vmatmul.mubr.msk.bf16.gmra.mrb[40].mxu1 %vm988_vm4, %v16436_v58  ;;  %v6860_v2 = vrot.slane %v6858_v6, 4  ;;  %v6863_v36 = vrot.slane %v6861_v52, 5  ;;  %v14631_v42 = vrot.slane %v6867_v55, 5  ;;  %v6873_v43 = vrot.slane %v6871_v15, 4  ;;  %v1957_v58 = vld [vmem:[%s16388_s0 + $0x18c] sm:$0xe] }
 0x1d0   :  { %10669 = vmatprep.mubr.msk.bf16.mxu1 %vm988_vm4, %v9295_v32  ;;  %v14635_v32 = vsel %vm12629_vm7, %v2232_v35, %v2233_v11  ;;  %v9270_v41 = vrot.slane %v1956_v56, 9  ;;  %v2239_v18 = vrot.slane %v2237_v63, 4  ;;  %v2240_v17 = vrot.slane %v11892_v50, 5 }
 0x1d1   :  { %v6882_v13 = vshrl.u32 %v9924_v14, 16  ;;  %v6885_v39 = vshll.u32 %v9924_v14, 16  ;;  %v6891_v23 = vshll.u32 %v9925_v46, 16  ;;  %v6895_v25 = vshrl.u32 %v9925_v46, 16 }
 0x1d2   :  { %v14643_v6 = vcombine.low %v6798_v12, %v6808_v48  ;;  %v6841_v52 = vrot.slane %v6840_v47, 4  ;;  %v6851_v55 = vrot.slane %v6850_v1, 4  ;;  %v6855_v15 = vrot.slane %v6853_v31, 5 }
 0x1d3   :  { %v14645_v35 = vcombine.low %v6822_v5, %v6832_v8  ;;  %v6864_v19 = vor.u32 %v6863_v36, %v6860_v2  ;;  %v6874_v11 = vor.u32 %v6873_v43, %v14631_v42  ;;  %v6877_v57 = vshll.u32 %v9923_v62, 16  ;;  %v11893_v5 = vld [vmem:[%s16388_s0 + $0x190] sm:$0xf]  ;;  %v11894_v36 = vld [vmem:[%s16388_s0 + $0x194] sm:$0x1] }
 0x1d4   :  { %v9302_v12 = vcombine.low %v14613_v45, %v14635_v32  ;;  %v14657_v48 = vsel %vm12629_vm7, %v9270_v41, %v2237_v63  ;;  %v14661_v49 = vsel %vm12629_vm7, %v2239_v18, %v2240_v17  ;;  %v9926_v63 = vld [vmem:[%s16388_s0 + $0xbc] sm:$0x1]  ;;  %v6884_v56 = vrot.slane %v6882_v13, 4  ;;  %v9931_v18 = vld [vmem:[%s16388_s0 + $0xd0] sm:$0xf] }
 0x1d5   :  { %10964 = vmatmul.mubr.msk.bf16.gmra.mrb[8].mxu0 %vm988_vm4, %v14433_v34  ;;  %v2244_v34 = vrot.slane %v11893_v5, 5  ;;  %v6887_v8 = vrot.slane %v6885_v39, 5  ;;  %v14678_v47 = vrot.slane %v6891_v23, 5  ;;  %v6897_v1 = vrot.slane %v6895_v25, 4 }
 0x1d6   :  { %10967 = vmatprep.mubr.msk.bf16.mxu0 %vm988_vm4, %v14440_v7  ;;  %v6846_v0 = vsel %vm12093_vm3, %v6841_v52, %v14580_v22  ;;  %v6856_v24 = vsel %vm12093_vm3, %v6851_v55, %v6855_v15  ;;  %v6906_v7 = vshrl.u32 %v9927_v51, 16  ;;  %v6909_v31 = vshll.u32 %v9927_v51, 16 }
 0x1d7   :  { %10670 = vmatmul.mubr.msk.bf16.gmra.mrb[44].mxu1 %vm988_vm4, %v9296_v38  ;;  %v9928_v38 = vld [vmem:[%s16388_s0 + $0xc4] sm:$0xf]  ;;  %v9303_v14 = vcombine.low %v14657_v48, %v14661_v49  ;;  %v6865_v46 = vrot.slane %v6864_v19, 4  ;;  %v6875_v10 = vrot.slane %v6874_v11, 4  ;;  %v6879_v53 = vrot.slane %v6877_v57, 5 }
 0x1d8   :  { %10673 = vmatprep.mubr.msk.bf16.mxu1 %vm988_vm4, %v9297_v40  ;;  %v9930_v40 = vld [vmem:[%s16388_s0 + $0xcc] sm:$0xf]  ;;  %v9271_v22 = vrot.slane %v1957_v58, 9  ;;  %v2246_v2 = vrot.slane %v2244_v34, 4  ;;  %v2247_v43 = vrot.slane %v11894_v36, 5  ;;  %v6901_v41 = vshll.u32 %v9926_v63, 16 }
 0x1d9   :  { %v6888_v50 = vor.u32 %v6887_v8, %v6884_v56  ;;  %v6898_v17 = vor.u32 %v6897_v1, %v14678_v47  ;;  %v6915_v62 = vshll.u32 %v9928_v38, 16  ;;  %v6919_v13 = vshrl.u32 %v9928_v38, 16  ;;  %v9934_v63 = vld [vmem:[%s16388_s0 + $0xf4] sm:$0xf]  ;;  %v9936_v1 = vld [vmem:[%s16388_s0 + $0xfc] sm:$0xf] }
 0x1da   :  { %v6908_v39 = vrot.slane %v6906_v7, 4  ;;  %v6911_v23 = vrot.slane %v6909_v31, 5  ;;  %v6930_v25 = vshrl.u32 %v9930_v40, 16  ;;  %v6933_v52 = vshll.u32 %v9930_v40, 16 }
 0x1db   :  { %v6870_v55 = vsel %vm12093_vm3, %v6865_v46, %v14631_v42  ;;  %v6880_v15 = vsel %vm12093_vm3, %v6875_v10, %v6879_v53  ;;  %v6939_v19 = vshll.u32 %v9931_v18, 16  ;;  %v6943_v11 = vshrl.u32 %v9931_v18, 16  ;;  %v9933_v42 = vld [vmem:[%s16388_s0 + $0xf0] sm:$0xf] }
 0x1dc   :  { %v14711_v57 = vcombine.low %v6846_v0, %v6856_v24  ;;  %v14715_v51 = vsel %vm12629_vm7, %v9271_v22, %v2244_v34  ;;  %v14719_v58 = vsel %vm12629_vm7, %v2246_v2, %v2247_v43  ;;  %v6903_v5 = vrot.slane %v6901_v41, 5 }
 0x1dd   :  { %10968 = vmatmul.mubr.msk.bf16.gmra.mrb[12].mxu0 %vm988_vm4, %v14543_v4  ;;  %v6889_v4 = vrot.slane %v6888_v50, 4  ;;  %v6899_v34 = vrot.slane %v6898_v17, 4  ;;  %v14733_v56 = vrot.slane %v6915_v62, 5  ;;  %v6921_v8 = vrot.slane %v6919_v13, 4  ;;  %v9939_v17 = vld [vmem:[%s16388_s0 + $0x108] sm:$0xf] }
 0x1de   :  { %10971 = vmatprep.mubr.msk.bf16.mxu0 %vm988_vm4, %v14555_v20  ;;  %v14742_v9 = vcombine.low %v6870_v55, %v6880_v15  ;;  %v9932_v20 = vld [vmem:[%s16388_s0 + $0xd4] sm:$0x1]  ;;  %v6932_v0 = vrot.slane %v6930_v25, 4  ;;  %v6935_v24 = vrot.slane %v6933_v52, 5  ;;  %v14750_v38 = vrot.slane %v6939_v19, 5 }
 0x1df   :  { %10674 = vmatmul.mubr.msk.bf16.gmra.mrb[48].mxu1 %vm988_vm4, %v9298_v21  ;;  %v6912_v21 = vor.u32 %v6911_v23, %v6908_v39  ;;  %v6945_v7 = vrot.slane %v6943_v11, 4  ;;  %v6954_v31 = vshrl.u32 %v9933_v42, 16  ;;  %v6957_v54 = vshll.u32 %v9933_v42, 16  ;;  %v9935_v23 = vld [vmem:[%s16388_s0 + $0xf8] sm:$0x1] }
 0x1e0   :  { %10677 = vmatprep.mubr.msk.bf16.mxu1 %vm988_vm4, %v9299_v27  ;;  %v6963_v27 = vshll.u32 %v9934_v63, 16  ;;  %v6967_v46 = vshrl.u32 %v9934_v63, 16  ;;  %v6978_v10 = vshrl.u32 %v9936_v1, 16  ;;  %v6981_v53 = vshll.u32 %v9936_v1, 16  ;;  %v9938_v11 = vld [vmem:[%s16388_s0 + $0x104] sm:$0x1] }
 0x1e1   :  { %v6894_v40 = vsel %vm12093_vm3, %v6889_v4, %v14678_v47  ;;  %v6904_v22 = vsel %vm12093_vm3, %v6899_v34, %v6903_v5  ;;  %v6922_v2 = vor.u32 %v6921_v8, %v14733_v56  ;;  %v6925_v36 = vshll.u32 %v9929_v30, 16  ;;  %v9940_v63 = vld [vmem:[%s16388_s0 + $0x10c] sm:$0xf] }
 0x1e2   :  { %v14761_v43 = vrot.slane %v6912_v21, 4  ;;  %v6949_v41 = vshll.u32 %v9932_v20, 16  ;;  %v6987_v18 = vshll.u32 %v9937_v60, 16  ;;  %v6991_v50 = vshrl.u32 %v9937_v60, 16  ;;  %v9943_v20 = vld [vmem:[%s16388_s0 + $0x118] sm:$0xf] }
 0x1e3   :  { %v6936_v62 = vor.u32 %v6935_v24, %v6932_v0  ;;  %v6946_v13 = vor.u32 %v6945_v7, %v14750_v38  ;;  %v6956_v39 = vrot.slane %v6954_v31, 4  ;;  %v6959_v47 = vrot.slane %v6957_v54, 5 }
 0x1e4   :  { %v14772_v25 = vrot.slane %v6963_v27, 5  ;;  %v6969_v52 = vrot.slane %v6967_v46, 4  ;;  %v6980_v55 = vrot.slane %v6978_v10, 4  ;;  %v6983_v15 = vrot.slane %v6981_v53, 5 }
 0x1e5   :  { %10972 = vmatmul.mubr.msk.bf16.gmra.mrb[16].mxu0 %vm988_vm4, %v14643_v6  ;;  %v9304_v6 = vcombine.low %v14715_v51, %v14719_v58  ;;  %v6927_v19 = vrot.slane %v6925_v36, 5  ;;  %v7002_v5 = vshrl.u32 %v9939_v17, 16  ;;  %v7005_v42 = vshll.u32 %v9939_v17, 16 }
 0x1e6   :  { %10975 = vmatprep.mubr.msk.bf16.mxu0 %vm988_vm4, %v14645_v35  ;;  %v14789_v26 = vcombine.low %v6894_v40, %v6904_v22  ;;  %v6923_v33 = vrot.slane %v6922_v2, 4  ;;  %v6993_v35 = vrot.slane %v6991_v50, 4  ;;  %v6918_v4 = vsel %vm12093_vm3, %v14761_v43, %v14733_v56 }
 0x1e7   :  { %10678 = vmatmul.mubr.msk.bf16.gmra.mrb[52].mxu1 %vm988_vm4, %v9300_v61  ;;  %v14791_v61 = vrot.slane %v6987_v18, 5  ;;  %v6937_v34 = vrot.slane %v6936_v62, 4  ;;  %v6947_v8 = vrot.slane %v6946_v13, 4  ;;  %v6951_v37 = vrot.slane %v6949_v41, 5  ;;  %v9945_v41 = vld [vmem:[%s16388_s0 + $0x120] sm:$0xf] }
 0x1e8   :  { %10681 = vmatprep.mubr.msk.bf16.mxu1 %vm988_vm4, %v9301_v16  ;;  %v6960_v16 = vor.u32 %v6959_v47, %v6956_v39  ;;  %v6970_v1 = vor.u32 %v6969_v52, %v14772_v25  ;;  %v6973_v30 = vshll.u32 %v9935_v23, 16  ;;  %v6984_v21 = vor.u32 %v6983_v15, %v6980_v55  ;;  %v9946_v47 = vld [vmem:[%s16388_s0 + $0x124] sm:$0xf] }
 0x1e9   :  { %v7004_v0 = vrot.slane %v7002_v5, 4  ;;  %v7007_v24 = vrot.slane %v7005_v42, 5  ;;  %v7011_v7 = vshll.u32 %v9940_v63, 16  ;;  %v7015_v56 = vshrl.u32 %v9940_v63, 16  ;;  %v9948_v42 = vld [vmem:[%s16388_s0 + $0x12c] sm:$0xf] }
 0x1ea   :  { %v6994_v31 = vor.u32 %v6993_v35, %v14791_v61  ;;  %v6997_v54 = vshll.u32 %v9938_v11, 16  ;;  %v7026_v60 = vshrl.u32 %v9942_v44, 16  ;;  %v7029_v27 = vshll.u32 %v9942_v44, 16 }
 0x1eb   :  { %v6928_v46 = vsel %vm12093_vm3, %v6923_v33, %v6927_v19  ;;  %v6942_v10 = vsel %vm12093_vm3, %v6937_v34, %v14750_v38  ;;  %v7035_v53 = vshll.u32 %v9943_v20, 16  ;;  %v7039_v40 = vshrl.u32 %v9943_v20, 16  ;;  %v11736_v33 = vld [vmem:[%s16388_s0 + $0xc] sm:$0xff]  }
 0x1ec   :  { %v6952_v22 = vsel %vm12093_vm3, %v6947_v8, %v6951_v37  ;;  %v6961_v2 = vrot.slane %v6960_v16, 4  ;;  %v6971_v36 = vrot.slane %v6970_v1, 4  ;;  %v6975_v43 = vrot.slane %v6973_v30, 5  ;;  %v9947_v30 = vld [vmem:[%s16388_s0 + $0x128] sm:$0x1] }
 0x1ed   :  { %10976 = vmatmul.mubr.msk.bf16.gmra.mrb[20].mxu0 %vm988_vm4, %v14711_v57  ;;  %v6985_v38 = vrot.slane %v6984_v21, 4  ;;  %v9941_v57 = vld [vmem:[%s16388_s0 + $0x110] sm:$0x1]  ;;  %v7008_v18 = vor.u32 %v7007_v24, %v7004_v0  ;;  %v14829_v50 = vrot.slane %v7011_v7, 5  ;;  %v7017_v17 = vrot.slane %v7015_v56, 4 }
 0x1ee   :  { %10979 = vmatprep.mubr.msk.bf16.mxu0 %vm988_vm4, %v14742_v9  ;;  %v6995_v45 = vrot.slane %v6994_v31, 4  ;;  %v6999_v32 = vrot.slane %v6997_v54, 5  ;;  %v7028_v9 = vrot.slane %v7026_v60, 4  ;;  %v7031_v62 = vrot.slane %v7029_v27, 5  ;;  %v9949_v7 = vld [vmem:[%s16388_s0 + $0x130] sm:$0xf] }
 0x1ef   :  { %10682 = vmatmul.mubr.msk.bf16.gmra.mrb[56].mxu1 %vm988_vm4, %v9302_v12  ;;  %v9944_v12 = vld [vmem:[%s16388_s0 + $0x11c] sm:$0x1]  ;;  %v14838_v13 = vrot.slane %v7035_v53, 5  ;;  %v7041_v39 = vrot.slane %v7039_v40, 4  ;;  %v7050_v23 = vshrl.u32 %v9945_v41, 16  ;;  %v7053_v52 = vshll.u32 %v9945_v41, 16 }
 0x1f0   :  { %10685 = vmatprep.mubr.msk.bf16.mxu1 %vm988_vm4, %v9303_v14  ;;  %v9996_v48 = vcombine.low %v6918_v4, %v6928_v46  ;;  %v9997_v49 = vcombine.low %v6942_v10, %v6952_v22  ;;  %v6966_v14 = vsel %vm12093_vm3, %v6961_v2, %v14772_v25  ;;  %v7021_v55 = vshll.u32 %v9941_v57, 16  ;;  %v9523_v25 = vld [vmem:[%s16388_s0 + $0x108] sm:$0xf]  ;;  %v9951_v54 = vld [vmem:[%s16388_s0 + $0x138] sm:$0xf] }
 0x1f1   :  { %v6976_v15 = vsel %vm12093_vm3, %v6971_v36, %v6975_v43  ;;  %v6990_v19 = vsel %vm12093_vm3, %v6985_v38, %v14791_v61  ;;  %v14851_v11 = vrot.slane %v7008_v18, 4  ;;  %v7018_v5 = vor.u32 %v7017_v17, %v14829_v50  ;;  %v9952_v53 = vld [vmem:[%s16388_s0 + $0x13c] sm:$0xf]  ;;  %v9950_v41 = vld [vmem:[%s16388_s0 + $0x134] sm:$0x1] }
 0x1f2   :  { %v7000_v35 = vsel %vm12093_vm3, %v6995_v45, %v6999_v32  ;;  %v7045_v61 = vshll.u32 %v9944_v12, 16  ;;  %v7059_v63 = vshll.u32 %v9946_v47, 16  ;;  %v7063_v4 = vshrl.u32 %v9946_v47, 16  ;;  %v11737_v43 = vld [vmem:[%s16388_s0 + $0x18] sm:$0xff]   ;;  %v11738_v45 = vld [vmem:[%s16388_s0 + $0x24] sm:$0xff]  }
 0x1f3   :  { %v7032_v34 = vor.u32 %v7031_v62, %v7028_v9  ;;  %v7042_v8 = vor.u32 %v7041_v39, %v14838_v13  ;;  %v7052_v37 = vrot.slane %v7050_v23, 4  ;;  %v7055_v44 = vrot.slane %v7053_v52, 5 }
 0x1f4   :  { %v9998_v16 = vcombine.low %v6966_v14, %v6976_v15  ;;  %v14868_v1 = vrot.slane %v7021_v55, 5  ;;  %v7074_v21 = vshrl.u32 %v9948_v42, 16  ;;  %v4031_v20 = vshrl.u32 %v9523_v25, 16  ;;  %v9954_v55 = vld [vmem:[%s16388_s0 + $0x144] sm:$0xf] }
 0x1f5   :  { %10980 = vmatmul.mubr.msk.bf16.gmra.mrb[24].mxu0 %vm988_vm4, %v14789_v26  ;;  %v14878_v0 = vcombine.low %v6990_v19, %v7000_v35  ;;  %v7014_v26 = vsel %vm12093_vm3, %v14851_v11, %v14829_v50  ;;  %v7019_v24 = vrot.slane %v7018_v5, 4  ;;  %v4034_v56 = vshll.u32 %v9523_v25, 16  ;;  %v16437_v50 = vld [vmem:[#allocation10_spill] sm:$0xff] }
 0x1f6   :  { %10983 = vmatprep.mubr.msk.bf16.mxu0 %vm988_vm4, %v9996_v48  ;;  %v7047_v51 = vrot.slane %v7045_v61, 5  ;;  %v14888_v58 = vrot.slane %v7059_v63, 5  ;;  %v7077_v31 = vshll.u32 %v9948_v42, 16  ;;  %v7033_v60 = vrot.slane %v7032_v34, 4  ;;  %v9955_v5 = vld [vmem:[%s16388_s0 + $0x148] sm:$0xf] }
 0x1f7   :  { %10686 = vmatmul.mubr.msk.bf16.gmra.mrb[60].mxu1 %vm988_vm4, %v9304_v6  ;;  %v7065_v6 = vrot.slane %v7063_v4, 4  ;;  %v7043_v27 = vrot.slane %v7042_v8, 4  ;;  %v7056_v46 = vor.u32 %v7055_v44, %v7052_v37  ;;  %v7069_v10 = vshll.u32 %v9947_v30, 16  ;;  %v16438_v42 = vld [vmem:[#allocation5_spill] sm:$0xff]  ;;  %v9957_v61 = vld [vmem:[%s16388_s0 + $0x150] sm:$0xf] }
 0x1f8   :  { %10691 = vmatprep.mubr.msk.bf16.mxu1 %vm988_vm4, %v11736_v33  ;;  %v7076_v40 = vrot.slane %v7074_v21, 4  ;;  %v7083_v22 = vshll.u32 %v9949_v7, 16  ;;  %v4033_v2 = vrot.slane %v4031_v20, 4  ;;  %v4036_v36 = vrot.slane %v4034_v56, 5  ;;  %v9953_v4 = vld [vmem:[%s16388_s0 + $0x140] sm:$0x1] }
 0x1f9   :  { %v7087_v38 = vshrl.u32 %v9949_v7, 16  ;;  %v7098_v57 = vshrl.u32 %v9951_v54, 16  ;;  %v7101_v18 = vshll.u32 %v9951_v54, 16  ;;  %v4053_v17 = vsel %vm12093_vm3, %v14598_v59, %v16437_v50  ;;  %v11739_v20 = vld [vmem:[%s16388_s0 + $0x30] sm:$0xff]  }
 0x1fa   :  { %v7066_v32 = vor.u32 %v7065_v6, %v14888_v58  ;;  %v7079_v12 = vrot.slane %v7077_v31, 5  ;;  %v7107_v9 = vshll.u32 %v9952_v53, 16  ;;  %v4037_v62 = vor.u32 %v4036_v36, %v4033_v2  ;;  %v9958_v7 = vld [vmem:[%s16388_s0 + $0x154] sm:$0xf] }
 0x1fb   :  { %v7024_v39 = vsel %vm12093_vm3, %v7019_v24, %v14868_v1  ;;  %v7038_v47 = vsel %vm12093_vm3, %v7033_v60, %v14838_v13  ;;  %v14916_v23 = vrot.slane %v7069_v10, 5  ;;  %v7111_v59 = vshrl.u32 %v9952_v53, 16 }
 0x1fc   :  { %v7048_v52 = vsel %vm12093_vm3, %v7043_v27, %v7047_v51  ;;  %v14921_v48 = vrot.slane %v7056_v46, 4  ;;  %v7093_v14 = vshll.u32 %v9950_v41, 16  ;;  %v4038_v15 = vrot.slane %v4037_v62, 4  ;;  %v9960_v27 = vld [vmem:[%s16388_s0 + $0x15c] sm:$0xf] }
 0x1fd   :  { %10984 = vmatmul.mubr.msk.bf16.gmra.mrb[28].mxu0 %vm988_vm4, %v9997_v49  ;;  %v14928_v13 = vrot.slane %v7083_v22, 5  ;;  %v7089_v19 = vrot.slane %v7087_v38, 4  ;;  %v7100_v11 = vrot.slane %v7098_v57, 4  ;;  %v7103_v49 = vrot.slane %v7101_v18, 5  ;;  %v9956_v22 = vld [vmem:[%s16388_s0 + $0x14c] sm:$0x1] }
 0x1fe   :  { %10987 = vmatprep.mubr.msk.bf16.mxu0 %vm988_vm4, %v9998_v16  ;;  %v7067_v25 = vrot.slane %v7066_v32, 4  ;;  %v7080_v33 = vor.u32 %v7079_v12, %v7076_v40  ;;  %v14935_v35 = vrot.slane %v7107_v9, 5  ;;  %v4043_v63 = vsel %vm12093_vm3, %v4038_v15, %v16434_v28 }
 0x1ff   :  { %10692 = vmatmul.mubr.msk.bf16.vlgmr.msra.gmra.mrb[0].mxu1 %vm988_vm4, %v11737_v43  ;;  %v7113_v34 = vrot.slane %v7111_v59, 4  ;;  %v7122_v8 = vshrl.u32 %v9954_v55, 16  ;;  %v7125_v37 = vshll.u32 %v9954_v55, 16  ;;  %v14946_v44 = vcombine.low %v4043_v63, %v4053_v17  ;;  %v9959_v59 = vld [vmem:[%s16388_s0 + $0x158] sm:$0x1] }
 0x200   :  { %10695 = vmatprep.mubr.msk.bf16.mxu1 %vm988_vm4, %v11738_v45  ;;  %11145 = vmatpush3.bf16.msra.mxu1 %v16438_v42  ;;  %v10000_v16 = vcombine.low %v7014_v26, %v7024_v39  ;;  %v14948_v1 = vcombine.low %v7038_v47, %v7048_v52  ;;  %v7131_v30 = vshll.u32 %v9955_v5, 16  ;;  %v7135_v21 = vshrl.u32 %v9955_v5, 16  ;;  %v11740_v26 = vld [vmem:[%s16388_s0 + $0x3c] sm:$0xff]   ;;  %v11742_v55 = vld [vmem:[%s16388_s0 + $0x54] sm:$0xff]   ;;  %v9963_v5 = vld [vmem:[%s16388_s0 + $0x168] sm:$0xf] }
 0x201   :  { %v7090_v28 = vor.u32 %v7089_v19, %v14928_v13  ;;  %v7104_v24 = vor.u32 %v7103_v49, %v7100_v11  ;;  %v7146_v56 = vshrl.u32 %v9957_v61, 16  ;;  %v7149_v51 = vshll.u32 %v9957_v61, 16 }
 0x202   :  { %v7062_v6 = vsel %vm12093_vm3, %v14921_v48, %v14888_v58  ;;  %v7072_v31 = vsel %vm12093_vm3, %v7067_v25, %v14916_v23  ;;  %v14967_v54 = vrot.slane %v7093_v14, 5  ;;  %v7117_v60 = vshll.u32 %v9953_v4, 16  ;;  %v9961_v58 = vld [vmem:[%s16388_s0 + $0x160] sm:$0xf]  ;;  %v11741_v14 = vld [vmem:[%s16388_s0 + $0x48] sm:$0xff]  }
 0x203   :  { %v14972_v46 = vrot.slane %v7080_v33, 4  ;;  %v7114_v10 = vor.u32 %v7113_v34, %v14935_v35  ;;  %v7124_v53 = vrot.slane %v7122_v8, 4  ;;  %v7127_v40 = vrot.slane %v7125_v37, 5  ;;  %v9962_v8 = vld [vmem:[%s16388_s0 + $0x164] sm:$0x1] }
 0x204   :  { %v14983_v2 = vrot.slane %v7131_v30, 5  ;;  %v7137_v36 = vrot.slane %v7135_v21, 4  ;;  %v7155_v43 = vshll.u32 %v9958_v7, 16  ;;  %v7159_v41 = vshrl.u32 %v9958_v7, 16 }
 0x205   :  { %10988 = vmatmul.mubr.msk.bf16.gmra.mrb[32].mxu0 %vm988_vm4, %v14878_v0  ;;  %v7091_v38 = vrot.slane %v7090_v28, 4  ;;  %v7105_v57 = vrot.slane %v7104_v24, 4  ;;  %v7148_v18 = vrot.slane %v7146_v56, 4  ;;  %v7151_v50 = vrot.slane %v7149_v51, 5 }
 0x206   :  { %10991 = vmatprep.mubr.msk.bf16.mxu0 %vm988_vm4, %v10000_v16  ;;  %v7170_v0 = vshrl.u32 %v9960_v27, 16  ;;  %v7173_v17 = vshll.u32 %v9960_v27, 16  ;;  %v7179_v45 = vshll.u32 %v9961_v58, 16  ;;  %v7183_v32 = vshrl.u32 %v9961_v58, 16  ;;  %v9967_v27 = vld [vmem:[%s16388_s0 + $0x178] sm:$0xf] }
 0x207   :  { %10696 = vmatmul.mubr.msk.bf16.gmra.mrb[4].mxu1 %vm988_vm4, %v11739_v20  ;;  %v7115_v12 = vrot.slane %v7114_v10, 4  ;;  %v7119_v9 = vrot.slane %v7117_v60, 5  ;;  %v7128_v62 = vor.u32 %v7127_v40, %v7124_v53  ;;  %v7141_v39 = vshll.u32 %v9956_v22, 16  ;;  %v9965_v60 = vld [vmem:[%s16388_s0 + $0x170] sm:$0x1] }
 0x208   :  { %10699 = vmatprep.mubr.msk.bf16.mxu1 %vm988_vm4, %v11740_v26  ;;  %v10002_v47 = vcombine.low %v7062_v6, %v7072_v31  ;;  %v7138_v23 = vor.u32 %v7137_v36, %v14983_v2  ;;  %v14992_v52 = vrot.slane %v7155_v43, 5  ;;  %v7161_v48 = vrot.slane %v7159_v41, 4  ;;  %v9969_v22 = vld [vmem:[%s16388_s0 + $0x180] sm:$0xf] }
 0x209   :  { %v7086_v15 = vsel %vm12093_vm3, %v14972_v46, %v14928_v13  ;;  %v7096_v19 = vsel %vm12093_vm3, %v7091_v38, %v14967_v54  ;;  %v7110_v11 = vsel %vm12093_vm3, %v7105_v57, %v14935_v35  ;;  %v7152_v49 = vor.u32 %v7151_v50, %v7148_v18  ;;  %v9964_v13 = vld [vmem:[%s16388_s0 + $0x16c] sm:$0xf]  ;;  %v11743_v46 = vld [vmem:[%s16388_s0 + $0x60] sm:$0xff]  }
 0x20a   :  { %v7172_v42 = vrot.slane %v7170_v0, 4  ;;  %v7175_v25 = vrot.slane %v7173_v17, 5  ;;  %v15013_v33 = vrot.slane %v7179_v45, 5  ;;  %v7185_v61 = vrot.slane %v7183_v32, 4  ;;  %v9970_v38 = vld [vmem:[%s16388_s0 + $0x184] sm:$0xf] }
 0x20b   :  { %v7120_v63 = vsel %vm12093_vm3, %v7115_v12, %v7119_v9  ;;  %v7129_v4 = vrot.slane %v7128_v62, 4  ;;  %v7143_v34 = vrot.slane %v7141_v39, 5  ;;  %v7165_v35 = vshll.u32 %v9959_v59, 16  ;;  %v11744_v57 = vld [vmem:[%s16388_s0 + $0x6c] sm:$0xff]  }
 0x20c   :  { %v7139_v37 = vrot.slane %v7138_v23, 4  ;;  %v7162_v16 = vor.u32 %v7161_v48, %v14992_v52  ;;  %v7194_v30 = vshrl.u32 %v9963_v5, 16  ;;  %v7197_v21 = vshll.u32 %v9963_v5, 16 }
 0x20d   :  { %10992 = vmatmul.mubr.msk.bf16.gmra.mrb[36].mxu0 %vm988_vm4, %v14948_v1  ;;  %v7203_v20 = vshll.u32 %v9964_v13, 16  ;;  %v7207_v28 = vshrl.u32 %v9964_v13, 16  ;;  %v7153_v24 = vrot.slane %v7152_v49, 4  ;;  %v7176_v7 = vor.u32 %v7175_v25, %v7172_v42  ;;  %v9966_v1 = vld [vmem:[%s16388_s0 + $0x174] sm:$0xf] }
 0x20e   :  { %10995 = vmatprep.mubr.msk.bf16.mxu0 %vm988_vm4, %v10002_v47  ;;  %v7186_v56 = vor.u32 %v7185_v61, %v15013_v33  ;;  %v7189_v51 = vshll.u32 %v9962_v8, 16  ;;  %v10003_v26 = vcombine.low %v7086_v15, %v7096_v19  ;;  %v10004_v6 = vcombine.low %v7110_v11, %v7120_v63  ;;  %v9968_v11 = vld [vmem:[%s16388_s0 + $0x17c] sm:$0x1]  ;;  %v9972_v61 = vld [vmem:[%s16388_s0 + $0x18c] sm:$0xf] }
 0x20f   :  { %10700 = vmatmul.mubr.msk.bf16.gmra.mrb[8].mxu1 %vm988_vm4, %v11741_v14  ;;  %v7134_v31 = vsel %vm12093_vm3, %v7129_v4, %v14983_v2  ;;  %v7167_v54 = vrot.slane %v7165_v35, 5  ;;  %v7144_v10 = vsel %vm12093_vm3, %v7139_v37, %v7143_v34  ;;  %v7163_v53 = vrot.slane %v7162_v16, 4  ;;  %v11745_v35 = vld [vmem:[%s16388_s0 + $0x78] sm:$0xff]  }
 0x210   :  { %10703 = vmatprep.mubr.msk.bf16.mxu1 %vm988_vm4, %v11742_v55  ;;  %v7196_v40 = vrot.slane %v7194_v30, 4  ;;  %v7199_v58 = vrot.slane %v7197_v21, 5  ;;  %v15050_v2 = vrot.slane %v7203_v20, 5  ;;  %v7209_v36 = vrot.slane %v7207_v28, 4  ;;  %v9973_v21 = vld [vmem:[%s16388_s0 + $0x190] sm:$0xf] }
 0x211   :  { %v7218_v43 = vshrl.u32 %v9966_v1, 16  ;;  %v7221_v41 = vshll.u32 %v9966_v1, 16  ;;  %v7158_v18 = vsel %vm12093_vm3, %v7153_v24, %v14992_v52  ;;  %v7177_v50 = vrot.slane %v7176_v7, 4  ;;  %v11746_v20 = vld [vmem:[%s16388_s0 + $0x84] sm:$0xff]   ;;  %v9975_v1 = vld [vmem:[%s16388_s0 + $0x198] sm:$0xf] }
 0x212   :  { %v7187_v0 = vrot.slane %v7186_v56, 4  ;;  %v7191_v17 = vrot.slane %v7189_v51, 5  ;;  %v7227_v45 = vshll.u32 %v9967_v27, 16  ;;  %v7231_v32 = vshrl.u32 %v9967_v27, 16 }
 0x213   :  { %v7242_v12 = vshrl.u32 %v9969_v22, 16  ;;  %v7245_v9 = vshll.u32 %v9969_v22, 16  ;;  %v7168_v62 = vsel %vm12093_vm3, %v7163_v53, %v7167_v54  ;;  %v7213_v39 = vshll.u32 %v9965_v60, 16 }
 0x214   :  { %v7251_v47 = vshll.u32 %v9970_v38, 16  ;;  %v7255_v23 = vshrl.u32 %v9970_v38, 16  ;;  %v7200_v59 = vor.u32 %v7199_v58, %v7196_v40  ;;  %v7210_v52 = vor.u32 %v7209_v36, %v15050_v2 }
 0x215   :  { %10996 = vmatmul.mubr.msk.bf16.gmra.mrb[40].mxu0 %vm988_vm4, %v10003_v26  ;;  %v7220_v48 = vrot.slane %v7218_v43, 4  ;;  %v7223_v14 = vrot.slane %v7221_v41, 5  ;;  %v10005_v55 = vcombine.low %v7134_v31, %v7144_v10  ;;  %v7182_v15 = vsel %vm12093_vm3, %v7177_v50, %v15013_v33  ;;  %v9971_v33 = vld [vmem:[%s16388_s0 + $0x188] sm:$0x1]  ;;  %v9976_v26 = vld [vmem:[%s16388_s0 + $0x19c] sm:$0xf] }
 0x216   :  { %10999 = vmatprep.mubr.msk.bf16.mxu0 %vm988_vm4, %v10004_v6  ;;  %v7192_v19 = vsel %vm12093_vm3, %v7187_v0, %v7191_v17  ;;  %v15076_v49 = vrot.slane %v7227_v45, 5  ;;  %v7233_v5 = vrot.slane %v7231_v32, 4  ;;  %v7244_v42 = vrot.slane %v7242_v12, 4  ;;  %v11747_v45 = vld [vmem:[%s16388_s0 + $0x90] sm:$0xff]   ;;  %v11748_v32 = vld [vmem:[%s16388_s0 + $0x9c] sm:$0xff]  }
 0x217   :  { %10704 = vmatmul.mubr.msk.bf16.gmra.mrb[12].mxu1 %vm988_vm4, %v11743_v46  ;;  %v7247_v25 = vrot.slane %v7245_v9, 5  ;;  %v10006_v13 = vcombine.low %v7158_v18, %v7168_v62  ;;  %v7215_v63 = vrot.slane %v7213_v39, 5  ;;  %v15084_v4 = vrot.slane %v7251_v47, 5  ;;  %v9978_v9 = vld [vmem:[%s16388_s0 + $0x1a4] sm:$0xf] }
 0x218   :  { %10707 = vmatprep.mubr.msk.bf16.mxu1 %vm988_vm4, %v11744_v57  ;;  %v7257_v34 = vrot.slane %v7255_v23, 4  ;;  %v7201_v8 = vrot.slane %v7200_v59, 4  ;;  %v7211_v37 = vrot.slane %v7210_v52, 4  ;;  %v7224_v16 = vor.u32 %v7223_v14, %v7220_v48  ;;  %v9979_v59 = vld [vmem:[%s16388_s0 + $0x1a8] sm:$0xf] }
 0x219   :  { %v7237_v30 = vshll.u32 %v9968_v11, 16  ;;  %v10007_v28 = vcombine.low %v7182_v15, %v7192_v19  ;;  %v7234_v24 = vor.u32 %v7233_v5, %v15076_v49  ;;  %v7248_v7 = vor.u32 %v7247_v25, %v7244_v42 }
 0x21a   :  { %v7261_v56 = vshll.u32 %v9971_v33, 16  ;;  %v7266_v51 = vshrl.u32 %v9972_v61, 16  ;;  %v7258_v6 = vor.u32 %v7257_v34, %v15084_v4  ;;  %v7269_v31 = vshll.u32 %v9972_v61, 16 }
 0x21b   :  { %v7275_v54 = vshll.u32 %v9973_v21, 16  ;;  %v7279_v60 = vshrl.u32 %v9973_v21, 16  ;;  %v7206_v27 = vsel %vm12093_vm3, %v7201_v8, %v15050_v2  ;;  %v7216_v46 = vsel %vm12093_vm3, %v7211_v37, %v7215_v63  ;;  %v9974_v2 = vld [vmem:[%s16388_s0 + $0x194] sm:$0x1] }
 0x21c   :  { %v7225_v10 = vrot.slane %v7224_v16, 4  ;;  %v7239_v53 = vrot.slane %v7237_v30, 5  ;;  %v7290_v40 = vshrl.u32 %v9975_v1, 16  ;;  %v7293_v58 = vshll.u32 %v9975_v1, 16  ;;  %v11749_v16 = vld [vmem:[%s16388_s0 + $0xa8] sm:$0xff]  }
 0x21d   :  { %11000 = vmatmul.mubr.msk.bf16.gmra.mrb[44].mxu0 %vm988_vm4, %v10005_v55  ;;  %v7299_v22 = vshll.u32 %v9976_v26, 16  ;;  %v7303_v36 = vshrl.u32 %v9976_v26, 16  ;;  %v7235_v43 = vrot.slane %v7234_v24, 4  ;;  %v7249_v41 = vrot.slane %v7248_v7, 4  ;;  %v9977_v55 = vld [vmem:[%s16388_s0 + $0x1a0] sm:$0x1] }
 0x21e   :  { %11003 = vmatprep.mubr.msk.bf16.mxu0 %vm988_vm4, %v10006_v13  ;;  %v7263_v38 = vrot.slane %v7261_v56, 5  ;;  %v7268_v57 = vrot.slane %v7266_v51, 4  ;;  %v7259_v18 = vrot.slane %v7258_v6, 4  ;;  %v7271_v50 = vrot.slane %v7269_v31, 5  ;;  %v11750_v24 = vld [vmem:[%s16388_s0 + $0xb4] sm:$0xff]  }
 0x21f   :  { %10708 = vmatmul.mubr.msk.bf16.gmra.mrb[16].mxu1 %vm988_vm4, %v11745_v35  ;;  %v7277_v0 = vrot.slane %v7275_v54, 5  ;;  %v7281_v17 = vrot.slane %v7279_v60, 4  ;;  %v10008_v12 = vcombine.low %v7206_v27, %v7216_v46  ;;  %v7292_v62 = vrot.slane %v7290_v40, 4  ;;  %v9980_v1 = vld [vmem:[%s16388_s0 + $0x1ac] sm:$0x1] }
 0x220   :  { %10711 = vmatprep.mubr.msk.bf16.mxu1 %vm988_vm4, %v11746_v20  ;;  %v7295_v39 = vrot.slane %v7293_v58, 5  ;;  %v7301_v47 = vrot.slane %v7299_v22, 5  ;;  %v7305_v23 = vrot.slane %v7303_v36, 4  ;;  %v7230_v52 = vsel %vm12093_vm3, %v7225_v10, %v15076_v49  ;;  %v11895_v10 = vld [vmem:[%s16388_s0 + $0x1c] sm:$0xf]  ;;  %v11751_v22 = vld [vmem:[%s16388_s0 + $0xc0] sm:$0xff]  }
 0x221   :  { %v7240_v48 = vsel %vm12093_vm3, %v7235_v43, %v7239_v53  ;;  %v7285_v14 = vshll.u32 %v9974_v2, 16  ;;  %v7254_v15 = vsel %vm12093_vm3, %v7249_v41, %v15084_v4  ;;  %v7264_v19 = vsel %vm12093_vm3, %v7259_v18, %v7263_v38  ;;  %v10046_v40 = vld [vmem:[%s16388_s0 + $0x18] sm:$0xe] }
 0x222   :  { %v7272_v11 = vor.u32 %v7271_v50, %v7268_v57  ;;  %v7282_v5 = vor.u32 %v7281_v17, %v7277_v0  ;;  %v7314_v49 = vshrl.u32 %v9978_v9, 16  ;;  %v7317_v42 = vshll.u32 %v9978_v9, 16  ;;  %v11752_v57 = vld [vmem:[%s16388_s0 + $0xe4] sm:$0xff]   ;;  %v11896_v50 = vld [vmem:[%s16388_s0 + $0x20] sm:$0x1] }
 0x223   :  { %v7323_v25 = vshll.u32 %v9979_v59, 16  ;;  %v7327_v61 = vshrl.u32 %v9979_v59, 16  ;;  %v7296_v13 = vor.u32 %v7295_v39, %v7292_v62  ;;  %v7306_v63 = vor.u32 %v7305_v23, %v7301_v47  ;;  %v10047_v39 = vld [vmem:[%s16388_s0 + $0x24] sm:$0xe]  ;;  %v10048_v59 = vld [vmem:[%s16388_s0 + $0x30] sm:$0xe] }
 0x224   :  { %v7309_v33 = vshll.u32 %v9977_v55, 16  ;;  %v10009_v34 = vcombine.low %v7230_v52, %v7240_v48  ;;  %v10010_v4 = vcombine.low %v7254_v15, %v7264_v19  ;;  %v7273_v35 = vrot.slane %v7272_v11, 4  ;;  %v11899_v52 = vld [vmem:[%s16388_s0 + $0x40] sm:$0xf]  ;;  %v10049_v55 = vld [vmem:[%s16388_s0 + $0x3c] sm:$0xe] }
 0x225   :  { %11004 = vmatmul.mubr.msk.bf16.gmra.mrb[48].mxu0 %vm988_vm4, %v10007_v28  ;;  %v7283_v8 = vrot.slane %v7282_v5, 4  ;;  %v7287_v37 = vrot.slane %v7285_v14, 5  ;;  %v7316_v30 = vrot.slane %v7314_v49, 4  ;;  %v7319_v21 = vrot.slane %v7317_v42, 5  ;;  %v11753_v15 = vld [vmem:[%s16388_s0 + $0xf0] sm:$0xff]  }
 0x226   :  { %11007 = vmatprep.mubr.msk.bf16.mxu0 %vm988_vm4, %v10008_v12  ;;  %v7325_v20 = vrot.slane %v7323_v25, 5  ;;  %v7329_v28 = vrot.slane %v7327_v61, 4  ;;  %v7297_v7 = vrot.slane %v7296_v13, 4  ;;  %v7307_v56 = vrot.slane %v7306_v63, 4  ;;  %v11900_v49 = vld [vmem:[%s16388_s0 + $0x2c] sm:$0x1] }
 0x227   :  { %10712 = vmatmul.mubr.msk.bf16.gmra.mrb[20].mxu1 %vm988_vm4, %v11747_v45  ;;  %v7311_v51 = vrot.slane %v7309_v33, 5  ;;  %v7278_v26 = vsel %vm12093_vm3, %v7273_v35, %v7277_v0  ;;  %v7288_v6 = vsel %vm12093_vm3, %v7283_v8, %v7287_v37  ;;  %v7320_v31 = vor.u32 %v7319_v21, %v7316_v30  ;;  %v11754_v25 = vld [vmem:[%s16388_s0 + $0xfc] sm:$0xff]   ;;  %v11901_v63 = vld [vmem:[%s16388_s0 + $0x38] sm:$0x1]  ;;  %v11902_v35 = vld [vmem:[%s16388_s0 + $0x44] sm:$0x1] }
 0x228   :  { %10715 = vmatprep.mubr.msk.bf16.mxu1 %vm988_vm4, %v11748_v32  ;;  %v7330_v54 = vor.u32 %v7329_v28, %v7325_v20  ;;  %v7333_v60 = vshll.u32 %v9980_v1, 16  ;;  %v7302_v27 = vsel %vm12093_vm3, %v7297_v7, %v7301_v47  ;;  %v8017_v53 = vrot.slane %v11895_v10, 5  ;;  %v11897_v32 = vld [vmem:[%s16388_s0 + $0x28] sm:$0xf]  ;;  %v11898_v47 = vld [vmem:[%s16388_s0 + $0x34] sm:$0xf] }
 0x229   :  { %v7312_v46 = vsel %vm12093_vm3, %v7307_v56, %v7311_v51  ;;  %v10011_v58 = vcombine.low %v7278_v26, %v7288_v6  ;;  %v7321_v43 = vrot.slane %v7320_v31, 4  ;;  %v10078_v18 = vrot.slane %v10046_v40, 9  ;;  %v10050_v37 = vld [vmem:[%s16388_s0 + $0x48] sm:$0xe]  ;;  %v10051_v21 = vld [vmem:[%s16388_s0 + $0x54] sm:$0xe] }
 0x22a   :  { %v10012_v36 = vcombine.low %v7302_v27, %v7312_v46  ;;  %v7331_v41 = vrot.slane %v7330_v54, 4  ;;  %v7335_v38 = vrot.slane %v7333_v60, 5  ;;  %v8019_v2 = vrot.slane %v8017_v53, 4  ;;  %v10052_v54 = vld [vmem:[%s16388_s0 + $0x60] sm:$0xe]  ;;  %v11755_v46 = vld [vmem:[%s16388_s0 + $0x108] sm:$0xff]  }
 0x22b   :  { %v8020_v0 = vrot.slane %v11896_v50, 5  ;;  %v7326_v17 = vsel %vm12093_vm3, %v7321_v43, %v7325_v20  ;;  %v8024_v12 = vrot.slane %v11897_v32, 5  ;;  %v8018_v9 = vsel %vm12629_vm7, %v10078_v18, %v8017_v53  ;;  %v11905_v60 = vld [vmem:[%s16388_s0 + $0x64] sm:$0xf]  ;;  %v11906_v40 = vld [vmem:[%s16388_s0 + $0x50] sm:$0x1] }
 0x22c   :  { %v7336_v45 = vsel %vm12093_vm3, %v7331_v41, %v7335_v38  ;;  %v8031_v23 = vrot.slane %v11898_v47, 5  ;;  %v8038_v48 = vrot.slane %v11899_v52, 5  ;;  %v10079_v11 = vrot.slane %v10047_v39, 9  ;;  %v11907_v41 = vld [vmem:[%s16388_s0 + $0x5c] sm:$0x1] }
 0x22d   :  { %11008 = vmatmul.mubr.msk.bf16.gmra.mrb[52].mxu0 %vm988_vm4, %v10009_v34  ;;  %v8021_v62 = vsel %vm12629_vm7, %v8019_v2, %v8020_v0  ;;  %v10013_v14 = vcombine.low %v7326_v17, %v7336_v45  ;;  %v8026_v5 = vrot.slane %v8024_v12, 4  ;;  %v8027_v42 = vrot.slane %v11900_v49, 5  ;;  %v11908_v18 = vld [vmem:[%s16388_s0 + $0x70] sm:$0xf]  ;;  %v10054_v17 = vld [vmem:[%s16388_s0 + $0x78] sm:$0xe] }
 0x22e   :  { %11011 = vmatprep.mubr.msk.bf16.mxu0 %vm988_vm4, %v10010_v4  ;;  %v10111_v19 = vcombine.low %v8018_v9, %v8021_v62  ;;  %v10080_v61 = vrot.slane %v10048_v59, 9  ;;  %v8033_v13 = vrot.slane %v8031_v23, 4  ;;  %v8034_v33 = vrot.slane %v11901_v63, 5  ;;  %v11909_v45 = vld [vmem:[%s16388_s0 + $0x7c] sm:$0xf] }
 0x22f   :  { %10716 = vmatmul.mubr.msk.bf16.gmra.mrb[24].mxu1 %vm988_vm4, %v11749_v16  ;;  %v10081_v34 = vrot.slane %v10049_v55, 9  ;;  %v8040_v4 = vrot.slane %v8038_v48, 4  ;;  %v8041_v8 = vrot.slane %v11902_v35, 5  ;;  %v11903_v16 = vld [vmem:[%s16388_s0 + $0x4c] sm:$0xf]  ;;  %v8025_v20 = vsel %vm12629_vm7, %v10079_v11, %v8024_v12 }
 0x230   :  { %10719 = vmatprep.mubr.msk.bf16.mxu1 %vm988_vm4, %v11750_v24  ;;  %v8045_v30 = vrot.slane %v11903_v16, 5  ;;  %v8028_v28 = vsel %vm12629_vm7, %v8026_v5, %v8027_v42  ;;  %v11904_v24 = vld [vmem:[%s16388_s0 + $0x58] sm:$0xf]  ;;  %v8032_v56 = vsel %vm12629_vm7, %v10080_v61, %v8031_v23  ;;  %v8035_v51 = vsel %vm12629_vm7, %v8033_v13, %v8034_v33  ;;  %v10055_v12 = vld [vmem:[%s16388_s0 + $0x84] sm:$0xe] }
 0x231   :  { %v8052_v7 = vrot.slane %v11904_v24, 5  ;;  %v10082_v1 = vrot.slane %v10050_v37, 9  ;;  %v15251_v26 = vsel %vm12629_vm7, %v10081_v34, %v8038_v48  ;;  %v15255_v6 = vsel %vm12629_vm7, %v8040_v4, %v8041_v8  ;;  %v11910_v47 = vld [vmem:[%s16388_s0 + $0x88] sm:$0xf]  ;;  %v11912_v55 = vld [vmem:[%s16388_s0 + $0x74] sm:$0x1] }
 0x232   :  { %v10083_v31 = vrot.slane %v10051_v21, 9  ;;  %v8059_v27 = vrot.slane %v11905_v60, 5  ;;  %v10112_v10 = vcombine.low %v8025_v20, %v8028_v28  ;;  %v8047_v53 = vrot.slane %v8045_v30, 4  ;;  %v11911_v52 = vld [vmem:[%s16388_s0 + $0x68] sm:$0x1] }
 0x233   :  { %v8054_v43 = vrot.slane %v8052_v7, 4  ;;  %v8055_v38 = vrot.slane %v11907_v41, 5  ;;  %v8066_v2 = vrot.slane %v11908_v18, 5  ;;  %v10114_v50 = vcombine.low %v15251_v26, %v15255_v6  ;;  %v11913_v61 = vld [vmem:[%s16388_s0 + $0x80] sm:$0x1] }
 0x234   :  { %v10084_v0 = vrot.slane %v10052_v54, 9  ;;  %v8073_v32 = vrot.slane %v11909_v45, 5  ;;  %v15294_v9 = vsel %vm12629_vm7, %v10082_v1, %v8045_v30  ;;  %v15298_v62 = vsel %vm12629_vm7, %v10083_v31, %v8052_v7  ;;  %v10056_v63 = vld [vmem:[%s16388_s0 + $0x90] sm:$0xe]  ;;  %v11914_v33 = vld [vmem:[%s16388_s0 + $0x94] sm:$0xf] }
 0x235   :  { %11012 = vmatmul.mubr.msk.bf16.gmra.mrb[56].mxu0 %vm988_vm4, %v10011_v58  ;;  %v8048_v58 = vrot.slane %v11906_v40, 5  ;;  %v8061_v39 = vrot.slane %v8059_v27, 4  ;;  %v8080_v23 = vrot.slane %v11910_v47, 5  ;;  %v8062_v48 = vrot.slane %v11911_v52, 5  ;;  %v11915_v8 = vld [vmem:[%s16388_s0 + $0x8c] sm:$0x1] }
 0x236   :  { %11015 = vmatprep.mubr.msk.bf16.mxu0 %vm988_vm4, %v10012_v36  ;;  %v10113_v36 = vcombine.low %v8032_v56, %v8035_v51  ;;  %v8068_v11 = vrot.slane %v8066_v2, 4  ;;  %v10086_v5 = vrot.slane %v10054_v17, 9  ;;  %v10087_v49 = vrot.slane %v10055_v12, 9  ;;  %v10057_v16 = vld [vmem:[%s16388_s0 + $0x9c] sm:$0xe]  ;;  %v11757_v1 = vld [vmem:[%s16388_s0 + $0x120] sm:$0xff]  }
 0x237   :  { %10720 = vmatmul.mubr.msk.bf16.gmra.mrb[28].mxu1 %vm988_vm4, %v11751_v22  ;;  %v11756_v22 = vld [vmem:[%s16388_s0 + $0x114] sm:$0xff]   ;;  %v8049_v59 = vsel %vm12629_vm7, %v8047_v53, %v8048_v58  ;;  %v15321_v42 = vsel %vm12629_vm7, %v10084_v0, %v8059_v27  ;;  %v8076_v13 = vrot.slane %v11913_v61, 5  ;;  %v8087_v34 = vrot.slane %v11914_v33, 5  ;;  %v11916_v30 = vld [vmem:[%s16388_s0 + $0xa0] sm:$0xf]  ;;  %v11758_v27 = vld [vmem:[%s16388_s0 + $0x12c] sm:$0xff]  }
 0x238   :  { %10723 = vmatprep.mubr.msk.bf16.mxu1 %vm988_vm4, %v11752_v57  ;;  %v10053_v57 = vld [vmem:[%s16388_s0 + $0x6c] sm:$0xe]  ;;  %v10115_v4 = vcombine.low %v15294_v9, %v8049_v59  ;;  %v8082_v35 = vrot.slane %v8080_v23, 4  ;;  %v8083_v37 = vrot.slane %v11915_v8, 5  ;;  %v8094_v21 = vrot.slane %v11916_v30, 5  ;;  %v11760_v8 = vld [vmem:[%s16388_s0 + $0x144] sm:$0xff]  }
 0x239   :  { %v15346_v28 = vsel %vm12629_vm7, %v8061_v39, %v8062_v48  ;;  %v10058_v7 = vld [vmem:[%s16388_s0 + $0xa8] sm:$0xe]  ;;  %v11917_v56 = vld [vmem:[%s16388_s0 + $0xac] sm:$0xf]  ;;  %v15367_v6 = vsel %vm12629_vm7, %v10086_v5, %v8073_v32  ;;  %v15371_v31 = vsel %vm12629_vm7, %v10087_v49, %v8080_v23  ;;  %v10088_v54 = vrot.slane %v10056_v63, 9  ;;  %v11759_v5 = vld [vmem:[%s16388_s0 + $0x138] sm:$0xff]  }
 0x23a   :  { %v8101_v51 = vrot.slane %v11917_v56, 5  ;;  %v9520_v60 = vld [vmem:[%s16388_s0 + $0xfc] sm:$0xf]  ;;  %v11918_v53 = vld [vmem:[%s16388_s0 + $0x98] sm:$0x1]  ;;  %v10089_v58 = vrot.slane %v10057_v16, 9  ;;  %v10117_v45 = vcombine.low %v15321_v42, %v15346_v28 }
 0x23b   :  { %v8090_v40 = vrot.slane %v11918_v53, 5  ;;  %v11920_v18 = vld [vmem:[%s16388_s0 + $0xb0] sm:$0x1]  ;;  %v4007_v0 = vshrl.u32 %v9520_v60, 16  ;;  %v4010_v17 = vshll.u32 %v9520_v60, 16 }
 0x23c   :  { %v15418_v47 = vsel %vm12629_vm7, %v10089_v58, %v8094_v21  ;;  %v9526_v23 = vld [vmem:[%s16388_s0 + $0x114] sm:$0xf]  ;;  %v11921_v48 = vld [vmem:[%s16388_s0 + $0xb8] sm:$0xf]  ;;  %v11924_v30 = vld [vmem:[%s16388_s0 + $0xbc] sm:$0x1] }
 0x23d   :  { %11016 = vmatmul.mubr.msk.bf16.gmra.mrb[60].mxu0 %vm988_vm4, %v10013_v14  ;;  %v10085_v14 = vrot.slane %v10053_v57, 9  ;;  %v8103_v57 = vrot.slane %v8101_v51, 4  ;;  %v10059_v52 = vld [vmem:[%s16388_s0 + $0xb4] sm:$0xe]  ;;  %v4012_v61 = vrot.slane %v4010_v17, 5  ;;  %v4055_v63 = vshrl.u32 %v9526_v23, 16 }
 0x23e   :  { %11021 = vmatprep.mubr.msk.bf16.mxu0 %vm988_vm4, %v10111_v19  ;;  %v15316_v19 = vsel %vm12629_vm7, %v8054_v43, %v8055_v38  ;;  %v11919_v43 = vld [vmem:[%s16388_s0 + $0xa4] sm:$0x1]  ;;  %v10090_v38 = vrot.slane %v10058_v7, 9  ;;  %v4058_v33 = vshll.u32 %v9526_v23, 16  ;;  %v10091_v16 = vrot.slane %v10059_v52, 9 }
 0x23f   :  { %10724 = vmatmul.mubr.msk.bf16.gmra.mrb[32].mxu1 %vm988_vm4, %v11753_v15  ;;  %v8069_v15 = vrot.slane %v11912_v55, 5  ;;  %v10116_v20 = vcombine.low %v15298_v62, %v15316_v19  ;;  %v15350_v24 = vsel %vm12629_vm7, %v10085_v14, %v8066_v2  ;;  %v8097_v41 = vrot.slane %v11919_v43, 5  ;;  %v11922_v55 = vld [vmem:[%s16388_s0 + $0x100] sm:$0xf]  ;;  %v11925_v28 = vld [vmem:[%s16388_s0 + $0xc4] sm:$0xf] }
 0x240   :  { %10727 = vmatprep.mubr.msk.bf16.mxu1 %vm988_vm4, %v11754_v25  ;;  %v8075_v25 = vrot.slane %v8073_v32, 4  ;;  %v8104_v2 = vrot.slane %v11920_v18, 5  ;;  %v8108_v14 = vrot.slane %v11921_v48, 5  ;;  %v15441_v49 = vsel %vm12629_vm7, %v10090_v38, %v8101_v51  ;;  %v9529_v60 = vld [vmem:[%s16388_s0 + $0x120] sm:$0xf] }
 0x241   :  { %v15363_v26 = vsel %vm12629_vm7, %v8068_v11, %v8069_v15  ;;  %v4016_v15 = vshll.u32 %v11922_v55, 16  ;;  %v4020_v11 = vshrl.u32 %v11922_v55, 16  ;;  %v8115_v7 = vrot.slane %v11925_v28, 5  ;;  %v11926_v53 = vld [vmem:[%s16388_s0 + $0x104] sm:$0x1] }
 0x242   :  { %v10118_v32 = vcombine.low %v15350_v24, %v15363_v26  ;;  %v15445_v42 = vsel %vm12629_vm7, %v8103_v57, %v8104_v2  ;;  %v8110_v51 = vrot.slane %v8108_v14, 4  ;;  %v4060_v43 = vrot.slane %v4058_v33, 5  ;;  %v10061_v48 = vld [vmem:[%s16388_s0 + $0xcc] sm:$0xe]  ;;  %v10062_v33 = vld [vmem:[%s16388_s0 + $0xf0] sm:$0xe] }
 0x243   :  { %v8117_v19 = vrot.slane %v8115_v7, 4  ;;  %v4079_v57 = vshrl.u32 %v9529_v60, 16  ;;  %v4082_v18 = vshll.u32 %v9529_v60, 16  ;;  %v15490_v2 = vsel %vm12629_vm7, %v10091_v16, %v8108_v14  ;;  %v11929_v14 = vld [vmem:[%s16388_s0 + $0x11c] sm:$0x1] }
 0x244   :  { %v4074_v55 = vshll.u32 %v11929_v14, 16  ;;  %v11932_v60 = vld [vmem:[%s16388_s0 + $0xd4] sm:$0x1] }
 0x245   :  { %11022 = vmatmul.mubr.msk.bf16.vlgmr.msra.gmra.mrb[0].mxu0 %vm988_vm4, %v10112_v10  ;;  %v8089_v10 = vrot.slane %v8087_v34, 4 }
 0x246   :  { %11025 = vmatprep.mubr.msk.bf16.mxu0 %vm988_vm4, %v10113_v36  ;;  %v8096_v36 = vrot.slane %v8094_v21, 4  ;;  %v8111_v21 = vrot.slane %v11924_v30, 5  ;;  %v4081_v30 = vrot.slane %v4079_v57, 4 }
 0x247   :  { %10728 = vmatmul.mubr.msk.bf16.gmra.mrb[36].mxu1 %vm988_vm4, %v11755_v46  ;;  %v15381_v46 = vsel %vm12629_vm7, %v8075_v25, %v8076_v13  ;;  %v15414_v39 = vsel %vm12629_vm7, %v8089_v10, %v8090_v40  ;;  %v4009_v25 = vrot.slane %v4007_v0, 4  ;;  %v10060_v13 = vld [vmem:[%s16388_s0 + $0xc0] sm:$0xe]  ;;  %v4026_v40 = vshll.u32 %v11926_v53, 16 }
 0x248   :  { %10731 = vmatprep.mubr.msk.bf16.mxu1 %vm988_vm4, %v11756_v22  ;;  %v15388_v22 = vsel %vm12629_vm7, %v8082_v35, %v8083_v37  ;;  %v10119_v12 = vcombine.low %v15367_v6, %v15381_v46  ;;  %v15425_v59 = vsel %vm12629_vm7, %v8096_v36, %v8097_v41  ;;  %v10092_v58 = vrot.slane %v10060_v13, 9 }
 0x249   :  { %v10120_v9 = vcombine.low %v15371_v31, %v15388_v22  ;;  %v10122_v56 = vcombine.low %v15418_v47, %v15425_v59  ;;  %v4013_v10 = vor.u32 %v4012_v61, %v4009_v25  ;;  %v4057_v36 = vrot.slane %v4055_v63, 4  ;;  %v11761_v25 = vld [vmem:[%s16388_s0 + $0x150] sm:$0xff]   ;;  %v11938_v31 = vld [vmem:[%s16388_s0 + $0x13c] sm:$0xf] }
 0x24a   :  { %v15494_v0 = vsel %vm12629_vm7, %v8110_v51, %v8111_v21  ;;  %v15500_v52 = vrot.slane %v4026_v40, 5  ;;  %v4084_v21 = vrot.slane %v4082_v18, 5  ;;  %v10093_v51 = vrot.slane %v10061_v48, 9  ;;  %v10063_v18 = vld [vmem:[%s16388_s0 + $0xfc] sm:$0xe] }
 0x24b   :  { %v15514_v61 = vrot.slane %v4013_v10, 4  ;;  %v4061_v13 = vor.u32 %v4060_v43, %v4057_v36  ;;  %v8125_v10 = vrot.slane %v11932_v60, 5  ;;  %v10094_v53 = vrot.slane %v10062_v33, 9  ;;  %v9532_v36 = vld [vmem:[%s16388_s0 + $0x12c] sm:$0xf] }
 0x24c   :  { %v4085_v46 = vor.u32 %v4084_v21, %v4081_v30  ;;  %v10095_v33 = vrot.slane %v10063_v18, 9  ;;  %v11937_v21 = vld [vmem:[%s16388_s0 + $0x130] sm:$0xf]  ;;  %v4136_v22 = vshll.u32 %v11938_v31, 16  ;;  %v11765_v18 = vld [vmem:[%s16388_s0 + $0x180] sm:$0xff]  }
 0x24d   :  { %11026 = vmatmul.mubr.msk.bf16.gmra.mrb[4].mxu0 %vm988_vm4, %v10114_v50  ;;  %v15405_v50 = vsel %vm12629_vm7, %v10088_v54, %v8087_v34  ;;  %v11923_v34 = vld [vmem:[%s16388_s0 + $0x118] sm:$0xf]  ;;  %v4022_v54 = vrot.slane %v4020_v11, 4  ;;  %v4062_v43 = vrot.slane %v4061_v13, 4  ;;  %v10065_v59 = vld [vmem:[%s16388_s0 + $0x114] sm:$0xe] }
 0x24e   :  { %11029 = vmatprep.mubr.msk.bf16.mxu0 %vm988_vm4, %v10115_v4  ;;  %v4064_v4 = vshll.u32 %v11923_v34, 16  ;;  %v4068_v35 = vshrl.u32 %v11923_v34, 16  ;;  %v10121_v37 = vcombine.low %v15405_v50, %v15414_v39  ;;  %v11931_v34 = vld [vmem:[%s16388_s0 + $0xf4] sm:$0xf] }
 0x24f   :  { %10732 = vmatmul.mubr.msk.bf16.gmra.mrb[40].mxu1 %vm988_vm4, %v11757_v1  ;;  %v15466_v1 = vrot.slane %v4016_v15, 5  ;;  %v11930_v15 = vld [vmem:[%s16388_s0 + $0x124] sm:$0xf]  ;;  %v11764_v13 = vld [vmem:[%s16388_s0 + $0x174] sm:$0xff]  }
 0x250   :  { %10735 = vmatprep.mubr.msk.bf16.mxu1 %vm988_vm4, %v11758_v27  ;;  %v10123_v27 = vcombine.low %v15441_v49, %v15445_v42  ;;  %v15482_v41 = vrot.slane %v4064_v4, 5  ;;  %v4070_v62 = vrot.slane %v4068_v35, 4  ;;  %v4088_v11 = vshll.u32 %v11930_v15, 16  ;;  %v11762_v35 = vld [vmem:[%s16388_s0 + $0x15c] sm:$0xff]  }
 0x251   :  { %v4023_v17 = vor.u32 %v4022_v54, %v15466_v1  ;;  %v8129_v4 = vrot.slane %v11931_v34, 5  ;;  %v4019_v6 = vsel %vm12093_vm3, %v15514_v61, %v15466_v1  ;;  %v11935_v1 = vld [vmem:[%s16388_s0 + $0x100] sm:$0xf]  ;;  %v9535_v61 = vld [vmem:[%s16388_s0 + $0x138] sm:$0xf] }
 0x252   :  { %v4071_v63 = vor.u32 %v4070_v62, %v15482_v41  ;;  %v15541_v40 = vrot.slane %v4088_v11, 5  ;;  %v4067_v11 = vsel %vm12093_vm3, %v4062_v43, %v15482_v41  ;;  %v4086_v41 = vrot.slane %v4085_v46, 4  ;;  %v11936_v34 = vld [vmem:[%s16388_s0 + $0x104] sm:$0x1] }
 0x253   :  { %v4024_v28 = vrot.slane %v4023_v17, 4  ;;  %v8131_v26 = vrot.slane %v8129_v4, 4  ;;  %v8136_v17 = vrot.slane %v11935_v1, 5  ;;  %v9538_v43 = vld [vmem:[%s16388_s0 + $0x144] sm:$0xf]  ;;  %v15660_v1 = vrot.slane %v4136_v22, 5 }
 0x254   :  { %v4072_v24 = vrot.slane %v4071_v63, 4  ;;  %v4091_v39 = vsel %vm12093_vm3, %v4086_v41, %v15541_v40  ;;  %v11945_v22 = vld [vmem:[%s16388_s0 + $0x124] sm:$0xf] }
 0x255   :  { %11030 = vmatmul.mubr.msk.bf16.gmra.mrb[8].mxu0 %vm988_vm4, %v10116_v20  ;;  %v11927_v20 = vld [vmem:[%s16388_s0 + $0xc8] sm:$0x1] }
 0x256   :  { %11033 = vmatprep.mubr.msk.bf16.mxu0 %vm988_vm4, %v10117_v45  ;;  %v8118_v38 = vrot.slane %v11927_v20, 5  ;;  %v11928_v45 = vld [vmem:[%s16388_s0 + $0xd0] sm:$0xf] }
 0x257   :  { %10736 = vmatmul.mubr.msk.bf16.gmra.mrb[44].mxu1 %vm988_vm4, %v11759_v5  ;;  %v8122_v23 = vrot.slane %v11928_v45, 5  ;;  %v4092_v5 = vshrl.u32 %v11930_v15, 16  ;;  %v4103_v45 = vshrl.u32 %v9532_v36, 16  ;;  %v11763_v15 = vld [vmem:[%s16388_s0 + $0x168] sm:$0xff]  }
 0x258   :  { %10739 = vmatprep.mubr.msk.bf16.mxu1 %vm988_vm4, %v11760_v8  ;;  %v15528_v8 = vsel %vm12629_vm7, %v10092_v58, %v8115_v7  ;;  %v15532_v16 = vsel %vm12629_vm7, %v8117_v19, %v8118_v38  ;;  %v4076_v7 = vrot.slane %v4074_v55, 5  ;;  %v10124_v19 = vcombine.low %v15490_v2, %v15494_v0 }
 0x259   :  { %v8124_v54 = vrot.slane %v8122_v23, 4  ;;  %v4094_v58 = vrot.slane %v4092_v5, 4  ;;  %v4029_v38 = vsel %vm12093_vm3, %v4024_v28, %v15500_v52  ;;  %v10125_v57 = vcombine.low %v15528_v8, %v15532_v16 }
 0x25a   :  { %v15577_v48 = vsel %vm12629_vm7, %v10093_v51, %v8122_v23  ;;  %v4106_v55 = vshll.u32 %v9532_v36, 16  ;;  %v4077_v5 = vsel %vm12093_vm3, %v4072_v24, %v4076_v7  ;;  %v15594_v23 = vsel %vm12629_vm7, %v10094_v53, %v8129_v4 }
 0x25b   :  { %v15581_v52 = vsel %vm12629_vm7, %v8124_v54, %v8125_v10  ;;  %v4095_v14 = vor.u32 %v4094_v58, %v15541_v40  ;;  %v8139_v4 = vrot.slane %v11936_v34, 5  ;;  %v4105_v30 = vrot.slane %v4103_v45, 4 }
 0x25c   :  { %v4112_v28 = vshll.u32 %v11937_v21, 16  ;;  %v4116_v51 = vshrl.u32 %v11937_v21, 16  ;;  %v4108_v60 = vrot.slane %v4106_v55, 5  ;;  %v4127_v10 = vshrl.u32 %v9535_v61, 16  ;;  %v11766_v55 = vld [vmem:[%s16388_s0 + $0x18c] sm:$0xff]  }
 0x25d   :  { %11034 = vmatmul.mubr.msk.bf16.gmra.mrb[12].mxu0 %vm988_vm4, %v10118_v32  ;;  %v11933_v32 = vld [vmem:[%s16388_s0 + $0xf8] sm:$0x1]  ;;  %v4096_v54 = vrot.slane %v4095_v14, 4  ;;  %v4130_v7 = vshll.u32 %v9535_v61, 16  ;;  %v15621_v53 = vcombine.low %v4019_v6, %v4029_v38  ;;  %v10126_v58 = vcombine.low %v15577_v48, %v15581_v52  ;;  %v10064_v6 = vld [vmem:[%s16388_s0 + $0x108] sm:$0xe] }
 0x25e   :  { %11037 = vmatprep.mubr.msk.bf16.mxu0 %vm988_vm4, %v10119_v12  ;;  %v8132_v62 = vrot.slane %v11933_v32, 5  ;;  %v11934_v12 = vld [vmem:[%s16388_s0 + $0x128] sm:$0x1]  ;;  %v15629_v36 = vcombine.low %v4067_v11, %v4077_v5  ;;  %v4118_v32 = vrot.slane %v4116_v51, 4  ;;  %v4151_v45 = vshrl.u32 %v9538_v43, 16 }
 0x25f   :  { %10740 = vmatmul.mubr.msk.bf16.gmra.mrb[48].mxu1 %vm988_vm4, %v11761_v25  ;;  %v4098_v20 = vshll.u32 %v11934_v12, 16  ;;  %v4109_v12 = vor.u32 %v4108_v60, %v4105_v30  ;;  %v4132_v38 = vrot.slane %v4130_v7, 5  ;;  %v4154_v14 = vshll.u32 %v9538_v43, 16  ;;  %v11940_v5 = vld [vmem:[%s16388_s0 + $0x148] sm:$0xf] }
 0x260   :  { %10743 = vmatprep.mubr.msk.bf16.mxu1 %vm988_vm4, %v11762_v35  ;;  %v15598_v25 = vsel %vm12629_vm7, %v8131_v26, %v8132_v62  ;;  %v8138_v35 = vrot.slane %v8136_v17, 4  ;;  %v15647_v26 = vrot.slane %v4112_v28, 5  ;;  %v11939_v62 = vld [vmem:[%s16388_s0 + $0x134] sm:$0x1]  ;;  %v10096_v11 = vrot.slane %v10064_v6, 9 }
 0x261   :  { %v4100_v63 = vrot.slane %v4098_v20, 5  ;;  %v10127_v50 = vcombine.low %v15594_v23, %v15598_v25  ;;  %v4122_v40 = vshll.u32 %v11939_v62, 16  ;;  %v4129_v20 = vrot.slane %v4127_v10, 4  ;;  %v11943_v51 = vld [vmem:[%s16388_s0 + $0x140] sm:$0x1] }
 0x262   :  { %v15645_v24 = vsel %vm12629_vm7, %v8138_v35, %v8139_v4  ;;  %v4160_v61 = vshll.u32 %v11940_v5, 16  ;;  %v4119_v41 = vor.u32 %v4118_v32, %v15647_v26  ;;  %v11942_v4 = vld [vmem:[%s16388_s0 + $0x110] sm:$0x1]  ;;  %v15685_v21 = vrot.slane %v4109_v12, 4  ;;  %v10066_v32 = vld [vmem:[%s16388_s0 + $0x120] sm:$0xe] }
 0x263   :  { %v4101_v46 = vsel %vm12093_vm3, %v4096_v54, %v4100_v63  ;;  %v15671_v63 = vrot.slane %v4122_v40, 5  ;;  %v8146_v35 = vrot.slane %v11942_v4, 5  ;;  %v4133_v28 = vor.u32 %v4132_v38, %v4129_v20  ;;  %v9541_v60 = vld [vmem:[%s16388_s0 + $0x150] sm:$0xf]  ;;  %v11946_v20 = vld [vmem:[%s16388_s0 + $0x11c] sm:$0x1] }
 0x264   :  { %v15683_v30 = vcombine.low %v4091_v39, %v4101_v46  ;;  %v4146_v54 = vshll.u32 %v11943_v51, 16  ;;  %v4153_v7 = vrot.slane %v4151_v45, 4  ;;  %v15710_v42 = vrot.slane %v4160_v61, 5  ;;  %v10068_v48 = vld [vmem:[%s16388_s0 + $0x138] sm:$0xe] }
 0x265   :  { %11038 = vmatmul.mubr.msk.bf16.gmra.mrb[16].mxu0 %vm988_vm4, %v10120_v9  ;;  %v4140_v9 = vshrl.u32 %v11938_v31, 16  ;;  %v4156_v31 = vrot.slane %v4154_v14, 5  ;;  %v4120_v39 = vrot.slane %v4119_v41, 4  ;;  %v4175_v62 = vshrl.u32 %v9541_v60, 16  ;;  %v11948_v41 = vld [vmem:[%s16388_s0 + $0x128] sm:$0x1] }
 0x266   :  { %11041 = vmatprep.mubr.msk.bf16.mxu0 %vm988_vm4, %v10121_v37  ;;  %v15638_v37 = vsel %vm12629_vm7, %v10095_v33, %v8136_v17  ;;  %v11941_v33 = vld [vmem:[%s16388_s0 + $0x10c] sm:$0xf]  ;;  %v4178_v40 = vshll.u32 %v9541_v60, 16  ;;  %v4134_v6 = vrot.slane %v4133_v28, 4  ;;  %v4148_v46 = vrot.slane %v4146_v54, 5 }
 0x267   :  { %10744 = vmatmul.mubr.msk.bf16.gmra.mrb[52].mxu1 %vm988_vm4, %v11763_v15  ;;  %v4142_v17 = vrot.slane %v4140_v9, 4  ;;  %v10128_v15 = vcombine.low %v15638_v37, %v15645_v24  ;;  %v8143_v34 = vrot.slane %v11941_v33, 5  ;;  %v8157_v9 = vrot.slane %v11945_v22, 5  ;;  %v11949_v28 = vld [vmem:[%s16388_s0 + $0x154] sm:$0xf] }
 0x268   :  { %10747 = vmatprep.mubr.msk.bf16.mxu1 %vm988_vm4, %v11764_v13  ;;  %v4164_v13 = vshrl.u32 %v11940_v5, 16  ;;  %v10097_v12 = vrot.slane %v10065_v59, 9  ;;  %v8153_v38 = vrot.slane %v11946_v20, 5  ;;  %v4157_v14 = vor.u32 %v4156_v31, %v4153_v7  ;;  %v10067_v7 = vld [vmem:[%s16388_s0 + $0x12c] sm:$0xe] }
 0x269   :  { %v4143_v47 = vor.u32 %v4142_v17, %v15660_v1  ;;  %v15708_v49 = vsel %vm12629_vm7, %v10096_v11, %v8143_v34  ;;  %v8145_v43 = vrot.slane %v8143_v34, 4  ;;  %v10098_v61 = vrot.slane %v10066_v32, 9  ;;  %v11953_v52 = vld [vmem:[%s16388_s0 + $0x13c] sm:$0xf]  ;;  %v11954_v23 = vld [vmem:[%s16388_s0 + $0x134] sm:$0x1] }
 0x26a   :  { %v8160_v33 = vrot.slane %v11948_v41, 5  ;;  %v4177_v34 = vrot.slane %v4175_v62, 4  ;;  %v4180_v4 = vrot.slane %v4178_v40, 5  ;;  %v4184_v51 = vshll.u32 %v11949_v28, 16 }
 0x26b   :  { %v4144_v17 = vrot.slane %v4143_v47, 4  ;;  %v4188_v54 = vshrl.u32 %v11949_v28, 16  ;;  %v4115_v60 = vsel %vm12093_vm3, %v15685_v21, %v15647_v26  ;;  %v4125_v47 = vsel %vm12093_vm3, %v4120_v39, %v15671_v63  ;;  %v9544_v26 = vld [vmem:[%s16388_s0 + $0x15c] sm:$0xf] }
 0x26c   :  { %v15747_v59 = vsel %vm12629_vm7, %v8145_v43, %v8146_v35  ;;  %v4139_v2 = vsel %vm12093_vm3, %v4134_v6, %v15660_v1  ;;  %v4158_v8 = vrot.slane %v4157_v14, 4  ;;  %v15774_v1 = vsel %vm12629_vm7, %v10098_v61, %v8157_v9 }
 0x26d   :  { %11042 = vmatmul.mubr.msk.bf16.gmra.mrb[20].mxu0 %vm988_vm4, %v10122_v56  ;;  %v11944_v56 = vld [vmem:[%s16388_s0 + $0x118] sm:$0xf]  ;;  %v4149_v0 = vsel %vm12093_vm3, %v4144_v17, %v4148_v46  ;;  %v4181_v35 = vor.u32 %v4180_v4, %v4177_v34  ;;  %v15780_v21 = vrot.slane %v4184_v51, 5  ;;  %v4202_v31 = vshll.u32 %v9544_v26, 16 }
 0x26e   :  { %11045 = vmatprep.mubr.msk.bf16.mxu0 %vm988_vm4, %v10123_v27  ;;  %v8150_v10 = vrot.slane %v11944_v56, 5  ;;  %v4166_v27 = vrot.slane %v4164_v13, 4  ;;  %v8159_v13 = vrot.slane %v8157_v9, 4  ;;  %v15788_v39 = vcombine.low %v4115_v60, %v4125_v47  ;;  %v9550_v60 = vld [vmem:[%s16388_s0 + $0x174] sm:$0xf] }
 0x26f   :  { %10748 = vmatmul.mubr.msk.bf16.gmra.mrb[56].mxu1 %vm988_vm4, %v11765_v18  ;;  %v11767_v18 = vld [vmem:[%s16388_s0 + $0x198] sm:$0xff]   ;;  %v10129_v43 = vcombine.low %v15708_v49, %v15747_v59  ;;  %v15792_v32 = vcombine.low %v4139_v2, %v4149_v0  ;;  %v4163_v40 = vsel %vm12093_vm3, %v4158_v8, %v15710_v42  ;;  %v8167_v25 = vrot.slane %v11954_v23, 5  ;;  %v11956_v0 = vld [vmem:[%s16388_s0 + $0x164] sm:$0x1]  ;;  %v11960_v49 = vld [vmem:[%s16388_s0 + $0x148] sm:$0xf] }
 0x270   :  { %10751 = vmatprep.mubr.msk.bf16.mxu1 %vm988_vm4, %v11766_v55  ;;  %v8152_v45 = vrot.slane %v8150_v10, 4  ;;  %v11947_v55 = vld [vmem:[%s16388_s0 + $0x14c] sm:$0x1]  ;;  %v4167_v5 = vor.u32 %v4166_v27, %v15710_v42  ;;  %v15751_v56 = vsel %vm12629_vm7, %v10097_v12, %v8150_v10  ;;  %v15778_v63 = vsel %vm12629_vm7, %v8159_v13, %v8160_v33  ;;  %v11950_v27 = vld [vmem:[%s16388_s0 + $0x160] sm:$0xf] }
 0x271   :  { %v4170_v11 = vshll.u32 %v11947_v55, 16  ;;  %v4190_v10 = vrot.slane %v4188_v54, 4  ;;  %v4208_v22 = vshll.u32 %v11950_v27, 16  ;;  %v4212_v9 = vshrl.u32 %v11950_v27, 16  ;;  %v11951_v12 = vld [vmem:[%s16388_s0 + $0x158] sm:$0x1] }
 0x272   :  { %v4168_v16 = vrot.slane %v4167_v5, 4  ;;  %v10131_v46 = vcombine.low %v15774_v1, %v15778_v63  ;;  %v4194_v20 = vshll.u32 %v11951_v12, 16  ;;  %v10099_v42 = vrot.slane %v10067_v7, 9  ;;  %v9553_v23 = vld [vmem:[%s16388_s0 + $0x180] sm:$0xf] }
 0x273   :  { %v4191_v17 = vor.u32 %v4190_v10, %v15780_v21  ;;  %v15819_v5 = vrot.slane %v4208_v22, 5  ;;  %v4214_v61 = vrot.slane %v4212_v9, 4  ;;  %v10100_v8 = vrot.slane %v10068_v48, 9 }
 0x274   :  { %v4247_v27 = vshrl.u32 %v9550_v60, 16  ;;  %v4250_v22 = vshll.u32 %v9550_v60, 16  ;;  %v8178_v59 = vrot.slane %v11960_v49, 5 }
 0x275   :  { %11046 = vmatmul.mubr.msk.bf16.gmra.mrb[24].mxu0 %vm988_vm4, %v10124_v19  ;;  %v15765_v19 = vsel %vm12629_vm7, %v8152_v45, %v8153_v38  ;;  %v9547_v38 = vld [vmem:[%s16388_s0 + $0x168] sm:$0xf]  ;;  %v11952_v45 = vld [vmem:[%s16388_s0 + $0x130] sm:$0xf]  ;;  %v4192_v51 = vrot.slane %v4191_v17, 4  ;;  %v4215_v2 = vor.u32 %v4214_v61, %v15819_v5 }
 0x276   :  { %11049 = vmatprep.mubr.msk.bf16.mxu0 %vm988_vm4, %v10125_v57  ;;  %v4172_v57 = vrot.slane %v4170_v11, 5  ;;  %v10130_v62 = vcombine.low %v15751_v56, %v15765_v19  ;;  %v8164_v14 = vrot.slane %v11952_v45, 5  ;;  %v4204_v11 = vrot.slane %v4202_v31, 5  ;;  %v10069_v31 = vld [vmem:[%s16388_s0 + $0x144] sm:$0xe] }
 0x277   :  { %10752 = vmatmul.mubr.msk.bf16.gmra.mrb[60].mxu1 %vm988_vm4, %v11767_v18  ;;  %v15809_v18 = vrot.slane %v4181_v35, 4  ;;  %v4223_v41 = vshrl.u32 %v9547_v38, 16  ;;  %v4226_v33 = vshll.u32 %v9547_v38, 16  ;;  %v8180_v60 = vrot.slane %v8178_v59, 4  ;;  %v11965_v56 = vld [vmem:[%s16388_s0 + $0x158] sm:$0x1] }
 0x278   :  { %10793 = vmatprep.mubr.msk.bf16.mxu1 %vm988_vm4, %v15621_v53  ;;  %v4199_v53 = vshrl.u32 %v9544_v26, 16  ;;  %v4173_v6 = vsel %vm12093_vm3, %v4168_v16, %v4172_v57  ;;  %v8166_v54 = vrot.slane %v8164_v14, 4  ;;  %v4218_v26 = vshll.u32 %v11956_v0, 16  ;;  %v11957_v57 = vld [vmem:[%s16388_s0 + $0x140] sm:$0x1] }
 0x279   :  { %v15827_v13 = vcombine.low %v4163_v40, %v4173_v6  ;;  %v4187_v28 = vsel %vm12093_vm3, %v15809_v18, %v15780_v21  ;;  %v8174_v35 = vrot.slane %v11957_v57, 5  ;;  %v4225_v21 = vrot.slane %v4223_v41, 4  ;;  %v11958_v6 = vld [vmem:[%s16388_s0 + $0x178] sm:$0xf] }
 0x27a   :  { %v4201_v55 = vrot.slane %v4199_v53, 4  ;;  %v4228_v10 = vrot.slane %v4226_v33, 5  ;;  %v15870_v40 = vsel %vm12629_vm7, %v8166_v54, %v8167_v25  ;;  %v4256_v12 = vshll.u32 %v11958_v6, 16 }
 0x27b   :  { %v15881_v18 = vrot.slane %v4215_v2, 4  ;;  %v15883_v17 = vrot.slane %v4218_v26, 5  ;;  %v11963_v2 = vld [vmem:[%s16388_s0 + $0x17c] sm:$0x1]  ;;  %v4274_v57 = vshll.u32 %v9553_v23, 16  ;;  %v8188_v19 = vrot.slane %v11965_v56, 5 }
 0x27c   :  { %v4205_v47 = vor.u32 %v4204_v11, %v4201_v55  ;;  %v4252_v55 = vrot.slane %v4250_v22, 5  ;;  %v15912_v48 = vrot.slane %v4256_v12, 5  ;;  %v4266_v0 = vshll.u32 %v11963_v2, 16 }
 0x27d   :  { %11050 = vmatmul.mubr.msk.bf16.gmra.mrb[28].mxu0 %vm988_vm4, %v10126_v58  ;;  %v8171_v58 = vrot.slane %v11953_v52, 5 }
 0x27e   :  { %11053 = vmatprep.mubr.msk.bf16.mxu0 %vm988_vm4, %v10127_v50  ;;  %v11955_v50 = vld [vmem:[%s16388_s0 + $0x16c] sm:$0xf]  ;;  %v15879_v38 = vrot.slane %v4205_v47, 4 }
 0x27f   :  { %10794 = vmatmul.mubr.msk.bf16.vlgmr.msra.gmra.mrb[36].mxu1 %vm988_vm4, %v14946_v44  ;;  %v4196_v44 = vrot.slane %v4194_v20, 5  ;;  %v4232_v34 = vshll.u32 %v11955_v50, 16  ;;  %v4236_v4 = vshrl.u32 %v11955_v50, 16  ;;  %v8173_v16 = vrot.slane %v8171_v58, 4  ;;  %v11961_v50 = vld [vmem:[%s16388_s0 + $0x14c] sm:$0x1] }
 0x280   :  { %10797 = vmatprep.mubr.msk.bf16.mxu1 %vm988_vm4, %v15629_v36  ;;  %v15849_v36 = vsel %vm12629_vm7, %v10099_v42, %v8164_v14  ;;  %v4260_v20 = vshrl.u32 %v11958_v6, 16  ;;  %v11959_v42 = vld [vmem:[%s16388_s0 + $0x170] sm:$0x1]  ;;  %v15896_v37 = vsel %vm12629_vm7, %v10100_v8, %v8171_v58  ;;  %v10101_v14 = vrot.slane %v10069_v31, 9 }
 0x281   :  { %v15861_v7 = vrot.slane %v4232_v34, 5  ;;  %v4238_v53 = vrot.slane %v4236_v4, 4  ;;  %v4197_v9 = vsel %vm12093_vm3, %v4192_v51, %v4196_v44  ;;  %v4242_v45 = vshll.u32 %v11959_v42, 16  ;;  %v10070_v44 = vld [vmem:[%s16388_s0 + $0x150] sm:$0xe] }
 0x282   :  { %v15900_v24 = vsel %vm12629_vm7, %v8173_v16, %v8174_v35  ;;  %v15908_v11 = vcombine.low %v4187_v28, %v4197_v9  ;;  %v10132_v61 = vcombine.low %v15849_v36, %v15870_v40  ;;  %v4262_v52 = vrot.slane %v4260_v20, 4  ;;  %v11962_v4 = vld [vmem:[%s16388_s0 + $0x154] sm:$0xf]  ;;  %v9556_v51 = vld [vmem:[%s16388_s0 + $0x18c] sm:$0xf] }
 0x283   :  { %v4221_v58 = vsel %vm12093_vm3, %v15881_v18, %v15883_v17  ;;  %v10133_v41 = vcombine.low %v15896_v37, %v15900_v24  ;;  %v4244_v33 = vrot.slane %v4242_v45, 5  ;;  %v8181_v34 = vrot.slane %v11961_v50, 5  ;;  %v11964_v35 = vld [vmem:[%s16388_s0 + $0x184] sm:$0xf] }
 0x284   :  { %v8185_v28 = vrot.slane %v11962_v4, 5  ;;  %v4263_v26 = vor.u32 %v4262_v52, %v15912_v48  ;;  %v10102_v8 = vrot.slane %v10070_v44, 9  ;;  %v4271_v16 = vshrl.u32 %v9553_v23, 16  ;;  %v9559_v44 = vld [vmem:[%s16388_s0 + $0x198] sm:$0xf] }
 0x285   :  { %11054 = vmatmul.mubr.msk.bf16.gmra.mrb[32].mxu0 %vm988_vm4, %v10128_v15  ;;  %v4229_v15 = vor.u32 %v4228_v10, %v4225_v21  ;;  %v4280_v21 = vshll.u32 %v11964_v35, 16  ;;  %v4284_v10 = vshrl.u32 %v11964_v35, 16  ;;  %v4298_v31 = vshll.u32 %v9556_v51, 16  ;;  %v10072_v4 = vld [vmem:[%s16388_s0 + $0x168] sm:$0xe] }
 0x286   :  { %11057 = vmatprep.mubr.msk.bf16.mxu0 %vm988_vm4, %v10129_v43  ;;  %v4249_v43 = vrot.slane %v4247_v27, 4  ;;  %v8187_v27 = vrot.slane %v8185_v28, 4  ;;  %v4264_v12 = vrot.slane %v4263_v26, 4  ;;  %v4273_v20 = vrot.slane %v4271_v16, 4 }
 0x287   :  { %10798 = vmatmul.mubr.msk.bf16.gmra.mrb[40].mxu1 %vm988_vm4, %v15683_v30  ;;  %v4239_v30 = vor.u32 %v4238_v53, %v15861_v7  ;;  %v4230_v25 = vrot.slane %v4229_v15, 4  ;;  %v4295_v53 = vshrl.u32 %v9556_v51, 16  ;;  %v15977_v18 = vrot.slane %v4280_v21, 5 }
 0x288   :  { %10801 = vmatprep.mubr.msk.bf16.mxu1 %vm988_vm4, %v15788_v39  ;;  %v4211_v39 = vsel %vm12093_vm3, %v15879_v38, %v15819_v5  ;;  %v15932_v5 = vsel %vm12629_vm7, %v10101_v14, %v8178_v59  ;;  %v4253_v47 = vor.u32 %v4252_v55, %v4249_v43  ;;  %v4276_v38 = vrot.slane %v4274_v57, 5  ;;  %v10071_v43 = vld [vmem:[%s16388_s0 + $0x15c] sm:$0xe] }
 0x289   :  { %v4240_v54 = vrot.slane %v4239_v30, 4  ;;  %v4235_v1 = vsel %vm12093_vm3, %v4230_v25, %v15861_v7  ;;  %v4286_v17 = vrot.slane %v4284_v10, 4  ;;  %v4300_v42 = vrot.slane %v4298_v31, 5  ;;  %v11968_v25 = vld [vmem:[%s16388_s0 + $0x160] sm:$0xf] }
 0x28a   :  { %v4254_v6 = vrot.slane %v4253_v47, 4  ;;  %v8186_v7 = vsel %vm12629_vm7, %v10102_v8, %v8185_v28  ;;  %v8189_v45 = vsel %vm12629_vm7, %v8187_v27, %v8188_v19  ;;  %v9589_v30 = vcombine.low %v4211_v39, %v4221_v58  ;;  %v11967_v39 = vld [vmem:[%s16388_s0 + $0x188] sm:$0x1]  ;;  %v11973_v31 = vld [vmem:[%s16388_s0 + $0x170] sm:$0x1] }
 0x28b   :  { %v4245_v63 = vsel %vm12093_vm3, %v4240_v54, %v4244_v33  ;;  %v4277_v33 = vor.u32 %v4276_v38, %v4273_v20  ;;  %v4290_v58 = vshll.u32 %v11967_v39, 16  ;;  %v10135_v23 = vcombine.low %v8186_v7, %v8189_v45  ;;  %v11974_v38 = vld [vmem:[%s16388_s0 + $0x1a0] sm:$0x1] }
 0x28c   :  { %v9590_v49 = vcombine.low %v4235_v1, %v4245_v63  ;;  %v4259_v55 = vsel %vm12093_vm3, %v4254_v6, %v15912_v48  ;;  %v4287_v48 = vor.u32 %v4286_v17, %v15977_v18  ;;  %v10103_v36 = vrot.slane %v10071_v43, 9  ;;  %v10073_v17 = vld [vmem:[%s16388_s0 + $0x174] sm:$0xe] }
 0x28d   :  { %11058 = vmatmul.mubr.msk.bf16.gmra.mrb[36].mxu0 %vm988_vm4, %v10130_v62  ;;  %v11966_v62 = vld [vmem:[%s16388_s0 + $0x190] sm:$0xf]  ;;  %v4319_v37 = vshrl.u32 %v9559_v44, 16  ;;  %v4322_v24 = vshll.u32 %v9559_v44, 16  ;;  %v4278_v47 = vrot.slane %v4277_v33, 4  ;;  %v4292_v2 = vrot.slane %v4290_v58, 5 }
 0x28e   :  { %11061 = vmatprep.mubr.msk.bf16.mxu0 %vm988_vm4, %v10131_v46  ;;  %v4304_v22 = vshll.u32 %v11966_v62, 16  ;;  %v4308_v9 = vshrl.u32 %v11966_v62, 16  ;;  %v4268_v46 = vrot.slane %v4266_v0, 5  ;;  %v11972_v0 = vld [vmem:[%s16388_s0 + $0x164] sm:$0x1]  ;;  %v4288_v8 = vrot.slane %v4287_v48, 4 }
 0x28f   :  { %10802 = vmatmul.mubr.msk.bf16.gmra.mrb[44].mxu1 %vm988_vm4, %v15792_v32  ;;  %v15975_v32 = vsel %vm12629_vm7, %v8180_v60, %v8181_v34  ;;  %v8195_v26 = vrot.slane %v11972_v0, 5  ;;  %v10104_v35 = vrot.slane %v10072_v4, 9  ;;  %v8202_v27 = vrot.slane %v11973_v31, 5  ;;  %v11977_v58 = vld [vmem:[%s16388_s0 + $0x17c] sm:$0x1] }
 0x290   :  { %10805 = vmatprep.mubr.msk.bf16.mxu1 %vm988_vm4, %v15827_v13  ;;  %v4297_v13 = vrot.slane %v4295_v53, 4  ;;  %v15983_v15 = vrot.slane %v4304_v22, 5  ;;  %v4310_v14 = vrot.slane %v4308_v9, 4  ;;  %v10134_v59 = vcombine.low %v15932_v5, %v15975_v32  ;;  %v10075_v4 = vld [vmem:[%s16388_s0 + $0x18c] sm:$0xe] }
 0x291   :  { %v4269_v52 = vsel %vm12093_vm3, %v4264_v12, %v4268_v46  ;;  %v8192_v5 = vrot.slane %v11968_v25, 5  ;;  %v4321_v56 = vrot.slane %v4319_v37, 4  ;;  %v4324_v19 = vrot.slane %v4322_v24, 5 }
 0x292   :  { %v4301_v50 = vor.u32 %v4300_v42, %v4297_v13  ;;  %v4311_v40 = vor.u32 %v4310_v14, %v15983_v15  ;;  %v9591_v60 = vcombine.low %v4259_v55, %v4269_v52  ;;  %v4283_v9 = vsel %vm12093_vm3, %v4278_v47, %v15977_v18  ;;  %v11975_v13 = vld [vmem:[%s16388_s0 + $0x178] sm:$0xf]  ;;  %v11976_v14 = vld [vmem:[%s16388_s0 + $0x184] sm:$0xf] }
 0x293   :  { %v8194_v16 = vrot.slane %v8192_v5, 4  ;;  %v8193_v1 = vsel %vm12629_vm7, %v10103_v36, %v8192_v5  ;;  %v4293_v63 = vsel %vm12093_vm3, %v4288_v8, %v4292_v2  ;;  %v4338_v18 = vshll.u32 %v11974_v38, 16 }
 0x294   :  { %v4302_v57 = vrot.slane %v4301_v50, 4  ;;  %v4312_v21 = vrot.slane %v4311_v40, 4  ;;  %v8206_v42 = vrot.slane %v11975_v13, 5  ;;  %v4325_v7 = vor.u32 %v4324_v19, %v4321_v56  ;;  %v11978_v50 = vld [vmem:[%s16388_s0 + $0x188] sm:$0x1] }
 0x295   :  { %11062 = vmatmul.mubr.msk.bf16.gmra.mrb[40].mxu0 %vm988_vm4, %v10132_v61  ;;  %v11969_v61 = vld [vmem:[%s16388_s0 + $0x194] sm:$0x1]  ;;  %v8196_v32 = vsel %vm12629_vm7, %v8194_v16, %v8195_v26  ;;  %v10105_v52 = vrot.slane %v10073_v17, 9  ;;  %v4340_v33 = vrot.slane %v4338_v18, 5  ;;  %v8209_v44 = vrot.slane %v11977_v58, 5 }
 0x296   :  { %11065 = vmatprep.mubr.msk.bf16.mxu0 %vm988_vm4, %v10133_v41  ;;  %v4314_v34 = vshll.u32 %v11969_v61, 16  ;;  %v11971_v41 = vld [vmem:[%s16388_s0 + $0x19c] sm:$0xf]  ;;  %v4307_v46 = vsel %vm12093_vm3, %v4302_v57, %v15983_v15  ;;  %v10074_v15 = vld [vmem:[%s16388_s0 + $0x180] sm:$0xe]  ;;  %v8208_v39 = vrot.slane %v8206_v42, 4 }
 0x297   :  { %10806 = vmatmul.mubr.msk.bf16.gmra.mrb[48].mxu1 %vm988_vm4, %v15908_v11  ;;  %v11970_v11 = vld [vmem:[%s16388_s0 + $0x16c] sm:$0xf]  ;;  %v4328_v51 = vshll.u32 %v11971_v41, 16  ;;  %v4332_v54 = vshrl.u32 %v11971_v41, 16  ;;  %v4326_v48 = vrot.slane %v4325_v7, 4  ;;  %v8216_v36 = vrot.slane %v11978_v50, 5 }
 0x298   :  { %v8199_v28 = vrot.slane %v11970_v11, 5  ;;  %10809 = vmatprep.mubr.msk.bf16.mxu1 %vm988_vm4, %v9589_v30  ;;  %v4316_v10 = vrot.slane %v4314_v34, 5  ;;  %v8213_v30 = vrot.slane %v11976_v14, 5  ;;  %v8207_v40 = vsel %vm12629_vm7, %v10105_v52, %v8206_v42  ;;  %v11979_v11 = vld [vmem:[%s16388_s0 + $0x190] sm:$0xf] }
 0x299   :  { %v4330_v62 = vrot.slane %v4328_v51, 5  ;;  %v4334_v22 = vrot.slane %v4332_v54, 4  ;;  %v8210_v61 = vsel %vm12629_vm7, %v8208_v39, %v8209_v44  ;;  %v11980_v51 = vld [vmem:[%s16388_s0 + $0x19c] sm:$0xf]  ;;  %v10107_v2 = vrot.slane %v10075_v4, 9 }
 0x29a   :  { %v8201_v53 = vrot.slane %v8199_v28, 4  ;;  %v8200_v6 = vsel %vm12629_vm7, %v10104_v35, %v8199_v28  ;;  %v4317_v12 = vsel %vm12093_vm3, %v4312_v21, %v4316_v10  ;;  %v8215_v5 = vrot.slane %v8213_v30, 4  ;;  %v11982_v21 = vld [vmem:[%s16388_s0 + $0x1a0] sm:$0x1] }
 0x29b   :  { %v4335_v45 = vor.u32 %v4334_v22, %v4330_v62  ;;  %v9593_v43 = vcombine.low %v4307_v46, %v4317_v12  ;;  %v8220_v28 = vrot.slane %v11979_v11, 5  ;;  %v4331_v37 = vsel %vm12093_vm3, %v4326_v48, %v4330_v62  ;;  %v10077_v22 = vld [vmem:[%s16388_s0 + $0x1a4] sm:$0xe]  ;;  %v11984_v46 = vld [vmem:[%s16388_s0 + $0x1ac] sm:$0x1] }
 0x29c   :  { %v8203_v20 = vsel %vm12629_vm7, %v8201_v53, %v8202_v27  ;;  %v8217_v41 = vsel %vm12629_vm7, %v8215_v5, %v8216_v36  ;;  %v8227_v54 = vrot.slane %v11980_v51, 5  ;;  %v10138_v47 = vcombine.low %v8207_v40, %v8210_v61  ;;  %v11983_v27 = vld [vmem:[%s16388_s0 + $0x1a8] sm:$0xf]  ;;  %v8998_v36 = vld [vmem:[%s16391_s3] sm:$0xff] }
 0x29d   :  { %11066 = vmatmul.mubr.msk.bf16.gmra.mrb[44].mxu0 %vm988_vm4, %v10134_v59  ;;  %v9592_v59 = vcombine.low %v4283_v9, %v4293_v63  ;;  %v10137_v55 = vcombine.low %v8200_v6, %v8203_v20  ;;  %v4336_v25 = vrot.slane %v4335_v45, 4  ;;  %v8222_v8 = vrot.slane %v8220_v28, 4  ;;  %v8999_v40 = vld [vmem:[%s16391_s3 + $0x8] sm:$0xff] }
 0x29e   :  { %11069 = vmatprep.mubr.msk.bf16.mxu0 %vm988_vm4, %v10135_v23  ;;  %v10106_v23 = vrot.slane %v10074_v15, 9  ;;  %v8223_v16 = vrot.slane %v11981_v29, 5  ;;  %v8229_v35 = vrot.slane %v8227_v54, 4  ;;  %v8230_v10 = vrot.slane %v11982_v21, 5  ;;  %v9004_v29 = vld [vmem:[%s16391_s3 + $0x30] sm:$0xff] }
 0x29f   :  { %10810 = vmatmul.mubr.msk.bf16.gmra.mrb[52].mxu1 %vm988_vm4, %v9590_v49  ;;  %v10136_v49 = vcombine.low %v8193_v1, %v8196_v32  ;;  %v4341_v24 = vsel %vm12093_vm3, %v4336_v25, %v4340_v33  ;;  %v8221_v53 = vsel %vm12629_vm7, %v10107_v2, %v8220_v28  ;;  %v8234_v56 = vrot.slane %v11983_v27, 5  ;;  %v9006_v27 = vld [vmem:[%s16391_s3 + $0x40] sm:$0xff] }
 0x2a0   :  { %10813 = vmatprep.mubr.msk.bf16.mxu1 %vm988_vm4, %v9591_v60  ;;  %v8214_v34 = vsel %vm12629_vm7, %v10106_v23, %v8213_v30  ;;  %v10076_v60 = vld [vmem:[%s16388_s0 + $0x198] sm:$0xe]  ;;  %v9594_v0 = vcombine.low %v4331_v37, %v4341_v24  ;;  %v8224_v31 = vsel %vm12629_vm7, %v8222_v8, %v8223_v16  ;;  %v8231_v62 = vsel %vm12629_vm7, %v8229_v35, %v8230_v10  ;;  %v9000_v24 = vld [vmem:[%s16391_s3 + $0x10] sm:$0xff] }
 0x2a1   :  { %v10139_v26 = vcombine.low %v8214_v34, %v8217_v41  ;;  %v10108_v57 = vrot.slane %v10076_v60, 9  ;;  %v10140_v9 = vcombine.low %v8221_v53, %v8224_v31  ;;  %v10109_v63 = vrot.slane %v10077_v22, 9  ;;  %v9001_v41 = vld [vmem:[%s16391_s3 + $0x18] sm:$0xff] }
 0x2a2   :  { %v8236_v32 = vrot.slane %v8234_v56, 4  ;;  %v8237_v6 = vrot.slane %v11984_v46, 5  ;;  %v12009_v61 = vmov 0.0|0.0   ;;  %v11121_v34 = vpack.c.bf16 %v8999_v40, %v8998_v36  ;;  %v9005_v16 = vld [vmem:[%s16391_s3 + $0x38] sm:$0xff] }
 0x2a3   :  { %v8228_v19 = vsel %vm12629_vm7, %v10108_v57, %v8227_v54  ;;  %v8235_v12 = vsel %vm12629_vm7, %v10109_v63, %v8234_v56  ;;  %11120 = vmatprep.subr.bf16.mxu1 %v12009_v61  ;;  %v11124_v51 = vpack.c.bf16 %v9001_v41, %v9000_v24  ;;  %v11130_v35 = vpack.c.bf16 %v9005_v16, %v9004_v29  ;;  %v9007_v56 = vld [vmem:[%s16391_s3 + $0x48] sm:$0xff] }
 0x2a4   :  { %v10141_v1 = vcombine.low %v8228_v19, %v8231_v62  ;;  %v8238_v20 = vsel %vm12629_vm7, %v8236_v32, %v8237_v6  ;;  %11122 = vmatpush3.bf16.msra.mxu1 %v11121_v34  ;;  %v16247_v62 = vld [vmem:[%s16390_s2] ss:$0 sm:$0xff]  ;;  %v9009_v34 = vld [vmem:[%s16391_s3 + $0x58] sm:$0xff] }
 0x2a5   :  { %11070 = vmatmul.mubr.msk.bf16.gmra.mrb[48].mxu0 %vm988_vm4, %v10136_v49  ;;  %v10142_v38 = vcombine.low %v8235_v12, %v8238_v20  ;;  %11123 = vmatprep.subr.bf16.mxu1 %v12009_v61 }
 0x2a6   :  { %11073 = vmatprep.mubr.msk.bf16.mxu0 %vm988_vm4, %v10137_v55 }
 0x2a7   :  { %10814 = vmatmul.mubr.msk.bf16.gmra.mrb[56].mxu1 %vm988_vm4, %v9592_v59 }
 0x2a8   :  { %10817 = vmatprep.mubr.msk.bf16.mxu1 %vm988_vm4, %v9593_v43  ;;  %11125 = vmatpush3.bf16.msra.mxu1 %v11124_v51 }
 0x2a9   :  { %11126 = vmatprep.subr.bf16.mxu1 %v12009_v61 }
 0x2ad   :  { %11074 = vmatmul.mubr.msk.bf16.gmra.mrb[52].mxu0 %vm988_vm4, %v10138_v47 }
 0x2ae   :  { %11077 = vmatprep.mubr.msk.bf16.mxu0 %vm988_vm4, %v10139_v26  ;;  %v9003_v26 = vld [vmem:[%s16391_s3 + $0x28] sm:$0xff] }
 0x2af   :  { %10818 = vmatmul.mubr.msk.bf16.gmra.mrb[60].mxu1 %vm988_vm4, %v9594_v0  ;;  %v9002_v0 = vld [vmem:[%s16391_s3 + $0x20] sm:$0xff] }
 0x2b0   :  { %v11127_v8 = vpack.c.bf16 %v9003_v26, %v9002_v0 }
 0x2b2   :  { %11128 = vmatpush3.bf16.msra.mxu1 %v11127_v8 }
 0x2b3   :  { %11129 = vmatprep.subr.bf16.mxu1 %v12009_v61 }
 0x2b5   :  { %11078 = vmatmul.mubr.msk.bf16.gmra.mrb[56].mxu0 %vm988_vm4, %v10140_v9  ;;  %v11133_v9 = vpack.c.bf16 %v9007_v56, %v9006_v27 }
 0x2b6   :  { %11081 = vmatprep.mubr.msk.bf16.mxu0 %vm988_vm4, %v10141_v1  ;;  %11131 = vmatpush3.bf16.msra.mxu1 %v11130_v35 }
 0x2b7   :  { %11132 = vmatprep.subr.bf16.mxu1 %v12009_v61 }
 0x2ba   :  { %11134 = vmatpush3.bf16.msra.mxu1 %v11133_v9 }
 0x2bb   :  { %11135 = vmatprep.subr.bf16.mxu1 %v12009_v61 }
 0x2bd   :  { %11082 = vmatmul.mubr.msk.bf16.gmra.mrb[60].mxu0 %vm988_vm4, %v10142_v38 }
 0x2d2   :  { %v10693_v18 = vpop.f32.mrb[0].mxu1 }
 0x2d3   :  { %v16139_v17 = vpop.f32.mrb[1].mxu1 }
 0x2d4   :  { %v16141_v13 = vpop.f32.mrb[2].mxu1 }
 0x2d5   :  { %v16143_v42 = vpop.f32.mrb[3].mxu1 }
 0x2da   :  { %v16145_v7 = vpop.f32.mrb[4].mxu1 }
 0x2db   :  { %v16147_v45 = vpop.f32.mrb[5].mxu1 }
 0x2dc   :  { %v16149_v15 = vpop.f32.mrb[6].mxu1 }
 0x2dd   :  { %v16151_v14 = vpop.f32.mrb[7].mxu1 }
 0x2e2   :  { %v16153_v3 = vpop.f32.mrb[8].mxu1 }
 0x2e3   :  { %v16155_v30 = vpop.f32.mrb[9].mxu1 }
 0x2e4   :  { %v16157_v49 = vpop.f32.mrb[10].mxu1 }
 0x2e5   :  { %v16159_v59 = vpop.f32.mrb[11].mxu1 }
 0x2ea   :  { %v16161_v43 = vpop.f32.mrb[12].mxu1 }
 0x2eb   :  { %v16163_v55 = vpop.f32.mrb[13].mxu1 }
 0x2ec   :  { %v16165_v52 = vpop.f32.mrb[14].mxu1 }
 0x2ed   :  { %v16167_v33 = vpop.f32.mrb[15].mxu1 }
 0x2f2   :  { %v16169_v39 = vpop.f32.mrb[16].mxu1 }
 0x2f3   :  { %v16171_v58 = vpop.f32.mrb[17].mxu1 }
 0x2f4   :  { %v16173_v44 = vpop.f32.mrb[18].mxu1 }
 0x2f5   :  { %v16175_v23 = vpop.f32.mrb[19].mxu1 }
 0x2fa   :  { %v16177_v48 = vpop.f32.mrb[20].mxu1 }
 0x2fb   :  { %v16179_v25 = vpop.f32.mrb[21].mxu1 }
 0x2fc   :  { %v16181_v5 = vpop.f32.mrb[22].mxu1 }
 0x2fd   :  { %v16183_v50 = vpop.f32.mrb[23].mxu1 }
 0x302   :  { %v16193_v4 = vpop.f32.mrb[24].mxu1 }
 0x303   :  { %v16195_v11 = vpop.f32.mrb[25].mxu1 }
 0x304   :  { %v16197_v28 = vpop.f32.mrb[26].mxu1 }
 0x305   :  { %v16199_v37 = vpop.f32.mrb[27].mxu1 }
 0x30a   :  { %v16208_v54 = vpop.f32.mrb[28].mxu1 }
 0x30b   :  { %v16210_v60 = vpop.f32.mrb[29].mxu1 }
 0x30c   :  { %v16212_v47 = vpop.f32.mrb[30].mxu1 }
 0x30d   :  { %v16214_v2 = vpop.f32.mrb[31].mxu1 }
 0x312   :  { %v16229_v57 = vpop.f32.mrb[32].mxu1 }
 0x313   :  { %v16231_v21 = vpop.f32.mrb[33].mxu1 }
 0x314   :  { %v16233_v10 = vpop.f32.mrb[34].mxu1 }
 0x315   :  { %v16235_v53 = vpop.f32.mrb[35].mxu1 }
 0x318   :  { %v11023_v31 = vpop.f32.mrb[0].mxu0 }
 0x319   :  { %v11146_v19 = vadd.f32 %v11023_v31, %v10693_v18  ;;  %v8470_v22 = vpop.f32.mrb[1].mxu0 }
 0x31a   :  { %v11147_v1 = vadd.f32 %v8470_v22, %v16139_v17  ;;  %v11024_v63 = vpop.f32.mrb[2].mxu0  ;;  %v9013_v22 = vld [vmem:[%s16391_s3 + $0x78] sm:$0xff] }
 0x31b   :  { %v11148_v32 = vadd.f32 %v11024_v63, %v16141_v13  ;;  %v8473_v46 = vpop.f32.mrb[3].mxu0  ;;  %v8798_v20 = vadd.f32 %v11146_v19, %v16247_v62  ;;  %v9008_v13 = vld [vmem:[%s16391_s3 + $0x50] sm:$0xff] }
 0x31c   :  { %v8796_v6 = vadd.f32 %v11147_v1, %v16247_v62  ;;  %v11149_v12 = vadd.f32 %v8473_v46, %v16143_v42  ;;  %v11136_v41 = vpack.c.bf16 %v9009_v34, %v9008_v13 }
 0x31d   :  { %v8799_v18 = vadd.f32 %v11148_v32, %v16247_v62  ;;  %v8862_v51 = vmax.f32 %v8798_v20, 0.0  ;;  %v12011_v32 = vmov 0.0  }
 0x31e   :  { %v8797_v38 = vadd.f32 %v11149_v12, %v16247_v62  ;;  %v8860_v36 = vmax.f32 %v8796_v6, 0.0  ;;  %11137 = vmatpush3.bf16.msra.mxu1 %v11136_v41  ;;  %11117 = vmatprep.mubr.msk.f32.mxu1 %vm12010_vm8, %v12011_v32 }
 0x31f   :  { %v8863_v29 = vmax.f32 %v8799_v18, 0.0  ;;  %11138 = vmatprep.subr.bf16.mxu1 %v12009_v61 }
 0x320   :  { %v8861_v40 = vmax.f32 %v8797_v38, 0.0  ;;  %v11027_v17 = vpop.f32.mrb[4].mxu0 }
 0x321   :  { %v11150_v42 = vadd.f32 %v11027_v17, %v16145_v7  ;;  %v8486_v24 = vpop.f32.mrb[5].mxu0  ;;  %v9010_v7 = vld [vmem:[%s16391_s3 + $0x60] sm:$0xff] }
 0x322   :  { %v8924_v0 = vadd.f32 %v8861_v40, %v8860_v36  ;;  %v11151_v26 = vadd.f32 %v8486_v24, %v16147_v45  ;;  %v11028_v8 = vpop.f32.mrb[6].mxu0  ;;  %v9011_v45 = vld [vmem:[%s16391_s3 + $0x68] sm:$0xff] }
 0x323   :  { %v11152_v16 = vadd.f32 %v11028_v8, %v16149_v15  ;;  %v8489_v35 = vpop.f32.mrb[7].mxu0  ;;  %v9012_v15 = vld [vmem:[%s16391_s3 + $0x70] sm:$0xff]  ;;  %v11139_v19 = vpack.c.bf16 %v9011_v45, %v9010_v7 }
 0x324   :  { %v8925_v31 = vadd.f32 %v8924_v0, %v8862_v51  ;;  %v8800_v27 = vadd.f32 %v11151_v26, %v16247_v62  ;;  %v11153_v56 = vadd.f32 %v8489_v35, %v16151_v14  ;;  %v8802_v14 = vadd.f32 %v11150_v42, %v16247_v62 }
 0x325   :  { %11140 = vmatpush3.bf16.msra.mxu1 %v11139_v19  ;;  %v11142_v46 = vpack.c.bf16 %v9013_v22, %v9012_v15  ;;  %v8803_v12 = vadd.f32 %v11152_v16, %v16247_v62 }
 0x326   :  { %v8864_v9 = vmax.f32 %v8800_v27, 0.0  ;;  %v8926_v1 = vadd.f32 %v8925_v31, %v8863_v29  ;;  %v8801_v63 = vadd.f32 %v11153_v56, %v16247_v62  ;;  %11141 = vmatprep.subr.bf16.mxu1 %v12009_v61  ;;  %v8866_v40 = vmax.f32 %v8802_v14, 0.0 }
 0x327   :  { %v8867_v41 = vmax.f32 %v8803_v12, 0.0 }
 0x328   :  { %v8927_v6 = vadd.f32 %v8926_v1, %v8864_v9  ;;  %v8865_v20 = vmax.f32 %v8801_v63, 0.0  ;;  %v11031_v38 = vpop.f32.mrb[8].mxu0 }
 0x329   :  { %v11154_v18 = vadd.f32 %v11031_v38, %v16153_v3  ;;  %v8502_v36 = vpop.f32.mrb[9].mxu0  ;;  %11143 = vmatpush3.bf16.msra.mxu1 %v11142_v46 }
 0x32a   :  { %v8928_v17 = vadd.f32 %v8927_v6, %v8865_v20  ;;  %v11155_v13 = vadd.f32 %v8502_v36, %v16155_v30  ;;  %v11032_v34 = vpop.f32.mrb[10].mxu0 }
 0x32b   :  { %v11156_v42 = vadd.f32 %v11032_v34, %v16157_v49  ;;  %v8505_v24 = vpop.f32.mrb[11].mxu0  ;;  %v8806_v61 = vadd.f32 %v11154_v18, %v16247_v62 }
 0x32c   :  { %v8929_v51 = vadd.f32 %v8928_v17, %v8866_v40  ;;  %v8804_v0 = vadd.f32 %v11155_v13, %v16247_v62  ;;  %v11157_v26 = vadd.f32 %v8505_v24, %v16159_v59 }
 0x32d   :  { %v8807_v30 = vadd.f32 %v11156_v42, %v16247_v62  ;;  %v8870_v56 = vmax.f32 %v8806_v61, 0.0 }
 0x32e   :  { %v8868_v8 = vmax.f32 %v8804_v0, 0.0  ;;  %v8930_v3 = vadd.f32 %v8929_v51, %v8867_v41  ;;  %v8805_v29 = vadd.f32 %v11157_v26, %v16247_v62 }
 0x32f   :  { %v8871_v22 = vmax.f32 %v8807_v30, 0.0 }
 0x330   :  { %v8931_v16 = vadd.f32 %v8930_v3, %v8868_v8  ;;  %v8869_v35 = vmax.f32 %v8805_v29, 0.0  ;;  %v11035_v31 = vpop.f32.mrb[12].mxu0 }
 0x331   :  { %v11158_v49 = vadd.f32 %v11035_v31, %v16161_v43  ;;  %v8518_v27 = vpop.f32.mrb[13].mxu0 }
 0x332   :  { %v8932_v7 = vadd.f32 %v8931_v16, %v8869_v35  ;;  %v11159_v45 = vadd.f32 %v8518_v27, %v16163_v55  ;;  %v11036_v15 = vpop.f32.mrb[14].mxu0 }
 0x333   :  { %v11160_v59 = vadd.f32 %v11036_v15, %v16165_v52  ;;  %v8521_v19 = vpop.f32.mrb[15].mxu0  ;;  %v8810_v63 = vadd.f32 %v11158_v49, %v16247_v62 }
 0x334   :  { %v8933_v14 = vadd.f32 %v8932_v7, %v8870_v56  ;;  %v8808_v9 = vadd.f32 %v11159_v45, %v16247_v62  ;;  %v11161_v1 = vadd.f32 %v8521_v19, %v16167_v33 }
 0x335   :  { %v8811_v12 = vadd.f32 %v11160_v59, %v16247_v62  ;;  %v8874_v18 = vmax.f32 %v8810_v63, 0.0 }
 0x336   :  { %v8872_v32 = vmax.f32 %v8808_v9, 0.0  ;;  %v8934_v46 = vadd.f32 %v8933_v14, %v8871_v22  ;;  %v8809_v43 = vadd.f32 %v11161_v1, %v16247_v62 }
 0x337   :  { %v8875_v34 = vmax.f32 %v8811_v12, 0.0 }
 0x338   :  { %v8935_v6 = vadd.f32 %v8934_v46, %v8872_v32  ;;  %v8873_v55 = vmax.f32 %v8809_v43, 0.0  ;;  %v11039_v20 = vpop.f32.mrb[16].mxu0 }
 0x339   :  { %v11162_v52 = vadd.f32 %v11039_v20, %v16169_v39  ;;  %v8534_v38 = vpop.f32.mrb[17].mxu0 }
 0x33a   :  { %v8936_v36 = vadd.f32 %v8935_v6, %v8873_v55  ;;  %v11163_v40 = vadd.f32 %v8534_v38, %v16171_v58  ;;  %v11040_v17 = vpop.f32.mrb[18].mxu0 }
 0x33b   :  { %v11164_v33 = vadd.f32 %v11040_v17, %v16173_v44  ;;  %v8537_v13 = vpop.f32.mrb[19].mxu0  ;;  %v8814_v51 = vadd.f32 %v11162_v52, %v16247_v62 }
 0x33c   :  { %v8937_v42 = vadd.f32 %v8936_v36, %v8874_v18  ;;  %v8812_v24 = vadd.f32 %v11163_v40, %v16247_v62  ;;  %v11165_v41 = vadd.f32 %v8537_v13, %v16175_v23 }
 0x33d   :  { %v8815_v8 = vadd.f32 %v11164_v33, %v16247_v62  ;;  %v8878_v16 = vmax.f32 %v8814_v51, 0.0 }
 0x33e   :  { %v8876_v0 = vmax.f32 %v8812_v24, 0.0  ;;  %v8938_v26 = vadd.f32 %v8937_v42, %v8875_v34  ;;  %v8813_v39 = vadd.f32 %v11165_v41, %v16247_v62 }
 0x33f   :  { %v8879_v27 = vmax.f32 %v8815_v8, 0.0 }
 0x340   :  { %v8939_v61 = vadd.f32 %v8938_v26, %v8876_v0  ;;  %v8877_v58 = vmax.f32 %v8813_v39, 0.0  ;;  %v11043_v3 = vpop.f32.mrb[20].mxu0 }
 0x341   :  { %v11166_v44 = vadd.f32 %v11043_v3, %v16177_v48  ;;  %v8550_v29 = vpop.f32.mrb[21].mxu0 }
 0x342   :  { %v8940_v30 = vadd.f32 %v8939_v61, %v8877_v58  ;;  %v11167_v35 = vadd.f32 %v8550_v29, %v16179_v25  ;;  %v11044_v31 = vpop.f32.mrb[22].mxu0 }
 0x343   :  { %v11168_v23 = vadd.f32 %v11044_v31, %v16181_v5  ;;  %v8553_v49 = vpop.f32.mrb[23].mxu0  ;;  %v8818_v15 = vadd.f32 %v11166_v44, %v16247_v62 }
 0x344   :  { %v8941_v56 = vadd.f32 %v8940_v30, %v8878_v16  ;;  %v8816_v7 = vadd.f32 %v11167_v35, %v16247_v62  ;;  %v11169_v45 = vadd.f32 %v8553_v49, %v16183_v50 }
 0x345   :  { %v8819_v14 = vadd.f32 %v11168_v23, %v16247_v62  ;;  %v8882_v63 = vmax.f32 %v8818_v15, 0.0 }
 0x346   :  { %v8880_v59 = vmax.f32 %v8816_v7, 0.0  ;;  %v8942_v19 = vadd.f32 %v8941_v56, %v8879_v27  ;;  %v8817_v48 = vadd.f32 %v11169_v45, %v16247_v62 }
 0x347   :  { %v8883_v12 = vmax.f32 %v8819_v14, 0.0 }
 0x348   :  { %v8943_v22 = vadd.f32 %v8942_v19, %v8880_v59  ;;  %v8881_v25 = vmax.f32 %v8817_v48, 0.0  ;;  %v11047_v9 = vpop.f32.mrb[24].mxu0 }
 0x349   :  { %v11170_v5 = vadd.f32 %v11047_v9, %v16193_v4  ;;  %v8566_v1 = vpop.f32.mrb[25].mxu0 }
 0x34a   :  { %v8944_v32 = vadd.f32 %v8943_v22, %v8881_v25  ;;  %v11171_v46 = vadd.f32 %v8566_v1, %v16195_v11  ;;  %v11048_v43 = vpop.f32.mrb[26].mxu0 }
 0x34b   :  { %v11172_v50 = vadd.f32 %v11048_v43, %v16197_v28  ;;  %v8569_v6 = vpop.f32.mrb[27].mxu0  ;;  %v8822_v38 = vadd.f32 %v11170_v5, %v16247_v62 }
 0x34c   :  { %v8945_v55 = vadd.f32 %v8944_v32, %v8882_v63  ;;  %v8820_v20 = vadd.f32 %v11171_v46, %v16247_v62  ;;  %v11173_v52 = vadd.f32 %v8569_v6, %v16199_v37 }
 0x34d   :  { %v8823_v17 = vadd.f32 %v11172_v50, %v16247_v62  ;;  %v8886_v42 = vmax.f32 %v8822_v38, 0.0 }
 0x34e   :  { %v8884_v18 = vmax.f32 %v8820_v20, 0.0  ;;  %v8946_v36 = vadd.f32 %v8945_v55, %v8883_v12  ;;  %v8821_v4 = vadd.f32 %v11173_v52, %v16247_v62 }
 0x34f   :  { %v8887_v61 = vmax.f32 %v8823_v17, 0.0 }
 0x350   :  { %v8947_v40 = vadd.f32 %v8946_v36, %v8884_v18  ;;  %v8885_v11 = vmax.f32 %v8821_v4, 0.0  ;;  %v11051_v33 = vpop.f32.mrb[28].mxu0 }
 0x351   :  { %v11174_v28 = vadd.f32 %v11051_v33, %v16208_v54  ;;  %v8582_v34 = vpop.f32.mrb[29].mxu0 }
 0x352   :  { %v10795_v13 = vpop.f32.mrb[36].mxu1  ;;  %v8948_v24 = vadd.f32 %v8947_v40, %v8885_v11  ;;  %v11175_v37 = vadd.f32 %v8582_v34, %v16210_v60  ;;  %v11052_v51 = vpop.f32.mrb[30].mxu0 }
 0x353   :  { %v4717_v41 = vpop.f32.mrb[37].mxu1  ;;  %v11176_v26 = vadd.f32 %v11052_v51, %v16212_v47  ;;  %v8585_v39 = vpop.f32.mrb[31].mxu0  ;;  %v8826_v54 = vadd.f32 %v11174_v28, %v16247_v62 }
 0x354   :  { %v10796_v0 = vpop.f32.mrb[38].mxu1  ;;  %v8949_v8 = vadd.f32 %v8948_v24, %v8886_v42  ;;  %v8824_v58 = vadd.f32 %v11175_v37, %v16247_v62  ;;  %v11177_v44 = vadd.f32 %v8585_v39, %v16214_v2 }
 0x355   :  { %v4720_v3 = vpop.f32.mrb[39].mxu1  ;;  %v8827_v60 = vadd.f32 %v11176_v26, %v16247_v62  ;;  %v8890_v56 = vmax.f32 %v8826_v54, 0.0 }
 0x356   :  { %v8888_v29 = vmax.f32 %v8824_v58, 0.0  ;;  %v8950_v16 = vadd.f32 %v8949_v8, %v8887_v61  ;;  %v8825_v30 = vadd.f32 %v11177_v44, %v16247_v62 }
 0x357   :  { %v8891_v22 = vmax.f32 %v8827_v60, 0.0 }
 0x358   :  { %v8951_v35 = vadd.f32 %v8950_v16, %v8888_v29  ;;  %v8889_v31 = vmax.f32 %v8825_v30, 0.0  ;;  %v11055_v23 = vpop.f32.mrb[32].mxu0 }
 0x359   :  { %v11178_v49 = vadd.f32 %v11055_v23, %v16229_v57  ;;  %v8598_v27 = vpop.f32.mrb[33].mxu0 }
 0x35a   :  { %v10799_v47 = vpop.f32.mrb[40].mxu1  ;;  %v8952_v7 = vadd.f32 %v8951_v35, %v8889_v31  ;;  %v11179_v2 = vadd.f32 %v8598_v27, %v16231_v21  ;;  %v11056_v15 = vpop.f32.mrb[34].mxu0 }
 0x35b   :  { %v4733_v45 = vpop.f32.mrb[41].mxu1  ;;  %v11180_v19 = vadd.f32 %v11056_v15, %v16233_v10  ;;  %v8601_v48 = vpop.f32.mrb[35].mxu0  ;;  %v8830_v57 = vadd.f32 %v11178_v49, %v16247_v62 }
 0x35c   :  { %v10800_v59 = vpop.f32.mrb[42].mxu1  ;;  %v8953_v14 = vadd.f32 %v8952_v7, %v8890_v56  ;;  %v8828_v25 = vadd.f32 %v11179_v2, %v16247_v62  ;;  %v11181_v5 = vadd.f32 %v8601_v48, %v16235_v53 }
 0x35d   :  { %v4736_v9 = vpop.f32.mrb[43].mxu1  ;;  %v8831_v21 = vadd.f32 %v11180_v19, %v16247_v62  ;;  %v8894_v12 = vmax.f32 %v8830_v57, 0.0 }
 0x35e   :  { %v16338_v1 = vadd.f32 %v8953_v14, %v8891_v22  ;;  %v8829_v63 = vadd.f32 %v11181_v5, %v16247_v62  ;;  %v8892_v32 = vmax.f32 %v8828_v25, 0.0 }
 0x35f   :  { %v8895_v4 = vmax.f32 %v8831_v21, 0.0 }
 0x360   :  { %v8893_v46 = vmax.f32 %v8829_v63, 0.0  ;;  %v11059_v43 = vpop.f32.mrb[36].mxu0 }
 0x361   :  { %v11182_v50 = vadd.f32 %v11059_v43, %v10795_v13  ;;  %v8614_v6 = vpop.f32.mrb[37].mxu0 }
 0x362   :  { %v10803_v10 = vpop.f32.mrb[44].mxu1  ;;  %v8961_v55 = vadd.f32 %v8893_v46, %v8892_v32  ;;  %v11183_v52 = vadd.f32 %v8614_v6, %v4717_v41  ;;  %v11060_v38 = vpop.f32.mrb[38].mxu0 }
 0x363   :  { %v4749_v20 = vpop.f32.mrb[45].mxu1  ;;  %v11184_v18 = vadd.f32 %v11060_v38, %v10796_v0  ;;  %v8617_v36 = vpop.f32.mrb[39].mxu0  ;;  %v8834_v28 = vadd.f32 %v11182_v50, %v16247_v62 }
 0x364   :  { %v10804_v53 = vpop.f32.mrb[46].mxu1  ;;  %v8962_v40 = vadd.f32 %v8961_v55, %v8894_v12  ;;  %v8832_v17 = vadd.f32 %v11183_v52, %v16247_v62  ;;  %v11185_v33 = vadd.f32 %v8617_v36, %v4720_v3 }
 0x365   :  { %v4752_v11 = vpop.f32.mrb[47].mxu1  ;;  %v8835_v37 = vadd.f32 %v11184_v18, %v16247_v62  ;;  %v8898_v61 = vmax.f32 %v8834_v28, 0.0 }
 0x366   :  { %v8896_v34 = vmax.f32 %v8832_v17, 0.0  ;;  %v8963_v42 = vadd.f32 %v8962_v40, %v8895_v4  ;;  %v8833_v13 = vadd.f32 %v11185_v33, %v16247_v62 }
 0x367   :  { %v8899_v30 = vmax.f32 %v8835_v37, 0.0 }
 0x368   :  { %v8964_v24 = vadd.f32 %v8963_v42, %v8896_v34  ;;  %v8897_v41 = vmax.f32 %v8833_v13, 0.0  ;;  %v11063_v51 = vpop.f32.mrb[40].mxu0 }
 0x369   :  { %v11186_v0 = vadd.f32 %v11063_v51, %v10799_v47  ;;  %v8630_v39 = vpop.f32.mrb[41].mxu0 }
 0x36a   :  { %v10807_v26 = vpop.f32.mrb[48].mxu1  ;;  %v8965_v8 = vadd.f32 %v8964_v24, %v8897_v41  ;;  %v11187_v44 = vadd.f32 %v8630_v39, %v4733_v45  ;;  %v11064_v54 = vpop.f32.mrb[42].mxu0 }
 0x36b   :  { %v4765_v58 = vpop.f32.mrb[49].mxu1  ;;  %v11188_v29 = vadd.f32 %v11064_v54, %v10800_v59  ;;  %v8633_v16 = vpop.f32.mrb[43].mxu0  ;;  %v8838_v49 = vadd.f32 %v11186_v0, %v16247_v62 }
 0x36c   :  { %v10808_v3 = vpop.f32.mrb[50].mxu1  ;;  %v8966_v35 = vadd.f32 %v8965_v8, %v8898_v61  ;;  %v8836_v60 = vadd.f32 %v11187_v44, %v16247_v62  ;;  %v11189_v23 = vadd.f32 %v8633_v16, %v4736_v9 }
 0x36d   :  { %v4768_v31 = vpop.f32.mrb[51].mxu1  ;;  %v8839_v2 = vadd.f32 %v11188_v29, %v16247_v62  ;;  %v8902_v22 = vmax.f32 %v8838_v49, 0.0 }
 0x36e   :  { %v8900_v27 = vmax.f32 %v8836_v60, 0.0  ;;  %v8967_v56 = vadd.f32 %v8966_v35, %v8899_v30  ;;  %v8837_v47 = vadd.f32 %v11189_v23, %v16247_v62 }
 0x36f   :  { %v8903_v21 = vmax.f32 %v8839_v2, 0.0 }
 0x370   :  { %v8968_v7 = vadd.f32 %v8967_v56, %v8900_v27  ;;  %v8901_v45 = vmax.f32 %v8837_v47, 0.0  ;;  %v11067_v15 = vpop.f32.mrb[44].mxu0 }
 0x371   :  { %v11190_v59 = vadd.f32 %v11067_v15, %v10803_v10  ;;  %v8646_v48 = vpop.f32.mrb[45].mxu0 }
 0x372   :  { %v10811_v19 = vpop.f32.mrb[52].mxu1  ;;  %v8969_v14 = vadd.f32 %v8968_v7, %v8901_v45  ;;  %v11191_v5 = vadd.f32 %v8646_v48, %v4749_v20  ;;  %v11068_v57 = vpop.f32.mrb[46].mxu0 }
 0x373   :  { %v4781_v25 = vpop.f32.mrb[53].mxu1  ;;  %v11192_v63 = vadd.f32 %v11068_v57, %v10804_v53  ;;  %v8649_v32 = vpop.f32.mrb[47].mxu0  ;;  %v8842_v12 = vadd.f32 %v11190_v59, %v16247_v62 }
 0x374   :  { %v10812_v9 = vpop.f32.mrb[54].mxu1  ;;  %v8970_v46 = vadd.f32 %v8969_v14, %v8902_v22  ;;  %v8840_v43 = vadd.f32 %v11191_v5, %v16247_v62  ;;  %v11193_v6 = vadd.f32 %v8649_v32, %v4752_v11 }
 0x375   :  { %v4784_v50 = vpop.f32.mrb[55].mxu1  ;;  %v8843_v18 = vadd.f32 %v11192_v63, %v16247_v62  ;;  %v8906_v17 = vmax.f32 %v8842_v12, 0.0 }
 0x376   :  { %v8904_v55 = vmax.f32 %v8840_v43, 0.0  ;;  %v8971_v52 = vadd.f32 %v8970_v46, %v8903_v21  ;;  %v8841_v10 = vadd.f32 %v11193_v6, %v16247_v62 }
 0x377   :  { %v8907_v37 = vmax.f32 %v8843_v18, 0.0 }
 0x378   :  { %v8972_v38 = vadd.f32 %v8971_v52, %v8904_v55  ;;  %v8905_v20 = vmax.f32 %v8841_v10, 0.0  ;;  %v11071_v36 = vpop.f32.mrb[48].mxu0 }
 0x379   :  { %v11194_v53 = vadd.f32 %v11071_v36, %v10807_v26  ;;  %v8662_v40 = vpop.f32.mrb[49].mxu0 }
 0x37a   :  { %v10815_v4 = vpop.f32.mrb[56].mxu1  ;;  %v8973_v33 = vadd.f32 %v8972_v38, %v8905_v20  ;;  %v11195_v34 = vadd.f32 %v8662_v40, %v4765_v58  ;;  %v11072_v42 = vpop.f32.mrb[50].mxu0 }
 0x37b   :  { %v4797_v28 = vpop.f32.mrb[57].mxu1  ;;  %v11196_v13 = vadd.f32 %v11072_v42, %v10808_v3  ;;  %v8665_v24 = vpop.f32.mrb[51].mxu0  ;;  %v8846_v61 = vadd.f32 %v11194_v53, %v16247_v62 }
 0x37c   :  { %v10816_v11 = vpop.f32.mrb[58].mxu1  ;;  %v8974_v41 = vadd.f32 %v8973_v33, %v8906_v17  ;;  %v8844_v51 = vadd.f32 %v11195_v34, %v16247_v62  ;;  %v11197_v39 = vadd.f32 %v8665_v24, %v4768_v31 }
 0x37d   :  { %v4800_v0 = vpop.f32.mrb[59].mxu1  ;;  %v8847_v29 = vadd.f32 %v11196_v13, %v16247_v62  ;;  %v8910_v60 = vmax.f32 %v8846_v61, 0.0 }
 0x37e   :  { %v8908_v8 = vmax.f32 %v8844_v51, 0.0  ;;  %v8975_v44 = vadd.f32 %v8974_v41, %v8907_v37  ;;  %v8845_v26 = vadd.f32 %v11197_v39, %v16247_v62 }
 0x37f   :  { %v8911_v2 = vmax.f32 %v8847_v29, 0.0 }
 0x380   :  { %v8976_v54 = vadd.f32 %v8975_v44, %v8908_v8  ;;  %v8909_v58 = vmax.f32 %v8845_v26, 0.0  ;;  %v11075_v16 = vpop.f32.mrb[52].mxu0  ;;  %v8955_v44 = vrot.slane %v16338_v1, 4 }
 0x381   :  { %v11198_v3 = vadd.f32 %v11075_v16, %v10811_v19  ;;  %v8678_v35 = vpop.f32.mrb[53].mxu0 }
 0x382   :  { %v10819_v30 = vpop.f32.mrb[60].mxu1  ;;  %v8977_v23 = vadd.f32 %v8976_v54, %v8909_v58  ;;  %v11199_v27 = vadd.f32 %v8678_v35, %v4781_v25  ;;  %v11076_v56 = vpop.f32.mrb[54].mxu0  ;;  %v8956_v35 = vadd.f32 %v8955_v44, %v16338_v1  ;;  %v10176_v1 = vld [vmem:[%s16392_s4] ss:$0 sm:$0xff] }
 0x383   :  { %v4813_v49 = vpop.f32.mrb[61].mxu1  ;;  %v11200_v47 = vadd.f32 %v11076_v56, %v10812_v9  ;;  %v8681_v7 = vpop.f32.mrb[55].mxu0  ;;  %v8850_v22 = vadd.f32 %v11198_v3, %v16247_v62 }
 0x384   :  { %v10820_v31 = vpop.f32.mrb[62].mxu1  ;;  %v8978_v45 = vadd.f32 %v8977_v23, %v8910_v60  ;;  %v8848_v15 = vadd.f32 %v11199_v27, %v16247_v62  ;;  %v11201_v48 = vadd.f32 %v8681_v7, %v4784_v50  ;;  %v8957_v56 = vrot.slane %v8956_v35, 2 }
 0x385   :  { %v4816_v59 = vpop.f32.mrb[63].mxu1  ;;  %v8851_v63 = vadd.f32 %v11200_v47, %v16247_v62  ;;  %v8914_v46 = vmax.f32 %v8850_v22, 0.0 }
 0x386   :  { %v8912_v14 = vmax.f32 %v8848_v15, 0.0  ;;  %v8979_v5 = vadd.f32 %v8978_v45, %v8911_v2  ;;  %v8849_v19 = vadd.f32 %v11201_v48, %v16247_v62  ;;  %v8958_v2 = vadd.f32 %v8957_v56, %v8956_v35 }
 0x387   :  { %v8915_v50 = vmax.f32 %v8851_v63, 0.0 }
 0x388   :  { %v8980_v57 = vadd.f32 %v8979_v5, %v8912_v14  ;;  %v8913_v25 = vmax.f32 %v8849_v19, 0.0  ;;  %v11079_v32 = vpop.f32.mrb[56].mxu0  ;;  %v8959_v15 = vrot.slane %v8958_v2, 1 }
 0x389   :  { %v11202_v21 = vadd.f32 %v11079_v32, %v10815_v4  ;;  %v8694_v9 = vpop.f32.mrb[57].mxu0 }
 0x38a   :  { %v8981_v43 = vadd.f32 %v8980_v57, %v8913_v25  ;;  %v11203_v6 = vadd.f32 %v8694_v9, %v4797_v28  ;;  %v11080_v12 = vpop.f32.mrb[58].mxu0  ;;  %v8960_v22 = vadd.f32 %v8959_v15, %v8958_v2 }
 0x38b   :  { %v11204_v55 = vadd.f32 %v11080_v12, %v10816_v11  ;;  %v8697_v52 = vpop.f32.mrb[59].mxu0  ;;  %v8854_v20 = vadd.f32 %v11202_v21, %v16247_v62 }
 0x38c   :  { %v8982_v10 = vadd.f32 %v8981_v43, %v8914_v46  ;;  %v8852_v38 = vadd.f32 %v11203_v6, %v16247_v62  ;;  %v11205_v18 = vadd.f32 %v8697_v52, %v4800_v0 }
 0x38d   :  { %v8855_v4 = vadd.f32 %v11204_v55, %v16247_v62  ;;  %v8918_v11 = vmax.f32 %v8854_v20, 0.0 }
 0x38e   :  { %v8916_v36 = vmax.f32 %v8852_v38, 0.0  ;;  %v8983_v53 = vadd.f32 %v8982_v10, %v8915_v50  ;;  %v8853_v40 = vadd.f32 %v11205_v18, %v16247_v62 }
 0x38f   :  { %v8919_v0 = vmax.f32 %v8855_v4, 0.0 }
 0x390   :  { %v8984_v17 = vadd.f32 %v8983_v53, %v8916_v36  ;;  %v8917_v33 = vmax.f32 %v8853_v40, 0.0  ;;  %v11083_v34 = vpop.f32.mrb[60].mxu0 }
 0x391   :  { %v11206_v28 = vadd.f32 %v11083_v34, %v10819_v30  ;;  %v8710_v42 = vpop.f32.mrb[61].mxu0 }
 0x392   :  { %v8985_v13 = vadd.f32 %v8984_v17, %v8917_v33  ;;  %v11207_v24 = vadd.f32 %v8710_v42, %v4813_v49  ;;  %v11084_v37 = vpop.f32.mrb[62].mxu0 }
 0x393   :  { %v11208_v41 = vadd.f32 %v11084_v37, %v10820_v31  ;;  %v8713_v51 = vpop.f32.mrb[63].mxu0  ;;  %v8858_v26 = vadd.f32 %v11206_v28, %v16247_v62 }
 0x394   :  { %v8986_v39 = vadd.f32 %v8985_v13, %v8918_v11  ;;  %v8856_v61 = vadd.f32 %v11207_v24, %v16247_v62  ;;  %v11209_v8 = vadd.f32 %v8713_v51, %v4816_v59 }
 0x395   :  { %v8859_v30 = vadd.f32 %v11208_v41, %v16247_v62  ;;  %v8922_v60 = vmax.f32 %v8858_v26, 0.0 }
 0x396   :  { %v8920_v54 = vmax.f32 %v8856_v61, 0.0  ;;  %v8987_v29 = vadd.f32 %v8986_v39, %v8919_v0  ;;  %v8857_v58 = vadd.f32 %v11209_v8, %v16247_v62 }
 0x397   :  { %v8923_v49 = vmax.f32 %v8859_v30, 0.0 }
 0x398   :  { %v8988_v16 = vadd.f32 %v8987_v29, %v8920_v54  ;;  %v8921_v3 = vmax.f32 %v8857_v58, 0.0 }
 0x39a   :  { %v8989_v23 = vadd.f32 %v8988_v16, %v8921_v3 }
 0x39c   :  { %v8990_v27 = vadd.f32 %v8989_v23, %v8922_v60 }
 0x39e   :  { %v8991_v31 = vadd.f32 %v8990_v27, %v8923_v49 }
 0x3a0   :  { %v8992_v47 = vrot.slane %v8991_v31, 4 }
 0x3a2   :  { %v8993_v7 = vadd.f32 %v8992_v47, %v8991_v31 }
 0x3a4   :  { %v8994_v45 = vrot.slane %v8993_v7, 2 }
 0x3a6   :  { %v8995_v59 = vadd.f32 %v8994_v45, %v8993_v7 }
 0x3a8   :  { %v8996_v48 = vrot.slane %v8995_v59, 1 }
 0x3aa   :  { %v8997_v14 = vadd.f32 %v8996_v48, %v8995_v59 }
 0x3ac   :  { %v9024_v62 = vsel %vm9023_vm9, %v8997_v14, %v8960_v22 }
 0x3ad   :  { %11118 = vmatmul.mubr.f32.vlgmr.msra.gmra.mrb[64].mxu1 %v9024_v62 }
 0x480   :  { %v9092_v5 = vpop.f32.mrb[64].mxu1 }
 0x481   :  { %v9093_v19 = vadd.f32 %v10176_v1, %v9092_v5  ;;  %v11119_v57 = vpop.f32.mrb[65].mxu1 }
 0x483   :  { %9096 = vst [vmem:[#allocation2] sm:$0x3] %v9093_v19 }
 0x484   :  { %11996 = shalt.err (!%p11993_p4)
}
 0x485   :  { %s11997_s27 = scalar_lea.hbm %s16393_s5, 32 }
 0x486   :  { %p11998_p5 = scmp.ne.s32.totalorder %s16393_s5, %s11997_s27  ;;  %p12001_p6 = scmp.lt.u32.totalorder %s11997_s27, %s16393_s5 }
 0x488   :  { %p12003_p7 = pnand %p12001_p6, %p11998_p5 }
 0x48a   :  { %12006 = shalt.err (!%p12003_p7)
}
 0x48b   :  { %9106 = dma.vmem_to_hbm [thread:$0]  %s9104_s23, 32, %s16393_s5, [#allocation3]  }
 0x48c   :  { %12007 = dma.done.wait [#allocation3], 32  }
 0x48d   :  { %12008 = vsyncadd [#allocation3], 4294967264 }
 0x48e   :  { %9110 = vsyncpa [#allocation3], 1 }

</bundles_post_ra>
